<compile_context>
chip_gen: v7x
topology: tpu7x:2x2x1
jax: 0.10.0
libtpu: 0.0.40
codegen_flags: <defaults>
</compile_context>

<pallas_src>
import jax
import jax.numpy as jnp
from jax.experimental import pallas as pl
from jax.experimental.pallas import tpu as pltpu


# ----------------------------------------------------------------------------
# Kernel A: fused vid2hid (Linear + ReLU) + LSTM input projections (both dirs)
#   gf = relu(x @ Wv + bv) @ W_ih_f + (b_ih_f + b_hh_f)
#   gb = relu(x @ Wv + bv) @ W_ih_b + (b_ih_b + b_hh_b)
# Tiled over B*T rows; bf16 matmul operands, f32 accumulation.
# ----------------------------------------------------------------------------
def proj_kernel(x_ref, wv_ref, bv_ref, wif_ref, bf_ref, wib_ref, bb_ref,
                gf_ref, gb_ref):
    x = x_ref[...].astype(jnp.bfloat16)
    wv = wv_ref[...].astype(jnp.bfloat16)
    hid = jnp.dot(x, wv, preferred_element_type=jnp.float32) + bv_ref[...]
    hid = jnp.maximum(hid, 0.0)
    # TODO(synk): nn.Dropout(input_dropout_p) is identity in eval mode; not emitted.
    hid_bf = hid.astype(jnp.bfloat16)
    gf_ref[...] = (jnp.dot(hid_bf, wif_ref[...].astype(jnp.bfloat16),
                           preferred_element_type=jnp.float32) + bf_ref[...])
    gb_ref[...] = (jnp.dot(hid_bf, wib_ref[...].astype(jnp.bfloat16),
                           preferred_element_type=jnp.float32) + bb_ref[...])


# ----------------------------------------------------------------------------
# Kernel B: bidirectional LSTM recurrence (gate pre-activations precomputed)
#           + final-hidden concat + fused no-affine LayerNorm.
# Fully unrolled over T (small, static); gridded over batch tiles.
# ----------------------------------------------------------------------------
def bilstm_ln_kernel(gf_ref, gb_ref, whh_f_ref, whh_b_ref, out_ref, hid_ref):
    Bb, T, G = gf_ref.shape
    H = G // 4

    # Hoist the (f32 -> bf16) weight casts out of the unrolled loops.
    whh_f = whh_f_ref[...].astype(jnp.bfloat16)
    whh_b = whh_b_ref[...].astype(jnp.bfloat16)

    def cell(g_pre, whh_bf, h, c):
        # Only the hidden-to-hidden matmul remains on the serial path.
        gates = g_pre + jnp.dot(h.astype(jnp.bfloat16), whh_bf,
                                preferred_element_type=jnp.float32)
        # PyTorch gate order: [i, f, g, o]; elementwise math in f32 (v5e-safe).
        i = jax.nn.sigmoid(gates[:, 0 * H:1 * H])
        f = jax.nn.sigmoid(gates[:, 1 * H:2 * H])
        g = jnp.tanh(gates[:, 2 * H:3 * H])
        o = jax.nn.sigmoid(gates[:, 3 * H:4 * H])
        c_new = f * c + i * g
        h_new = o * jnp.tanh(c_new)
        return h_new, c_new

    zeros = jnp.zeros((Bb, H), jnp.float32)

    # ---- forward direction: raw hidden states go straight into out_ref[:, t, :H]
    h, c = zeros, zeros
    for t in range(T):
        h, c = cell(gf_ref[:, t, :], whh_f, h, c)
        out_ref[:, t, 0:H] = h
    hid_ref[:, 0:H] = h                                   # fhidden[0] (fwd final)

    # ---- backward direction with fused LayerNorm (eps=1e-5, no affine)
    h, c = zeros, zeros
    for s in range(T):
        t = T - 1 - s
        h, c = cell(gb_ref[:, t, :], whh_b, h, c)
        y = jnp.concatenate([out_ref[:, t, 0:H], h], axis=-1)      # (Bb, 2H)
        mu = jnp.mean(y, axis=-1, keepdims=True)
        var = jnp.mean(jnp.square(y - mu), axis=-1, keepdims=True)
        out_ref[:, t, :] = (y - mu) * jax.lax.rsqrt(var + 1e-5)
    hid_ref[:, H:2 * H] = h                               # fhidden[1] (bwd final)


# ----------------------------------------------------------------------------
# Wrapper
# ----------------------------------------------------------------------------
def _row_block(n):
    """Largest row-tile (multiple of 8, <=512) that divides n."""
    if n <= 512:
        return n
    for cand in (512, 256, 128, 64, 32, 16, 8):
        if n % cand == 0:
            return cand
    return n


def _batch_block(b):
    """Batch tile for the recurrence kernel (multiple of 8 that divides b)."""
    if b % 8 != 0:
        return b
    for cand in (32, 16, 8):
        if b % cand == 0:
            return cand
    return b


@jax.jit
def encoder_vid_hga_forward(vid_feats, params):
    B, T, Dv = vid_feats.shape
    H = params["w_vid2hid"].shape[1]
    BT = B * T

    x_flat = vid_feats.reshape(BT, Dv).astype(jnp.float32)
    bv = params["b_vid2hid"].reshape(1, H)

    # ---- Kernel A: fused projection, tiled & pipelined over B*T rows --------
    R = _row_block(BT)
    grid_a = (pl.cdiv(BT, R),)
    const2 = lambda i: (0, 0)
    gf_flat, gb_flat = pl.pallas_call(
        proj_kernel,
        out_shape=(jax.ShapeDtypeStruct((BT, 4 * H), jnp.float32),
                   jax.ShapeDtypeStruct((BT, 4 * H), jnp.float32)),
        grid_spec=pltpu.PrefetchScalarGridSpec(
            num_scalar_prefetch=0, grid=grid_a,
            in_specs=[pl.BlockSpec((R, Dv), lambda i: (i, 0)),
                      pl.BlockSpec((Dv, H), const2),
                      pl.BlockSpec((1, H), const2),
                      pl.BlockSpec((H, 4 * H), const2),
                      pl.BlockSpec((1, 4 * H), const2),
                      pl.BlockSpec((H, 4 * H), const2),
                      pl.BlockSpec((1, 4 * H), const2)],
            out_specs=[pl.BlockSpec((R, 4 * H), lambda i: (i, 0)),
                       pl.BlockSpec((R, 4 * H), lambda i: (i, 0))]),
        compiler_params=pltpu.CompilerParams(
            dimension_semantics=("parallel",)),
    )(x_flat, params["w_vid2hid"], bv,
      params["w_ih_f"], params["b_f"], params["w_ih_b"], params["b_b"])

    # Free (metadata-only) reshapes: row order of the flat gates is (b*T + t).
    gf = gf_flat.reshape(B, T, 4 * H)
    gb = gb_flat.reshape(B, T, 4 * H)

    # ---- Kernel B: recurrence + LayerNorm, gridded over batch tiles ---------
    Bblk = _batch_block(B)
    grid_b = (pl.cdiv(B, Bblk),)
    foutput, fhidden = pl.pallas_call(
        bilstm_ln_kernel,
        out_shape=(jax.ShapeDtypeStruct((B, T, 2 * H), jnp.float32),
                   jax.ShapeDtypeStruct((B, 2 * H), jnp.float32)),
        grid_spec=pltpu.PrefetchScalarGridSpec(
            num_scalar_prefetch=0, grid=grid_b,
            in_specs=[pl.BlockSpec((Bblk, T, 4 * H), lambda i: (i, 0, 0)),
                      pl.BlockSpec((Bblk, T, 4 * H), lambda i: (i, 0, 0)),
                      pl.BlockSpec((H, 4 * H), const2),
                      pl.BlockSpec((H, 4 * H), const2)],
            out_specs=[pl.BlockSpec((Bblk, T, 2 * H), lambda i: (i, 0, 0)),
                       pl.BlockSpec((Bblk, 2 * H), lambda i: (i, 0))]),
        compiler_params=pltpu.CompilerParams(
            dimension_semantics=("parallel",)),
    )(gf, gb, params["w_hh_f"], params["w_hh_b"])

    return foutput, fhidden
    # TODO(synk): fg_mask / pack_padded_sequence path not implemented (the
    # reference feeds an unpacked tensor to the RNN, so that branch would
    # error in PyTorch as well).
    # TODO(synk): for very long T, tile the gates over a T grid axis
    # ("arbitrary") carrying (h, c) in scratch instead of full unroll.


# ----------------------------------------------------------------------------
# Deterministic parameter construction (matches PyTorch shapes / init style)
# ----------------------------------------------------------------------------
def make_params(key, dim_vid, dim_hidden):
    H, Dv = dim_hidden, dim_vid
    keys = jax.random.split(key, 12)

    xavier_std = (2.0 / (Dv + H)) ** 0.5
    w_vid2hid = xavier_std * jax.random.normal(keys[0], (Dv, H), jnp.float32)
    b_bound = 1.0 / (Dv ** 0.5)
    b_vid2hid = jax.random.uniform(keys[1], (H,), jnp.float32, -b_bound, b_bound)

    k = 1.0 / (H ** 0.5)

    def u(kk, shape):
        return jax.random.uniform(kk, shape, jnp.float32, -k, k)

    # Stored pre-transposed (input_dim, 4H); gate order [i, f, g, o].
    w_ih_f = u(keys[2], (H, 4 * H))
    w_hh_f = u(keys[3], (H, 4 * H))
    b_f = (u(keys[4], (4 * H,)) + u(keys[5], (4 * H,))).reshape(1, 4 * H)
    w_ih_b = u(keys[6], (H, 4 * H))
    w_hh_b = u(keys[7], (H, 4 * H))
    b_b = (u(keys[8], (4 * H,)) + u(keys[9], (4 * H,))).reshape(1, 4 * H)

    return dict(w_vid2hid=w_vid2hid, b_vid2hid=b_vid2hid,
                w_ih_f=w_ih_f, w_hh_f=w_hh_f, b_f=b_f,
                w_ih_b=w_ih_b, w_hh_b=w_hh_b, b_b=b_b)


# ----------------------------------------------------------------------------
# Pure-JAX reference (same math incl. bf16 matmul operands) for sanity check
# ----------------------------------------------------------------------------
def reference_forward(vid_feats, params):
    B, T, Dv = vid_feats.shape
    H = params["w_vid2hid"].shape[1]

    def mm(a, b):
        return jnp.dot(a.astype(jnp.bfloat16), b.astype(jnp.bfloat16),
                       preferred_element_type=jnp.float32)

    x = vid_feats.reshape(B * T, Dv)
    hid = jnp.maximum(mm(x, params["w_vid2hid"]) + params["b_vid2hid"], 0.0)
    gf = (mm(hid, params["w_ih_f"]) + params["b_f"]).reshape(B, T, 4 * H)
    gb = (mm(hid, params["w_ih_b"]) + params["b_b"]).reshape(B, T, 4 * H)

    def run(gates, whh, reverse):
        h = jnp.zeros((B, H), jnp.float32)
        c = jnp.zeros((B, H), jnp.float32)
        hs = [None] * T
        order = range(T - 1, -1, -1) if reverse else range(T)
        for t in order:
            g = gates[:, t, :] + mm(h, whh)
            i = jax.nn.sigmoid(g[:, 0 * H:1 * H])
            f = jax.nn.sigmoid(g[:, 1 * H:2 * H])
            gg = jnp.tanh(g[:, 2 * H:3 * H])
            o = jax.nn.sigmoid(g[:, 3 * H:4 * H])
            c = f * c + i * gg
            h = o * jnp.tanh(c)
            hs[t] = h
        return jnp.stack(hs, axis=1), h

    hsf, hf = run(gf, params["w_hh_f"], False)
    hsb, hb = run(gb, params["w_hh_b"], True)
    y = jnp.concatenate([hsf, hsb], axis=-1)
    mu = jnp.mean(y, axis=-1, keepdims=True)
    var = jnp.mean((y - mu) ** 2, axis=-1, keepdims=True)
    out = (y - mu) * jax.lax.rsqrt(var + 1e-5)
    return out, jnp.concatenate([hf, hb], axis=-1)


if __name__ == "__main__":
    # Small shapes consistent with the module (vid_feats: (bs, seq, dim_vid)).
    # dim_hidden chosen so 4H = 128 (lane aligned gate tensor).
    B, T, DIM_VID, DIM_HIDDEN = 2, 8, 64, 32

    key = jax.random.PRNGKey(0)
    k_param, k_in = jax.random.split(key)
    params = make_params(k_param, DIM_VID, DIM_HIDDEN)
    vid_feats = jax.random.normal(k_in, (B, T, DIM_VID), jnp.float32)

    foutput, fhidden = encoder_vid_hga_forward(vid_feats, params)
    foutput, fhidden = jax.block_until_ready((foutput, fhidden))

    assert foutput.shape == (B, T, 2 * DIM_HIDDEN)
    assert fhidden.shape == (B, 2 * DIM_HIDDEN)

    ref_out, ref_hid = reference_forward(vid_feats, params)
    assert jnp.allclose(foutput, ref_out, atol=5e-3, rtol=5e-3)
    assert jnp.allclose(fhidden, ref_hid, atol=5e-3, rtol=5e-3)

    print("KERNEL_OK")
</pallas_src>

<mosaic_0001>
module attributes {stable_mosaic.version = 11 : i64} {
  func.func @bilstm_ln_kernel(%arg0: i32, %arg1: memref<2x8x128xf32, #tpu.memory_space<vmem>>, %arg2: memref<2x8x128xf32, #tpu.memory_space<vmem>>, %arg3: memref<32x128xf32, #tpu.memory_space<vmem>>, %arg4: memref<32x128xf32, #tpu.memory_space<vmem>>, %arg5: memref<2x8x64xf32, #tpu.memory_space<vmem>>, %arg6: memref<2x64xf32, #tpu.memory_space<vmem>>) attributes {dimension_semantics = [#tpu.dimension_semantics<parallel>], iteration_bounds = array<i64: 1>, scalar_prefetch = 0 : i64, scratch_operands = 0 : i64, tpu.core_type = #tpu.core_type<tc>, window_params = [{transform_indices = @transform_0, window_bounds = array<i64: 2, 8, 128>}, {transform_indices = @transform_1, window_bounds = array<i64: 2, 8, 128>}, {pipeline_mode = #tpu.pipeline_mode<synchronous>, transform_indices = @transform_2, window_bounds = array<i64: 32, 128>}, {pipeline_mode = #tpu.pipeline_mode<synchronous>, transform_indices = @transform_3, window_bounds = array<i64: 32, 128>}, {transform_indices = @transform_4, window_bounds = array<i64: 2, 8, 64>}, {transform_indices = @transform_5, window_bounds = array<i64: 2, 64>}]} {
    %c0 = arith.constant 0 : index
    %c0_0 = arith.constant 0 : index
    %0 = vector.load %arg3[%c0, %c0_0] : memref<32x128xf32, #tpu.memory_space<vmem>>, vector<32x128xf32>
    %1 = arith.truncf %0 : vector<32x128xf32> to vector<32x128xbf16>
    %c0_1 = arith.constant 0 : index
    %c0_2 = arith.constant 0 : index
    %2 = vector.load %arg4[%c0_1, %c0_2] : memref<32x128xf32, #tpu.memory_space<vmem>>, vector<32x128xf32>
    %3 = arith.truncf %2 : vector<32x128xf32> to vector<32x128xbf16>
    %cst = arith.constant 0.000000e+00 : f32
    %4 = vector.broadcast %cst : f32 to vector<2x32xf32>
    %c0_3 = arith.constant 0 : index
    %c0_4 = arith.constant 0 : index
    %c0_5 = arith.constant 0 : index
    %5 = vector.load %arg1[%c0_3, %c0_4, %c0_5] : memref<2x8x128xf32, #tpu.memory_space<vmem>>, vector<2x1x128xf32>
    %6 = vector.shape_cast %5 : vector<2x1x128xf32> to vector<2x128xf32>
    %7 = arith.truncf %4 : vector<2x32xf32> to vector<2x32xbf16>
    %cst_6 = arith.constant dense<0.000000e+00> : vector<2x128xf32>
    %8 = tpu.matmul %7, %1, %cst_6 {dimension_numbers = #tpu.dot_dimension_numbers<[1], [0], [0], [1], [0, 0, 1, 1], [], []>} : vector<2x32xbf16>, vector<32x128xbf16>, vector<2x128xf32> -> vector<2x128xf32>
    %9 = arith.addf %6, %8 : vector<2x128xf32>
    %10 = vector.extract_strided_slice %9 {offsets = [0, 0], sizes = [2, 32], strides = [1, 1]} : vector<2x128xf32> to vector<2x32xf32>
    %11 = arith.negf %10 : vector<2x32xf32>
    %12 = math.exp %11 : vector<2x32xf32>
    %cst_7 = arith.constant 1.000000e+00 : f32
    %13 = vector.broadcast %cst_7 : f32 to vector<2x32xf32>
    %14 = arith.addf %13, %12 : vector<2x32xf32>
    %15 = arith.divf %13, %14 : vector<2x32xf32>
    %16 = vector.extract_strided_slice %9 {offsets = [0, 32], sizes = [2, 32], strides = [1, 1]} : vector<2x128xf32> to vector<2x32xf32>
    %17 = arith.negf %16 : vector<2x32xf32>
    %18 = math.exp %17 : vector<2x32xf32>
    %cst_8 = arith.constant 1.000000e+00 : f32
    %19 = vector.broadcast %cst_8 : f32 to vector<2x32xf32>
    %20 = arith.addf %19, %18 : vector<2x32xf32>
    %21 = arith.divf %19, %20 : vector<2x32xf32>
    %22 = vector.extract_strided_slice %9 {offsets = [0, 64], sizes = [2, 32], strides = [1, 1]} : vector<2x128xf32> to vector<2x32xf32>
    %23 = math.tanh %22 : vector<2x32xf32>
    %24 = vector.extract_strided_slice %9 {offsets = [0, 96], sizes = [2, 32], strides = [1, 1]} : vector<2x128xf32> to vector<2x32xf32>
    %25 = arith.negf %24 : vector<2x32xf32>
    %26 = math.exp %25 : vector<2x32xf32>
    %cst_9 = arith.constant 1.000000e+00 : f32
    %27 = vector.broadcast %cst_9 : f32 to vector<2x32xf32>
    %28 = arith.addf %27, %26 : vector<2x32xf32>
    %29 = arith.divf %27, %28 : vector<2x32xf32>
    %30 = arith.mulf %21, %4 : vector<2x32xf32>
    %31 = arith.mulf %15, %23 : vector<2x32xf32>
    %32 = arith.addf %30, %31 : vector<2x32xf32>
    %33 = math.tanh %32 : vector<2x32xf32>
    %34 = arith.mulf %29, %33 : vector<2x32xf32>
    %c0_10 = arith.constant 0 : index
    %c0_11 = arith.constant 0 : index
    %c0_12 = arith.constant 0 : index
    %35 = vector.load %arg5[%c0_10, %c0_11, %c0_12] : memref<2x8x64xf32, #tpu.memory_space<vmem>>, vector<2x1x32xf32>
    %36 = vector.shape_cast %35 : vector<2x1x32xf32> to vector<2x32xf32>
    %37 = vector.shape_cast %34 : vector<2x32xf32> to vector<2x1x32xf32>
    tpu.vector_store %arg5[%c0_10, %c0_11, %c0_12], %37 {strides = array<i32>} : memref<2x8x64xf32, #tpu.memory_space<vmem>>, vector<2x1x32xf32>,
    %c0_13 = arith.constant 0 : index
    %c1 = arith.constant 1 : index
    %c0_14 = arith.constant 0 : index
    %38 = vector.load %arg1[%c0_13, %c1, %c0_14] : memref<2x8x128xf32, #tpu.memory_space<vmem>>, vector<2x1x128xf32>
    %39 = vector.shape_cast %38 : vector<2x1x128xf32> to vector<2x128xf32>
    %40 = arith.truncf %34 : vector<2x32xf32> to vector<2x32xbf16>
    %cst_15 = arith.constant dense<0.000000e+00> : vector<2x128xf32>
    %41 = tpu.matmul %40, %1, %cst_15 {dimension_numbers = #tpu.dot_dimension_numbers<[1], [0], [0], [1], [0, 0, 1, 1], [], []>} : vector<2x32xbf16>, vector<32x128xbf16>, vector<2x128xf32> -> vector<2x128xf32>
    %42 = arith.addf %39, %41 : vector<2x128xf32>
    %43 = vector.extract_strided_slice %42 {offsets = [0, 0], sizes = [2, 32], strides = [1, 1]} : vector<2x128xf32> to vector<2x32xf32>
    %44 = arith.negf %43 : vector<2x32xf32>
    %45 = math.exp %44 : vector<2x32xf32>
    %cst_16 = arith.constant 1.000000e+00 : f32
    %46 = vector.broadcast %cst_16 : f32 to vector<2x32xf32>
    %47 = arith.addf %46, %45 : vector<2x32xf32>
    %48 = arith.divf %46, %47 : vector<2x32xf32>
    %49 = vector.extract_strided_slice %42 {offsets = [0, 32], sizes = [2, 32], strides = [1, 1]} : vector<2x128xf32> to vector<2x32xf32>
    %50 = arith.negf %49 : vector<2x32xf32>
    %51 = math.exp %50 : vector<2x32xf32>
    %cst_17 = arith.constant 1.000000e+00 : f32
    %52 = vector.broadcast %cst_17 : f32 to vector<2x32xf32>
    %53 = arith.addf %52, %51 : vector<2x32xf32>
    %54 = arith.divf %52, %53 : vector<2x32xf32>
    %55 = vector.extract_strided_slice %42 {offsets = [0, 64], sizes = [2, 32], strides = [1, 1]} : vector<2x128xf32> to vector<2x32xf32>
    %56 = math.tanh %55 : vector<2x32xf32>
    %57 = vector.extract_strided_slice %42 {offsets = [0, 96], sizes = [2, 32], strides = [1, 1]} : vector<2x128xf32> to vector<2x32xf32>
    %58 = arith.negf %57 : vector<2x32xf32>
    %59 = math.exp %58 : vector<2x32xf32>
    %cst_18 = arith.constant 1.000000e+00 : f32
    %60 = vector.broadcast %cst_18 : f32 to vector<2x32xf32>
    %61 = arith.addf %60, %59 : vector<2x32xf32>
    %62 = arith.divf %60, %61 : vector<2x32xf32>
    %63 = arith.mulf %54, %32 : vector<2x32xf32>
    %64 = arith.mulf %48, %56 : vector<2x32xf32>
    %65 = arith.addf %63, %64 : vector<2x32xf32>
    %66 = math.tanh %65 : vector<2x32xf32>
    %67 = arith.mulf %62, %66 : vector<2x32xf32>
    %c0_19 = arith.constant 0 : index
    %c1_20 = arith.constant 1 : index
    %c0_21 = arith.constant 0 : index
    %68 = vector.load %arg5[%c0_19, %c1_20, %c0_21] : memref<2x8x64xf32, #tpu.memory_space<vmem>>, vector<2x1x32xf32>
    %69 = vector.shape_cast %68 : vector<2x1x32xf32> to vector<2x32xf32>
    %70 = vector.shape_cast %67 : vector<2x32xf32> to vector<2x1x32xf32>
    tpu.vector_store %arg5[%c0_19, %c1_20, %c0_21], %70 {strides = array<i32>} : memref<2x8x64xf32, #tpu.memory_space<vmem>>, vector<2x1x32xf32>,
    %c0_22 = arith.constant 0 : index
    %c2 = arith.constant 2 : index
    %c0_23 = arith.constant 0 : index
    %71 = vector.load %arg1[%c0_22, %c2, %c0_23] : memref<2x8x128xf32, #tpu.memory_space<vmem>>, vector<2x1x128xf32>
    %72 = vector.shape_cast %71 : vector<2x1x128xf32> to vector<2x128xf32>
    %73 = arith.truncf %67 : vector<2x32xf32> to vector<2x32xbf16>
    %cst_24 = arith.constant dense<0.000000e+00> : vector<2x128xf32>
    %74 = tpu.matmul %73, %1, %cst_24 {dimension_numbers = #tpu.dot_dimension_numbers<[1], [0], [0], [1], [0, 0, 1, 1], [], []>} : vector<2x32xbf16>, vector<32x128xbf16>, vector<2x128xf32> -> vector<2x128xf32>
    %75 = arith.addf %72, %74 : vector<2x128xf32>
    %76 = vector.extract_strided_slice %75 {offsets = [0, 0], sizes = [2, 32], strides = [1, 1]} : vector<2x128xf32> to vector<2x32xf32>
    %77 = arith.negf %76 : vector<2x32xf32>
    %78 = math.exp %77 : vector<2x32xf32>
    %cst_25 = arith.constant 1.000000e+00 : f32
    %79 = vector.broadcast %cst_25 : f32 to vector<2x32xf32>
    %80 = arith.addf %79, %78 : vector<2x32xf32>
    %81 = arith.divf %79, %80 : vector<2x32xf32>
    %82 = vector.extract_strided_slice %75 {offsets = [0, 32], sizes = [2, 32], strides = [1, 1]} : vector<2x128xf32> to vector<2x32xf32>
    %83 = arith.negf %82 : vector<2x32xf32>
    %84 = math.exp %83 : vector<2x32xf32>
    %cst_26 = arith.constant 1.000000e+00 : f32
    %85 = vector.broadcast %cst_26 : f32 to vector<2x32xf32>
    %86 = arith.addf %85, %84 : vector<2x32xf32>
    %87 = arith.divf %85, %86 : vector<2x32xf32>
    %88 = vector.extract_strided_slice %75 {offsets = [0, 64], sizes = [2, 32], strides = [1, 1]} : vector<2x128xf32> to vector<2x32xf32>
    %89 = math.tanh %88 : vector<2x32xf32>
    %90 = vector.extract_strided_slice %75 {offsets = [0, 96], sizes = [2, 32], strides = [1, 1]} : vector<2x128xf32> to vector<2x32xf32>
    %91 = arith.negf %90 : vector<2x32xf32>
    %92 = math.exp %91 : vector<2x32xf32>
    %cst_27 = arith.constant 1.000000e+00 : f32
    %93 = vector.broadcast %cst_27 : f32 to vector<2x32xf32>
    %94 = arith.addf %93, %92 : vector<2x32xf32>
    %95 = arith.divf %93, %94 : vector<2x32xf32>
    %96 = arith.mulf %87, %65 : vector<2x32xf32>
    %97 = arith.mulf %81, %89 : vector<2x32xf32>
    %98 = arith.addf %96, %97 : vector<2x32xf32>
    %99 = math.tanh %98 : vector<2x32xf32>
    %100 = arith.mulf %95, %99 : vector<2x32xf32>
    %c0_28 = arith.constant 0 : index
    %c2_29 = arith.constant 2 : index
    %c0_30 = arith.constant 0 : index
    %101 = vector.load %arg5[%c0_28, %c2_29, %c0_30] : memref<2x8x64xf32, #tpu.memory_space<vmem>>, vector<2x1x32xf32>
    %102 = vector.shape_cast %101 : vector<2x1x32xf32> to vector<2x32xf32>
    %103 = vector.shape_cast %100 : vector<2x32xf32> to vector<2x1x32xf32>
    tpu.vector_store %arg5[%c0_28, %c2_29, %c0_30], %103 {strides = array<i32>} : memref<2x8x64xf32, #tpu.memory_space<vmem>>, vector<2x1x32xf32>,
    %c0_31 = arith.constant 0 : index
    %c3 = arith.constant 3 : index
    %c0_32 = arith.constant 0 : index
    %104 = vector.load %arg1[%c0_31, %c3, %c0_32] : memref<2x8x128xf32, #tpu.memory_space<vmem>>, vector<2x1x128xf32>
    %105 = vector.shape_cast %104 : vector<2x1x128xf32> to vector<2x128xf32>
    %106 = arith.truncf %100 : vector<2x32xf32> to vector<2x32xbf16>
    %cst_33 = arith.constant dense<0.000000e+00> : vector<2x128xf32>
    %107 = tpu.matmul %106, %1, %cst_33 {dimension_numbers = #tpu.dot_dimension_numbers<[1], [0], [0], [1], [0, 0, 1, 1], [], []>} : vector<2x32xbf16>, vector<32x128xbf16>, vector<2x128xf32> -> vector<2x128xf32>
    %108 = arith.addf %105, %107 : vector<2x128xf32>
    %109 = vector.extract_strided_slice %108 {offsets = [0, 0], sizes = [2, 32], strides = [1, 1]} : vector<2x128xf32> to vector<2x32xf32>
    %110 = arith.negf %109 : vector<2x32xf32>
    %111 = math.exp %110 : vector<2x32xf32>
    %cst_34 = arith.constant 1.000000e+00 : f32
    %112 = vector.broadcast %cst_34 : f32 to vector<2x32xf32>
    %113 = arith.addf %112, %111 : vector<2x32xf32>
    %114 = arith.divf %112, %113 : vector<2x32xf32>
    %115 = vector.extract_strided_slice %108 {offsets = [0, 32], sizes = [2, 32], strides = [1, 1]} : vector<2x128xf32> to vector<2x32xf32>
    %116 = arith.negf %115 : vector<2x32xf32>
    %117 = math.exp %116 : vector<2x32xf32>
    %cst_35 = arith.constant 1.000000e+00 : f32
    %118 = vector.broadcast %cst_35 : f32 to vector<2x32xf32>
    %119 = arith.addf %118, %117 : vector<2x32xf32>
    %120 = arith.divf %118, %119 : vector<2x32xf32>
    %121 = vector.extract_strided_slice %108 {offsets = [0, 64], sizes = [2, 32], strides = [1, 1]} : vector<2x128xf32> to vector<2x32xf32>
    %122 = math.tanh %121 : vector<2x32xf32>
    %123 = vector.extract_strided_slice %108 {offsets = [0, 96], sizes = [2, 32], strides = [1, 1]} : vector<2x128xf32> to vector<2x32xf32>
    %124 = arith.negf %123 : vector<2x32xf32>
    %125 = math.exp %124 : vector<2x32xf32>
    %cst_36 = arith.constant 1.000000e+00 : f32
    %126 = vector.broadcast %cst_36 : f32 to vector<2x32xf32>
    %127 = arith.addf %126, %125 : vector<2x32xf32>
    %128 = arith.divf %126, %127 : vector<2x32xf32>
    %129 = arith.mulf %120, %98 : vector<2x32xf32>
    %130 = arith.mulf %114, %122 : vector<2x32xf32>
    %131 = arith.addf %129, %130 : vector<2x32xf32>
    %132 = math.tanh %131 : vector<2x32xf32>
    %133 = arith.mulf %128, %132 : vector<2x32xf32>
    %c0_37 = arith.constant 0 : index
    %c3_38 = arith.constant 3 : index
    %c0_39 = arith.constant 0 : index
    %134 = vector.load %arg5[%c0_37, %c3_38, %c0_39] : memref<2x8x64xf32, #tpu.memory_space<vmem>>, vector<2x1x32xf32>
    %135 = vector.shape_cast %134 : vector<2x1x32xf32> to vector<2x32xf32>
    %136 = vector.shape_cast %133 : vector<2x32xf32> to vector<2x1x32xf32>
    tpu.vector_store %arg5[%c0_37, %c3_38, %c0_39], %136 {strides = array<i32>} : memref<2x8x64xf32, #tpu.memory_space<vmem>>, vector<2x1x32xf32>,
    %c0_40 = arith.constant 0 : index
    %c4 = arith.constant 4 : index
    %c0_41 = arith.constant 0 : index
    %137 = vector.load %arg1[%c0_40, %c4, %c0_41] : memref<2x8x128xf32, #tpu.memory_space<vmem>>, vector<2x1x128xf32>
    %138 = vector.shape_cast %137 : vector<2x1x128xf32> to vector<2x128xf32>
    %139 = arith.truncf %133 : vector<2x32xf32> to vector<2x32xbf16>
    %cst_42 = arith.constant dense<0.000000e+00> : vector<2x128xf32>
    %140 = tpu.matmul %139, %1, %cst_42 {dimension_numbers = #tpu.dot_dimension_numbers<[1], [0], [0], [1], [0, 0, 1, 1], [], []>} : vector<2x32xbf16>, vector<32x128xbf16>, vector<2x128xf32> -> vector<2x128xf32>
    %141 = arith.addf %138, %140 : vector<2x128xf32>
    %142 = vector.extract_strided_slice %141 {offsets = [0, 0], sizes = [2, 32], strides = [1, 1]} : vector<2x128xf32> to vector<2x32xf32>
    %143 = arith.negf %142 : vector<2x32xf32>
    %144 = math.exp %143 : vector<2x32xf32>
    %cst_43 = arith.constant 1.000000e+00 : f32
    %145 = vector.broadcast %cst_43 : f32 to vector<2x32xf32>
    %146 = arith.addf %145, %144 : vector<2x32xf32>
    %147 = arith.divf %145, %146 : vector<2x32xf32>
    %148 = vector.extract_strided_slice %141 {offsets = [0, 32], sizes = [2, 32], strides = [1, 1]} : vector<2x128xf32> to vector<2x32xf32>
    %149 = arith.negf %148 : vector<2x32xf32>
    %150 = math.exp %149 : vector<2x32xf32>
    %cst_44 = arith.constant 1.000000e+00 : f32
    %151 = vector.broadcast %cst_44 : f32 to vector<2x32xf32>
    %152 = arith.addf %151, %150 : vector<2x32xf32>
    %153 = arith.divf %151, %152 : vector<2x32xf32>
    %154 = vector.extract_strided_slice %141 {offsets = [0, 64], sizes = [2, 32], strides = [1, 1]} : vector<2x128xf32> to vector<2x32xf32>
    %155 = math.tanh %154 : vector<2x32xf32>
    %156 = vector.extract_strided_slice %141 {offsets = [0, 96], sizes = [2, 32], strides = [1, 1]} : vector<2x128xf32> to vector<2x32xf32>
    %157 = arith.negf %156 : vector<2x32xf32>
    %158 = math.exp %157 : vector<2x32xf32>
    %cst_45 = arith.constant 1.000000e+00 : f32
    %159 = vector.broadcast %cst_45 : f32 to vector<2x32xf32>
    %160 = arith.addf %159, %158 : vector<2x32xf32>
    %161 = arith.divf %159, %160 : vector<2x32xf32>
    %162 = arith.mulf %153, %131 : vector<2x32xf32>
    %163 = arith.mulf %147, %155 : vector<2x32xf32>
    %164 = arith.addf %162, %163 : vector<2x32xf32>
    %165 = math.tanh %164 : vector<2x32xf32>
    %166 = arith.mulf %161, %165 : vector<2x32xf32>
    %c0_46 = arith.constant 0 : index
    %c4_47 = arith.constant 4 : index
    %c0_48 = arith.constant 0 : index
    %167 = vector.load %arg5[%c0_46, %c4_47, %c0_48] : memref<2x8x64xf32, #tpu.memory_space<vmem>>, vector<2x1x32xf32>
    %168 = vector.shape_cast %167 : vector<2x1x32xf32> to vector<2x32xf32>
    %169 = vector.shape_cast %166 : vector<2x32xf32> to vector<2x1x32xf32>
    tpu.vector_store %arg5[%c0_46, %c4_47, %c0_48], %169 {strides = array<i32>} : memref<2x8x64xf32, #tpu.memory_space<vmem>>, vector<2x1x32xf32>,
    %c0_49 = arith.constant 0 : index
    %c5 = arith.constant 5 : index
    %c0_50 = arith.constant 0 : index
    %170 = vector.load %arg1[%c0_49, %c5, %c0_50] : memref<2x8x128xf32, #tpu.memory_space<vmem>>, vector<2x1x128xf32>
    %171 = vector.shape_cast %170 : vector<2x1x128xf32> to vector<2x128xf32>
    %172 = arith.truncf %166 : vector<2x32xf32> to vector<2x32xbf16>
    %cst_51 = arith.constant dense<0.000000e+00> : vector<2x128xf32>
    %173 = tpu.matmul %172, %1, %cst_51 {dimension_numbers = #tpu.dot_dimension_numbers<[1], [0], [0], [1], [0, 0, 1, 1], [], []>} : vector<2x32xbf16>, vector<32x128xbf16>, vector<2x128xf32> -> vector<2x128xf32>
    %174 = arith.addf %171, %173 : vector<2x128xf32>
    %175 = vector.extract_strided_slice %174 {offsets = [0, 0], sizes = [2, 32], strides = [1, 1]} : vector<2x128xf32> to vector<2x32xf32>
    %176 = arith.negf %175 : vector<2x32xf32>
    %177 = math.exp %176 : vector<2x32xf32>
    %cst_52 = arith.constant 1.000000e+00 : f32
    %178 = vector.broadcast %cst_52 : f32 to vector<2x32xf32>
    %179 = arith.addf %178, %177 : vector<2x32xf32>
    %180 = arith.divf %178, %179 : vector<2x32xf32>
    %181 = vector.extract_strided_slice %174 {offsets = [0, 32], sizes = [2, 32], strides = [1, 1]} : vector<2x128xf32> to vector<2x32xf32>
    %182 = arith.negf %181 : vector<2x32xf32>
    %183 = math.exp %182 : vector<2x32xf32>
    %cst_53 = arith.constant 1.000000e+00 : f32
    %184 = vector.broadcast %cst_53 : f32 to vector<2x32xf32>
    %185 = arith.addf %184, %183 : vector<2x32xf32>
    %186 = arith.divf %184, %185 : vector<2x32xf32>
    %187 = vector.extract_strided_slice %174 {offsets = [0, 64], sizes = [2, 32], strides = [1, 1]} : vector<2x128xf32> to vector<2x32xf32>
    %188 = math.tanh %187 : vector<2x32xf32>
    %189 = vector.extract_strided_slice %174 {offsets = [0, 96], sizes = [2, 32], strides = [1, 1]} : vector<2x128xf32> to vector<2x32xf32>
    %190 = arith.negf %189 : vector<2x32xf32>
    %191 = math.exp %190 : vector<2x32xf32>
    %cst_54 = arith.constant 1.000000e+00 : f32
    %192 = vector.broadcast %cst_54 : f32 to vector<2x32xf32>
    %193 = arith.addf %192, %191 : vector<2x32xf32>
    %194 = arith.divf %192, %193 : vector<2x32xf32>
    %195 = arith.mulf %186, %164 : vector<2x32xf32>
    %196 = arith.mulf %180, %188 : vector<2x32xf32>
    %197 = arith.addf %195, %196 : vector<2x32xf32>
    %198 = math.tanh %197 : vector<2x32xf32>
    %199 = arith.mulf %194, %198 : vector<2x32xf32>
    %c0_55 = arith.constant 0 : index
    %c5_56 = arith.constant 5 : index
    %c0_57 = arith.constant 0 : index
    %200 = vector.load %arg5[%c0_55, %c5_56, %c0_57] : memref<2x8x64xf32, #tpu.memory_space<vmem>>, vector<2x1x32xf32>
    %201 = vector.shape_cast %200 : vector<2x1x32xf32> to vector<2x32xf32>
    %202 = vector.shape_cast %199 : vector<2x32xf32> to vector<2x1x32xf32>
    tpu.vector_store %arg5[%c0_55, %c5_56, %c0_57], %202 {strides = array<i32>} : memref<2x8x64xf32, #tpu.memory_space<vmem>>, vector<2x1x32xf32>,
    %c0_58 = arith.constant 0 : index
    %c6 = arith.constant 6 : index
    %c0_59 = arith.constant 0 : index
    %203 = vector.load %arg1[%c0_58, %c6, %c0_59] : memref<2x8x128xf32, #tpu.memory_space<vmem>>, vector<2x1x128xf32>
    %204 = vector.shape_cast %203 : vector<2x1x128xf32> to vector<2x128xf32>
    %205 = arith.truncf %199 : vector<2x32xf32> to vector<2x32xbf16>
    %cst_60 = arith.constant dense<0.000000e+00> : vector<2x128xf32>
    %206 = tpu.matmul %205, %1, %cst_60 {dimension_numbers = #tpu.dot_dimension_numbers<[1], [0], [0], [1], [0, 0, 1, 1], [], []>} : vector<2x32xbf16>, vector<32x128xbf16>, vector<2x128xf32> -> vector<2x128xf32>
    %207 = arith.addf %204, %206 : vector<2x128xf32>
    %208 = vector.extract_strided_slice %207 {offsets = [0, 0], sizes = [2, 32], strides = [1, 1]} : vector<2x128xf32> to vector<2x32xf32>
    %209 = arith.negf %208 : vector<2x32xf32>
    %210 = math.exp %209 : vector<2x32xf32>
    %cst_61 = arith.constant 1.000000e+00 : f32
    %211 = vector.broadcast %cst_61 : f32 to vector<2x32xf32>
    %212 = arith.addf %211, %210 : vector<2x32xf32>
    %213 = arith.divf %211, %212 : vector<2x32xf32>
    %214 = vector.extract_strided_slice %207 {offsets = [0, 32], sizes = [2, 32], strides = [1, 1]} : vector<2x128xf32> to vector<2x32xf32>
    %215 = arith.negf %214 : vector<2x32xf32>
    %216 = math.exp %215 : vector<2x32xf32>
    %cst_62 = arith.constant 1.000000e+00 : f32
    %217 = vector.broadcast %cst_62 : f32 to vector<2x32xf32>
    %218 = arith.addf %217, %216 : vector<2x32xf32>
    %219 = arith.divf %217, %218 : vector<2x32xf32>
    %220 = vector.extract_strided_slice %207 {offsets = [0, 64], sizes = [2, 32], strides = [1, 1]} : vector<2x128xf32> to vector<2x32xf32>
    %221 = math.tanh %220 : vector<2x32xf32>
    %222 = vector.extract_strided_slice %207 {offsets = [0, 96], sizes = [2, 32], strides = [1, 1]} : vector<2x128xf32> to vector<2x32xf32>
    %223 = arith.negf %222 : vector<2x32xf32>
    %224 = math.exp %223 : vector<2x32xf32>
    %cst_63 = arith.constant 1.000000e+00 : f32
    %225 = vector.broadcast %cst_63 : f32 to vector<2x32xf32>
    %226 = arith.addf %225, %224 : vector<2x32xf32>
    %227 = arith.divf %225, %226 : vector<2x32xf32>
    %228 = arith.mulf %219, %197 : vector<2x32xf32>
    %229 = arith.mulf %213, %221 : vector<2x32xf32>
    %230 = arith.addf %228, %229 : vector<2x32xf32>
    %231 = math.tanh %230 : vector<2x32xf32>
    %232 = arith.mulf %227, %231 : vector<2x32xf32>
    %c0_64 = arith.constant 0 : index
    %c6_65 = arith.constant 6 : index
    %c0_66 = arith.constant 0 : index
    %233 = vector.load %arg5[%c0_64, %c6_65, %c0_66] : memref<2x8x64xf32, #tpu.memory_space<vmem>>, vector<2x1x32xf32>
    %234 = vector.shape_cast %233 : vector<2x1x32xf32> to vector<2x32xf32>
    %235 = vector.shape_cast %232 : vector<2x32xf32> to vector<2x1x32xf32>
    tpu.vector_store %arg5[%c0_64, %c6_65, %c0_66], %235 {strides = array<i32>} : memref<2x8x64xf32, #tpu.memory_space<vmem>>, vector<2x1x32xf32>,
    %c0_67 = arith.constant 0 : index
    %c7 = arith.constant 7 : index
    %c0_68 = arith.constant 0 : index
    %236 = vector.load %arg1[%c0_67, %c7, %c0_68] : memref<2x8x128xf32, #tpu.memory_space<vmem>>, vector<2x1x128xf32>
    %237 = vector.shape_cast %236 : vector<2x1x128xf32> to vector<2x128xf32>
    %238 = arith.truncf %232 : vector<2x32xf32> to vector<2x32xbf16>
    %cst_69 = arith.constant dense<0.000000e+00> : vector<2x128xf32>
    %239 = tpu.matmul %238, %1, %cst_69 {dimension_numbers = #tpu.dot_dimension_numbers<[1], [0], [0], [1], [0, 0, 1, 1], [], []>} : vector<2x32xbf16>, vector<32x128xbf16>, vector<2x128xf32> -> vector<2x128xf32>
    %240 = arith.addf %237, %239 : vector<2x128xf32>
    %241 = vector.extract_strided_slice %240 {offsets = [0, 0], sizes = [2, 32], strides = [1, 1]} : vector<2x128xf32> to vector<2x32xf32>
    %242 = arith.negf %241 : vector<2x32xf32>
    %243 = math.exp %242 : vector<2x32xf32>
    %cst_70 = arith.constant 1.000000e+00 : f32
    %244 = vector.broadcast %cst_70 : f32 to vector<2x32xf32>
    %245 = arith.addf %244, %243 : vector<2x32xf32>
    %246 = arith.divf %244, %245 : vector<2x32xf32>
    %247 = vector.extract_strided_slice %240 {offsets = [0, 32], sizes = [2, 32], strides = [1, 1]} : vector<2x128xf32> to vector<2x32xf32>
    %248 = arith.negf %247 : vector<2x32xf32>
    %249 = math.exp %248 : vector<2x32xf32>
    %cst_71 = arith.constant 1.000000e+00 : f32
    %250 = vector.broadcast %cst_71 : f32 to vector<2x32xf32>
    %251 = arith.addf %250, %249 : vector<2x32xf32>
    %252 = arith.divf %250, %251 : vector<2x32xf32>
    %253 = vector.extract_strided_slice %240 {offsets = [0, 64], sizes = [2, 32], strides = [1, 1]} : vector<2x128xf32> to vector<2x32xf32>
    %254 = math.tanh %253 : vector<2x32xf32>
    %255 = vector.extract_strided_slice %240 {offsets = [0, 96], sizes = [2, 32], strides = [1, 1]} : vector<2x128xf32> to vector<2x32xf32>
    %256 = arith.negf %255 : vector<2x32xf32>
    %257 = math.exp %256 : vector<2x32xf32>
    %cst_72 = arith.constant 1.000000e+00 : f32
    %258 = vector.broadcast %cst_72 : f32 to vector<2x32xf32>
    %259 = arith.addf %258, %257 : vector<2x32xf32>
    %260 = arith.divf %258, %259 : vector<2x32xf32>
    %261 = arith.mulf %252, %230 : vector<2x32xf32>
    %262 = arith.mulf %246, %254 : vector<2x32xf32>
    %263 = arith.addf %261, %262 : vector<2x32xf32>
    %264 = math.tanh %263 : vector<2x32xf32>
    %265 = arith.mulf %260, %264 : vector<2x32xf32>
    %c0_73 = arith.constant 0 : index
    %c7_74 = arith.constant 7 : index
    %c0_75 = arith.constant 0 : index
    %266 = vector.load %arg5[%c0_73, %c7_74, %c0_75] : memref<2x8x64xf32, #tpu.memory_space<vmem>>, vector<2x1x32xf32>
    %267 = vector.shape_cast %266 : vector<2x1x32xf32> to vector<2x32xf32>
    %268 = vector.shape_cast %265 : vector<2x32xf32> to vector<2x1x32xf32>
    tpu.vector_store %arg5[%c0_73, %c7_74, %c0_75], %268 {strides = array<i32>} : memref<2x8x64xf32, #tpu.memory_space<vmem>>, vector<2x1x32xf32>,
    %c0_76 = arith.constant 0 : index
    %c0_77 = arith.constant 0 : index
    %269 = vector.load %arg6[%c0_76, %c0_77] : memref<2x64xf32, #tpu.memory_space<vmem>>, vector<2x32xf32>
    tpu.vector_store %arg6[%c0_76, %c0_77], %265 {strides = array<i32>} : memref<2x64xf32, #tpu.memory_space<vmem>>, vector<2x32xf32>,
    %c0_78 = arith.constant 0 : index
    %c7_79 = arith.constant 7 : index
    %c0_80 = arith.constant 0 : index
    %270 = vector.load %arg2[%c0_78, %c7_79, %c0_80] : memref<2x8x128xf32, #tpu.memory_space<vmem>>, vector<2x1x128xf32>
    %271 = vector.shape_cast %270 : vector<2x1x128xf32> to vector<2x128xf32>
    %272 = arith.truncf %4 : vector<2x32xf32> to vector<2x32xbf16>
    %cst_81 = arith.constant dense<0.000000e+00> : vector<2x128xf32>
    %273 = tpu.matmul %272, %3, %cst_81 {dimension_numbers = #tpu.dot_dimension_numbers<[1], [0], [0], [1], [0, 0, 1, 1], [], []>} : vector<2x32xbf16>, vector<32x128xbf16>, vector<2x128xf32> -> vector<2x128xf32>
    %274 = arith.addf %271, %273 : vector<2x128xf32>
    %275 = vector.extract_strided_slice %274 {offsets = [0, 0], sizes = [2, 32], strides = [1, 1]} : vector<2x128xf32> to vector<2x32xf32>
    %276 = arith.negf %275 : vector<2x32xf32>
    %277 = math.exp %276 : vector<2x32xf32>
    %cst_82 = arith.constant 1.000000e+00 : f32
    %278 = vector.broadcast %cst_82 : f32 to vector<2x32xf32>
    %279 = arith.addf %278, %277 : vector<2x32xf32>
    %280 = arith.divf %278, %279 : vector<2x32xf32>
    %281 = vector.extract_strided_slice %274 {offsets = [0, 32], sizes = [2, 32], strides = [1, 1]} : vector<2x128xf32> to vector<2x32xf32>
    %282 = arith.negf %281 : vector<2x32xf32>
    %283 = math.exp %282 : vector<2x32xf32>
    %cst_83 = arith.constant 1.000000e+00 : f32
    %284 = vector.broadcast %cst_83 : f32 to vector<2x32xf32>
    %285 = arith.addf %284, %283 : vector<2x32xf32>
    %286 = arith.divf %284, %285 : vector<2x32xf32>
    %287 = vector.extract_strided_slice %274 {offsets = [0, 64], sizes = [2, 32], strides = [1, 1]} : vector<2x128xf32> to vector<2x32xf32>
    %288 = math.tanh %287 : vector<2x32xf32>
    %289 = vector.extract_strided_slice %274 {offsets = [0, 96], sizes = [2, 32], strides = [1, 1]} : vector<2x128xf32> to vector<2x32xf32>
    %290 = arith.negf %289 : vector<2x32xf32>
    %291 = math.exp %290 : vector<2x32xf32>
    %cst_84 = arith.constant 1.000000e+00 : f32
    %292 = vector.broadcast %cst_84 : f32 to vector<2x32xf32>
    %293 = arith.addf %292, %291 : vector<2x32xf32>
    %294 = arith.divf %292, %293 : vector<2x32xf32>
    %295 = arith.mulf %286, %4 : vector<2x32xf32>
    %296 = arith.mulf %280, %288 : vector<2x32xf32>
    %297 = arith.addf %295, %296 : vector<2x32xf32>
    %298 = math.tanh %297 : vector<2x32xf32>
    %299 = arith.mulf %294, %298 : vector<2x32xf32>
    %c0_85 = arith.constant 0 : index
    %c7_86 = arith.constant 7 : index
    %c0_87 = arith.constant 0 : index
    %300 = vector.load %arg5[%c0_85, %c7_86, %c0_87] : memref<2x8x64xf32, #tpu.memory_space<vmem>>, vector<2x1x32xf32>
    %301 = vector.shape_cast %300 : vector<2x1x32xf32> to vector<2x32xf32>
    %302 = tpu.concatenate %301, %299 in 1 : vector<2x32xf32>, vector<2x32xf32> -> vector<2x64xf32>
    %cst_88 = arith.constant dense<0.000000e+00> : vector<2xf32>
    %303 = vector.multi_reduction <add>, %302, %cst_88 [1] : vector<2x64xf32> to vector<2xf32>
    %304 = vector.shape_cast %303 : vector<2xf32> to vector<2x1xf32>
    %cst_89 = arith.constant 6.400000e+01 : f32
    %305 = vector.broadcast %cst_89 : f32 to vector<2x1xf32>
    %306 = arith.divf %304, %305 : vector<2x1xf32>
    %307 = vector.broadcast %306 : vector<2x1xf32> to vector<2x64xf32>
    %308 = arith.subf %302, %307 : vector<2x64xf32>
    %309 = arith.mulf %308, %308 : vector<2x64xf32>
    %cst_90 = arith.constant dense<0.000000e+00> : vector<2xf32>
    %310 = vector.multi_reduction <add>, %309, %cst_90 [1] : vector<2x64xf32> to vector<2xf32>
    %311 = vector.shape_cast %310 : vector<2xf32> to vector<2x1xf32>
    %cst_91 = arith.constant 6.400000e+01 : f32
    %312 = vector.broadcast %cst_91 : f32 to vector<2x1xf32>
    %313 = arith.divf %311, %312 : vector<2x1xf32>
    %314 = vector.broadcast %306 : vector<2x1xf32> to vector<2x64xf32>
    %315 = arith.subf %302, %314 : vector<2x64xf32>
    %cst_92 = arith.constant 9.99999974E-6 : f32
    %316 = vector.broadcast %cst_92 : f32 to vector<2x1xf32>
    %317 = arith.addf %313, %316 : vector<2x1xf32>
    %318 = math.rsqrt %317 : vector<2x1xf32>
    %319 = vector.broadcast %318 : vector<2x1xf32> to vector<2x64xf32>
    %320 = arith.mulf %315, %319 : vector<2x64xf32>
    %c0_93 = arith.constant 0 : index
    %c7_94 = arith.constant 7 : index
    %c0_95 = arith.constant 0 : index
    %321 = vector.load %arg5[%c0_93, %c7_94, %c0_95] : memref<2x8x64xf32, #tpu.memory_space<vmem>>, vector<2x1x64xf32>
    %322 = vector.shape_cast %321 : vector<2x1x64xf32> to vector<2x64xf32>
    %323 = vector.shape_cast %320 : vector<2x64xf32> to vector<2x1x64xf32>
    tpu.vector_store %arg5[%c0_93, %c7_94, %c0_95], %323 {strides = array<i32>} : memref<2x8x64xf32, #tpu.memory_space<vmem>>, vector<2x1x64xf32>,
    %c0_96 = arith.constant 0 : index
    %c6_97 = arith.constant 6 : index
    %c0_98 = arith.constant 0 : index
    %324 = vector.load %arg2[%c0_96, %c6_97, %c0_98] : memref<2x8x128xf32, #tpu.memory_space<vmem>>, vector<2x1x128xf32>
    %325 = vector.shape_cast %324 : vector<2x1x128xf32> to vector<2x128xf32>
    %326 = arith.truncf %299 : vector<2x32xf32> to vector<2x32xbf16>
    %cst_99 = arith.constant dense<0.000000e+00> : vector<2x128xf32>
    %327 = tpu.matmul %326, %3, %cst_99 {dimension_numbers = #tpu.dot_dimension_numbers<[1], [0], [0], [1], [0, 0, 1, 1], [], []>} : vector<2x32xbf16>, vector<32x128xbf16>, vector<2x128xf32> -> vector<2x128xf32>
    %328 = arith.addf %325, %327 : vector<2x128xf32>
    %329 = vector.extract_strided_slice %328 {offsets = [0, 0], sizes = [2, 32], strides = [1, 1]} : vector<2x128xf32> to vector<2x32xf32>
    %330 = arith.negf %329 : vector<2x32xf32>
    %331 = math.exp %330 : vector<2x32xf32>
    %cst_100 = arith.constant 1.000000e+00 : f32
    %332 = vector.broadcast %cst_100 : f32 to vector<2x32xf32>
    %333 = arith.addf %332, %331 : vector<2x32xf32>
    %334 = arith.divf %332, %333 : vector<2x32xf32>
    %335 = vector.extract_strided_slice %328 {offsets = [0, 32], sizes = [2, 32], strides = [1, 1]} : vector<2x128xf32> to vector<2x32xf32>
    %336 = arith.negf %335 : vector<2x32xf32>
    %337 = math.exp %336 : vector<2x32xf32>
    %cst_101 = arith.constant 1.000000e+00 : f32
    %338 = vector.broadcast %cst_101 : f32 to vector<2x32xf32>
    %339 = arith.addf %338, %337 : vector<2x32xf32>
    %340 = arith.divf %338, %339 : vector<2x32xf32>
    %341 = vector.extract_strided_slice %328 {offsets = [0, 64], sizes = [2, 32], strides = [1, 1]} : vector<2x128xf32> to vector<2x32xf32>
    %342 = math.tanh %341 : vector<2x32xf32>
    %343 = vector.extract_strided_slice %328 {offsets = [0, 96], sizes = [2, 32], strides = [1, 1]} : vector<2x128xf32> to vector<2x32xf32>
    %344 = arith.negf %343 : vector<2x32xf32>
    %345 = math.exp %344 : vector<2x32xf32>
    %cst_102 = arith.constant 1.000000e+00 : f32
    %346 = vector.broadcast %cst_102 : f32 to vector<2x32xf32>
    %347 = arith.addf %346, %345 : vector<2x32xf32>
    %348 = arith.divf %346, %347 : vector<2x32xf32>
    %349 = arith.mulf %340, %297 : vector<2x32xf32>
    %350 = arith.mulf %334, %342 : vector<2x32xf32>
    %351 = arith.addf %349, %350 : vector<2x32xf32>
    %352 = math.tanh %351 : vector<2x32xf32>
    %353 = arith.mulf %348, %352 : vector<2x32xf32>
    %c0_103 = arith.constant 0 : index
    %c6_104 = arith.constant 6 : index
    %c0_105 = arith.constant 0 : index
    %354 = vector.load %arg5[%c0_103, %c6_104, %c0_105] : memref<2x8x64xf32, #tpu.memory_space<vmem>>, vector<2x1x32xf32>
    %355 = vector.shape_cast %354 : vector<2x1x32xf32> to vector<2x32xf32>
    %356 = tpu.concatenate %355, %353 in 1 : vector<2x32xf32>, vector<2x32xf32> -> vector<2x64xf32>
    %cst_106 = arith.constant dense<0.000000e+00> : vector<2xf32>
    %357 = vector.multi_reduction <add>, %356, %cst_106 [1] : vector<2x64xf32> to vector<2xf32>
    %358 = vector.shape_cast %357 : vector<2xf32> to vector<2x1xf32>
    %cst_107 = arith.constant 6.400000e+01 : f32
    %359 = vector.broadcast %cst_107 : f32 to vector<2x1xf32>
    %360 = arith.divf %358, %359 : vector<2x1xf32>
    %361 = vector.broadcast %360 : vector<2x1xf32> to vector<2x64xf32>
    %362 = arith.subf %356, %361 : vector<2x64xf32>
    %363 = arith.mulf %362, %362 : vector<2x64xf32>
    %cst_108 = arith.constant dense<0.000000e+00> : vector<2xf32>
    %364 = vector.multi_reduction <add>, %363, %cst_108 [1] : vector<2x64xf32> to vector<2xf32>
    %365 = vector.shape_cast %364 : vector<2xf32> to vector<2x1xf32>
    %cst_109 = arith.constant 6.400000e+01 : f32
    %366 = vector.broadcast %cst_109 : f32 to vector<2x1xf32>
    %367 = arith.divf %365, %366 : vector<2x1xf32>
    %368 = vector.broadcast %360 : vector<2x1xf32> to vector<2x64xf32>
    %369 = arith.subf %356, %368 : vector<2x64xf32>
    %cst_110 = arith.constant 9.99999974E-6 : f32
    %370 = vector.broadcast %cst_110 : f32 to vector<2x1xf32>
    %371 = arith.addf %367, %370 : vector<2x1xf32>
    %372 = math.rsqrt %371 : vector<2x1xf32>
    %373 = vector.broadcast %372 : vector<2x1xf32> to vector<2x64xf32>
    %374 = arith.mulf %369, %373 : vector<2x64xf32>
    %c0_111 = arith.constant 0 : index
    %c6_112 = arith.constant 6 : index
    %c0_113 = arith.constant 0 : index
    %375 = vector.load %arg5[%c0_111, %c6_112, %c0_113] : memref<2x8x64xf32, #tpu.memory_space<vmem>>, vector<2x1x64xf32>
    %376 = vector.shape_cast %375 : vector<2x1x64xf32> to vector<2x64xf32>
    %377 = vector.shape_cast %374 : vector<2x64xf32> to vector<2x1x64xf32>
    tpu.vector_store %arg5[%c0_111, %c6_112, %c0_113], %377 {strides = array<i32>} : memref<2x8x64xf32, #tpu.memory_space<vmem>>, vector<2x1x64xf32>,
    %c0_114 = arith.constant 0 : index
    %c5_115 = arith.constant 5 : index
    %c0_116 = arith.constant 0 : index
    %378 = vector.load %arg2[%c0_114, %c5_115, %c0_116] : memref<2x8x128xf32, #tpu.memory_space<vmem>>, vector<2x1x128xf32>
    %379 = vector.shape_cast %378 : vector<2x1x128xf32> to vector<2x128xf32>
    %380 = arith.truncf %353 : vector<2x32xf32> to vector<2x32xbf16>
    %cst_117 = arith.constant dense<0.000000e+00> : vector<2x128xf32>
    %381 = tpu.matmul %380, %3, %cst_117 {dimension_numbers = #tpu.dot_dimension_numbers<[1], [0], [0], [1], [0, 0, 1, 1], [], []>} : vector<2x32xbf16>, vector<32x128xbf16>, vector<2x128xf32> -> vector<2x128xf32>
    %382 = arith.addf %379, %381 : vector<2x128xf32>
    %383 = vector.extract_strided_slice %382 {offsets = [0, 0], sizes = [2, 32], strides = [1, 1]} : vector<2x128xf32> to vector<2x32xf32>
    %384 = arith.negf %383 : vector<2x32xf32>
    %385 = math.exp %384 : vector<2x32xf32>
    %cst_118 = arith.constant 1.000000e+00 : f32
    %386 = vector.broadcast %cst_118 : f32 to vector<2x32xf32>
    %387 = arith.addf %386, %385 : vector<2x32xf32>
    %388 = arith.divf %386, %387 : vector<2x32xf32>
    %389 = vector.extract_strided_slice %382 {offsets = [0, 32], sizes = [2, 32], strides = [1, 1]} : vector<2x128xf32> to vector<2x32xf32>
    %390 = arith.negf %389 : vector<2x32xf32>
    %391 = math.exp %390 : vector<2x32xf32>
    %cst_119 = arith.constant 1.000000e+00 : f32
    %392 = vector.broadcast %cst_119 : f32 to vector<2x32xf32>
    %393 = arith.addf %392, %391 : vector<2x32xf32>
    %394 = arith.divf %392, %393 : vector<2x32xf32>
    %395 = vector.extract_strided_slice %382 {offsets = [0, 64], sizes = [2, 32], strides = [1, 1]} : vector<2x128xf32> to vector<2x32xf32>
    %396 = math.tanh %395 : vector<2x32xf32>
    %397 = vector.extract_strided_slice %382 {offsets = [0, 96], sizes = [2, 32], strides = [1, 1]} : vector<2x128xf32> to vector<2x32xf32>
    %398 = arith.negf %397 : vector<2x32xf32>
    %399 = math.exp %398 : vector<2x32xf32>
    %cst_120 = arith.constant 1.000000e+00 : f32
    %400 = vector.broadcast %cst_120 : f32 to vector<2x32xf32>
    %401 = arith.addf %400, %399 : vector<2x32xf32>
    %402 = arith.divf %400, %401 : vector<2x32xf32>
    %403 = arith.mulf %394, %351 : vector<2x32xf32>
    %404 = arith.mulf %388, %396 : vector<2x32xf32>
    %405 = arith.addf %403, %404 : vector<2x32xf32>
    %406 = math.tanh %405 : vector<2x32xf32>
    %407 = arith.mulf %402, %406 : vector<2x32xf32>
    %c0_121 = arith.constant 0 : index
    %c5_122 = arith.constant 5 : index
    %c0_123 = arith.constant 0 : index
    %408 = vector.load %arg5[%c0_121, %c5_122, %c0_123] : memref<2x8x64xf32, #tpu.memory_space<vmem>>, vector<2x1x32xf32>
    %409 = vector.shape_cast %408 : vector<2x1x32xf32> to vector<2x32xf32>
    %410 = tpu.concatenate %409, %407 in 1 : vector<2x32xf32>, vector<2x32xf32> -> vector<2x64xf32>
    %cst_124 = arith.constant dense<0.000000e+00> : vector<2xf32>
    %411 = vector.multi_reduction <add>, %410, %cst_124 [1] : vector<2x64xf32> to vector<2xf32>
    %412 = vector.shape_cast %411 : vector<2xf32> to vector<2x1xf32>
    %cst_125 = arith.constant 6.400000e+01 : f32
    %413 = vector.broadcast %cst_125 : f32 to vector<2x1xf32>
    %414 = arith.divf %412, %413 : vector<2x1xf32>
    %415 = vector.broadcast %414 : vector<2x1xf32> to vector<2x64xf32>
    %416 = arith.subf %410, %415 : vector<2x64xf32>
    %417 = arith.mulf %416, %416 : vector<2x64xf32>
    %cst_126 = arith.constant dense<0.000000e+00> : vector<2xf32>
    %418 = vector.multi_reduction <add>, %417, %cst_126 [1] : vector<2x64xf32> to vector<2xf32>
    %419 = vector.shape_cast %418 : vector<2xf32> to vector<2x1xf32>
    %cst_127 = arith.constant 6.400000e+01 : f32
    %420 = vector.broadcast %cst_127 : f32 to vector<2x1xf32>
    %421 = arith.divf %419, %420 : vector<2x1xf32>
    %422 = vector.broadcast %414 : vector<2x1xf32> to vector<2x64xf32>
    %423 = arith.subf %410, %422 : vector<2x64xf32>
    %cst_128 = arith.constant 9.99999974E-6 : f32
    %424 = vector.broadcast %cst_128 : f32 to vector<2x1xf32>
    %425 = arith.addf %421, %424 : vector<2x1xf32>
    %426 = math.rsqrt %425 : vector<2x1xf32>
    %427 = vector.broadcast %426 : vector<2x1xf32> to vector<2x64xf32>
    %428 = arith.mulf %423, %427 : vector<2x64xf32>
    %c0_129 = arith.constant 0 : index
    %c5_130 = arith.constant 5 : index
    %c0_131 = arith.constant 0 : index
    %429 = vector.load %arg5[%c0_129, %c5_130, %c0_131] : memref<2x8x64xf32, #tpu.memory_space<vmem>>, vector<2x1x64xf32>
    %430 = vector.shape_cast %429 : vector<2x1x64xf32> to vector<2x64xf32>
    %431 = vector.shape_cast %428 : vector<2x64xf32> to vector<2x1x64xf32>
    tpu.vector_store %arg5[%c0_129, %c5_130, %c0_131], %431 {strides = array<i32>} : memref<2x8x64xf32, #tpu.memory_space<vmem>>, vector<2x1x64xf32>,
    %c0_132 = arith.constant 0 : index
    %c4_133 = arith.constant 4 : index
    %c0_134 = arith.constant 0 : index
    %432 = vector.load %arg2[%c0_132, %c4_133, %c0_134] : memref<2x8x128xf32, #tpu.memory_space<vmem>>, vector<2x1x128xf32>
    %433 = vector.shape_cast %432 : vector<2x1x128xf32> to vector<2x128xf32>
    %434 = arith.truncf %407 : vector<2x32xf32> to vector<2x32xbf16>
    %cst_135 = arith.constant dense<0.000000e+00> : vector<2x128xf32>
    %435 = tpu.matmul %434, %3, %cst_135 {dimension_numbers = #tpu.dot_dimension_numbers<[1], [0], [0], [1], [0, 0, 1, 1], [], []>} : vector<2x32xbf16>, vector<32x128xbf16>, vector<2x128xf32> -> vector<2x128xf32>
    %436 = arith.addf %433, %435 : vector<2x128xf32>
    %437 = vector.extract_strided_slice %436 {offsets = [0, 0], sizes = [2, 32], strides = [1, 1]} : vector<2x128xf32> to vector<2x32xf32>
    %438 = arith.negf %437 : vector<2x32xf32>
    %439 = math.exp %438 : vector<2x32xf32>
    %cst_136 = arith.constant 1.000000e+00 : f32
    %440 = vector.broadcast %cst_136 : f32 to vector<2x32xf32>
    %441 = arith.addf %440, %439 : vector<2x32xf32>
    %442 = arith.divf %440, %441 : vector<2x32xf32>
    %443 = vector.extract_strided_slice %436 {offsets = [0, 32], sizes = [2, 32], strides = [1, 1]} : vector<2x128xf32> to vector<2x32xf32>
    %444 = arith.negf %443 : vector<2x32xf32>
    %445 = math.exp %444 : vector<2x32xf32>
    %cst_137 = arith.constant 1.000000e+00 : f32
    %446 = vector.broadcast %cst_137 : f32 to vector<2x32xf32>
    %447 = arith.addf %446, %445 : vector<2x32xf32>
    %448 = arith.divf %446, %447 : vector<2x32xf32>
    %449 = vector.extract_strided_slice %436 {offsets = [0, 64], sizes = [2, 32], strides = [1, 1]} : vector<2x128xf32> to vector<2x32xf32>
    %450 = math.tanh %449 : vector<2x32xf32>
    %451 = vector.extract_strided_slice %436 {offsets = [0, 96], sizes = [2, 32], strides = [1, 1]} : vector<2x128xf32> to vector<2x32xf32>
    %452 = arith.negf %451 : vector<2x32xf32>
    %453 = math.exp %452 : vector<2x32xf32>
    %cst_138 = arith.constant 1.000000e+00 : f32
    %454 = vector.broadcast %cst_138 : f32 to vector<2x32xf32>
    %455 = arith.addf %454, %453 : vector<2x32xf32>
    %456 = arith.divf %454, %455 : vector<2x32xf32>
    %457 = arith.mulf %448, %405 : vector<2x32xf32>
    %458 = arith.mulf %442, %450 : vector<2x32xf32>
    %459 = arith.addf %457, %458 : vector<2x32xf32>
    %460 = math.tanh %459 : vector<2x32xf32>
    %461 = arith.mulf %456, %460 : vector<2x32xf32>
    %c0_139 = arith.constant 0 : index
    %c4_140 = arith.constant 4 : index
    %c0_141 = arith.constant 0 : index
    %462 = vector.load %arg5[%c0_139, %c4_140, %c0_141] : memref<2x8x64xf32, #tpu.memory_space<vmem>>, vector<2x1x32xf32>
    %463 = vector.shape_cast %462 : vector<2x1x32xf32> to vector<2x32xf32>
    %464 = tpu.concatenate %463, %461 in 1 : vector<2x32xf32>, vector<2x32xf32> -> vector<2x64xf32>
    %cst_142 = arith.constant dense<0.000000e+00> : vector<2xf32>
    %465 = vector.multi_reduction <add>, %464, %cst_142 [1] : vector<2x64xf32> to vector<2xf32>
    %466 = vector.shape_cast %465 : vector<2xf32> to vector<2x1xf32>
    %cst_143 = arith.constant 6.400000e+01 : f32
    %467 = vector.broadcast %cst_143 : f32 to vector<2x1xf32>
    %468 = arith.divf %466, %467 : vector<2x1xf32>
    %469 = vector.broadcast %468 : vector<2x1xf32> to vector<2x64xf32>
    %470 = arith.subf %464, %469 : vector<2x64xf32>
    %471 = arith.mulf %470, %470 : vector<2x64xf32>
    %cst_144 = arith.constant dense<0.000000e+00> : vector<2xf32>
    %472 = vector.multi_reduction <add>, %471, %cst_144 [1] : vector<2x64xf32> to vector<2xf32>
    %473 = vector.shape_cast %472 : vector<2xf32> to vector<2x1xf32>
    %cst_145 = arith.constant 6.400000e+01 : f32
    %474 = vector.broadcast %cst_145 : f32 to vector<2x1xf32>
    %475 = arith.divf %473, %474 : vector<2x1xf32>
    %476 = vector.broadcast %468 : vector<2x1xf32> to vector<2x64xf32>
    %477 = arith.subf %464, %476 : vector<2x64xf32>
    %cst_146 = arith.constant 9.99999974E-6 : f32
    %478 = vector.broadcast %cst_146 : f32 to vector<2x1xf32>
    %479 = arith.addf %475, %478 : vector<2x1xf32>
    %480 = math.rsqrt %479 : vector<2x1xf32>
    %481 = vector.broadcast %480 : vector<2x1xf32> to vector<2x64xf32>
    %482 = arith.mulf %477, %481 : vector<2x64xf32>
    %c0_147 = arith.constant 0 : index
    %c4_148 = arith.constant 4 : index
    %c0_149 = arith.constant 0 : index
    %483 = vector.load %arg5[%c0_147, %c4_148, %c0_149] : memref<2x8x64xf32, #tpu.memory_space<vmem>>, vector<2x1x64xf32>
    %484 = vector.shape_cast %483 : vector<2x1x64xf32> to vector<2x64xf32>
    %485 = vector.shape_cast %482 : vector<2x64xf32> to vector<2x1x64xf32>
    tpu.vector_store %arg5[%c0_147, %c4_148, %c0_149], %485 {strides = array<i32>} : memref<2x8x64xf32, #tpu.memory_space<vmem>>, vector<2x1x64xf32>,
    %c0_150 = arith.constant 0 : index
    %c3_151 = arith.constant 3 : index
    %c0_152 = arith.constant 0 : index
    %486 = vector.load %arg2[%c0_150, %c3_151, %c0_152] : memref<2x8x128xf32, #tpu.memory_space<vmem>>, vector<2x1x128xf32>
    %487 = vector.shape_cast %486 : vector<2x1x128xf32> to vector<2x128xf32>
    %488 = arith.truncf %461 : vector<2x32xf32> to vector<2x32xbf16>
    %cst_153 = arith.constant dense<0.000000e+00> : vector<2x128xf32>
    %489 = tpu.matmul %488, %3, %cst_153 {dimension_numbers = #tpu.dot_dimension_numbers<[1], [0], [0], [1], [0, 0, 1, 1], [], []>} : vector<2x32xbf16>, vector<32x128xbf16>, vector<2x128xf32> -> vector<2x128xf32>
    %490 = arith.addf %487, %489 : vector<2x128xf32>
    %491 = vector.extract_strided_slice %490 {offsets = [0, 0], sizes = [2, 32], strides = [1, 1]} : vector<2x128xf32> to vector<2x32xf32>
    %492 = arith.negf %491 : vector<2x32xf32>
    %493 = math.exp %492 : vector<2x32xf32>
    %cst_154 = arith.constant 1.000000e+00 : f32
    %494 = vector.broadcast %cst_154 : f32 to vector<2x32xf32>
    %495 = arith.addf %494, %493 : vector<2x32xf32>
    %496 = arith.divf %494, %495 : vector<2x32xf32>
    %497 = vector.extract_strided_slice %490 {offsets = [0, 32], sizes = [2, 32], strides = [1, 1]} : vector<2x128xf32> to vector<2x32xf32>
    %498 = arith.negf %497 : vector<2x32xf32>
    %499 = math.exp %498 : vector<2x32xf32>
    %cst_155 = arith.constant 1.000000e+00 : f32
    %500 = vector.broadcast %cst_155 : f32 to vector<2x32xf32>
    %501 = arith.addf %500, %499 : vector<2x32xf32>
    %502 = arith.divf %500, %501 : vector<2x32xf32>
    %503 = vector.extract_strided_slice %490 {offsets = [0, 64], sizes = [2, 32], strides = [1, 1]} : vector<2x128xf32> to vector<2x32xf32>
    %504 = math.tanh %503 : vector<2x32xf32>
    %505 = vector.extract_strided_slice %490 {offsets = [0, 96], sizes = [2, 32], strides = [1, 1]} : vector<2x128xf32> to vector<2x32xf32>
    %506 = arith.negf %505 : vector<2x32xf32>
    %507 = math.exp %506 : vector<2x32xf32>
    %cst_156 = arith.constant 1.000000e+00 : f32
    %508 = vector.broadcast %cst_156 : f32 to vector<2x32xf32>
    %509 = arith.addf %508, %507 : vector<2x32xf32>
    %510 = arith.divf %508, %509 : vector<2x32xf32>
    %511 = arith.mulf %502, %459 : vector<2x32xf32>
    %512 = arith.mulf %496, %504 : vector<2x32xf32>
    %513 = arith.addf %511, %512 : vector<2x32xf32>
    %514 = math.tanh %513 : vector<2x32xf32>
    %515 = arith.mulf %510, %514 : vector<2x32xf32>
    %c0_157 = arith.constant 0 : index
    %c3_158 = arith.constant 3 : index
    %c0_159 = arith.constant 0 : index
    %516 = vector.load %arg5[%c0_157, %c3_158, %c0_159] : memref<2x8x64xf32, #tpu.memory_space<vmem>>, vector<2x1x32xf32>
    %517 = vector.shape_cast %516 : vector<2x1x32xf32> to vector<2x32xf32>
    %518 = tpu.concatenate %517, %515 in 1 : vector<2x32xf32>, vector<2x32xf32> -> vector<2x64xf32>
    %cst_160 = arith.constant dense<0.000000e+00> : vector<2xf32>
    %519 = vector.multi_reduction <add>, %518, %cst_160 [1] : vector<2x64xf32> to vector<2xf32>
    %520 = vector.shape_cast %519 : vector<2xf32> to vector<2x1xf32>
    %cst_161 = arith.constant 6.400000e+01 : f32
    %521 = vector.broadcast %cst_161 : f32 to vector<2x1xf32>
    %522 = arith.divf %520, %521 : vector<2x1xf32>
    %523 = vector.broadcast %522 : vector<2x1xf32> to vector<2x64xf32>
    %524 = arith.subf %518, %523 : vector<2x64xf32>
    %525 = arith.mulf %524, %524 : vector<2x64xf32>
    %cst_162 = arith.constant dense<0.000000e+00> : vector<2xf32>
    %526 = vector.multi_reduction <add>, %525, %cst_162 [1] : vector<2x64xf32> to vector<2xf32>
    %527 = vector.shape_cast %526 : vector<2xf32> to vector<2x1xf32>
    %cst_163 = arith.constant 6.400000e+01 : f32
    %528 = vector.broadcast %cst_163 : f32 to vector<2x1xf32>
    %529 = arith.divf %527, %528 : vector<2x1xf32>
    %530 = vector.broadcast %522 : vector<2x1xf32> to vector<2x64xf32>
    %531 = arith.subf %518, %530 : vector<2x64xf32>
    %cst_164 = arith.constant 9.99999974E-6 : f32
    %532 = vector.broadcast %cst_164 : f32 to vector<2x1xf32>
    %533 = arith.addf %529, %532 : vector<2x1xf32>
    %534 = math.rsqrt %533 : vector<2x1xf32>
    %535 = vector.broadcast %534 : vector<2x1xf32> to vector<2x64xf32>
    %536 = arith.mulf %531, %535 : vector<2x64xf32>
    %c0_165 = arith.constant 0 : index
    %c3_166 = arith.constant 3 : index
    %c0_167 = arith.constant 0 : index
    %537 = vector.load %arg5[%c0_165, %c3_166, %c0_167] : memref<2x8x64xf32, #tpu.memory_space<vmem>>, vector<2x1x64xf32>
    %538 = vector.shape_cast %537 : vector<2x1x64xf32> to vector<2x64xf32>
    %539 = vector.shape_cast %536 : vector<2x64xf32> to vector<2x1x64xf32>
    tpu.vector_store %arg5[%c0_165, %c3_166, %c0_167], %539 {strides = array<i32>} : memref<2x8x64xf32, #tpu.memory_space<vmem>>, vector<2x1x64xf32>,
    %c0_168 = arith.constant 0 : index
    %c2_169 = arith.constant 2 : index
    %c0_170 = arith.constant 0 : index
    %540 = vector.load %arg2[%c0_168, %c2_169, %c0_170] : memref<2x8x128xf32, #tpu.memory_space<vmem>>, vector<2x1x128xf32>
    %541 = vector.shape_cast %540 : vector<2x1x128xf32> to vector<2x128xf32>
    %542 = arith.truncf %515 : vector<2x32xf32> to vector<2x32xbf16>
    %cst_171 = arith.constant dense<0.000000e+00> : vector<2x128xf32>
    %543 = tpu.matmul %542, %3, %cst_171 {dimension_numbers = #tpu.dot_dimension_numbers<[1], [0], [0], [1], [0, 0, 1, 1], [], []>} : vector<2x32xbf16>, vector<32x128xbf16>, vector<2x128xf32> -> vector<2x128xf32>
    %544 = arith.addf %541, %543 : vector<2x128xf32>
    %545 = vector.extract_strided_slice %544 {offsets = [0, 0], sizes = [2, 32], strides = [1, 1]} : vector<2x128xf32> to vector<2x32xf32>
    %546 = arith.negf %545 : vector<2x32xf32>
    %547 = math.exp %546 : vector<2x32xf32>
    %cst_172 = arith.constant 1.000000e+00 : f32
    %548 = vector.broadcast %cst_172 : f32 to vector<2x32xf32>
    %549 = arith.addf %548, %547 : vector<2x32xf32>
    %550 = arith.divf %548, %549 : vector<2x32xf32>
    %551 = vector.extract_strided_slice %544 {offsets = [0, 32], sizes = [2, 32], strides = [1, 1]} : vector<2x128xf32> to vector<2x32xf32>
    %552 = arith.negf %551 : vector<2x32xf32>
    %553 = math.exp %552 : vector<2x32xf32>
    %cst_173 = arith.constant 1.000000e+00 : f32
    %554 = vector.broadcast %cst_173 : f32 to vector<2x32xf32>
    %555 = arith.addf %554, %553 : vector<2x32xf32>
    %556 = arith.divf %554, %555 : vector<2x32xf32>
    %557 = vector.extract_strided_slice %544 {offsets = [0, 64], sizes = [2, 32], strides = [1, 1]} : vector<2x128xf32> to vector<2x32xf32>
    %558 = math.tanh %557 : vector<2x32xf32>
    %559 = vector.extract_strided_slice %544 {offsets = [0, 96], sizes = [2, 32], strides = [1, 1]} : vector<2x128xf32> to vector<2x32xf32>
    %560 = arith.negf %559 : vector<2x32xf32>
    %561 = math.exp %560 : vector<2x32xf32>
    %cst_174 = arith.constant 1.000000e+00 : f32
    %562 = vector.broadcast %cst_174 : f32 to vector<2x32xf32>
    %563 = arith.addf %562, %561 : vector<2x32xf32>
    %564 = arith.divf %562, %563 : vector<2x32xf32>
    %565 = arith.mulf %556, %513 : vector<2x32xf32>
    %566 = arith.mulf %550, %558 : vector<2x32xf32>
    %567 = arith.addf %565, %566 : vector<2x32xf32>
    %568 = math.tanh %567 : vector<2x32xf32>
    %569 = arith.mulf %564, %568 : vector<2x32xf32>
    %c0_175 = arith.constant 0 : index
    %c2_176 = arith.constant 2 : index
    %c0_177 = arith.constant 0 : index
    %570 = vector.load %arg5[%c0_175, %c2_176, %c0_177] : memref<2x8x64xf32, #tpu.memory_space<vmem>>, vector<2x1x32xf32>
    %571 = vector.shape_cast %570 : vector<2x1x32xf32> to vector<2x32xf32>
    %572 = tpu.concatenate %571, %569 in 1 : vector<2x32xf32>, vector<2x32xf32> -> vector<2x64xf32>
    %cst_178 = arith.constant dense<0.000000e+00> : vector<2xf32>
    %573 = vector.multi_reduction <add>, %572, %cst_178 [1] : vector<2x64xf32> to vector<2xf32>
    %574 = vector.shape_cast %573 : vector<2xf32> to vector<2x1xf32>
    %cst_179 = arith.constant 6.400000e+01 : f32
    %575 = vector.broadcast %cst_179 : f32 to vector<2x1xf32>
    %576 = arith.divf %574, %575 : vector<2x1xf32>
    %577 = vector.broadcast %576 : vector<2x1xf32> to vector<2x64xf32>
    %578 = arith.subf %572, %577 : vector<2x64xf32>
    %579 = arith.mulf %578, %578 : vector<2x64xf32>
    %cst_180 = arith.constant dense<0.000000e+00> : vector<2xf32>
    %580 = vector.multi_reduction <add>, %579, %cst_180 [1] : vector<2x64xf32> to vector<2xf32>
    %581 = vector.shape_cast %580 : vector<2xf32> to vector<2x1xf32>
    %cst_181 = arith.constant 6.400000e+01 : f32
    %582 = vector.broadcast %cst_181 : f32 to vector<2x1xf32>
    %583 = arith.divf %581, %582 : vector<2x1xf32>
    %584 = vector.broadcast %576 : vector<2x1xf32> to vector<2x64xf32>
    %585 = arith.subf %572, %584 : vector<2x64xf32>
    %cst_182 = arith.constant 9.99999974E-6 : f32
    %586 = vector.broadcast %cst_182 : f32 to vector<2x1xf32>
    %587 = arith.addf %583, %586 : vector<2x1xf32>
    %588 = math.rsqrt %587 : vector<2x1xf32>
    %589 = vector.broadcast %588 : vector<2x1xf32> to vector<2x64xf32>
    %590 = arith.mulf %585, %589 : vector<2x64xf32>
    %c0_183 = arith.constant 0 : index
    %c2_184 = arith.constant 2 : index
    %c0_185 = arith.constant 0 : index
    %591 = vector.load %arg5[%c0_183, %c2_184, %c0_185] : memref<2x8x64xf32, #tpu.memory_space<vmem>>, vector<2x1x64xf32>
    %592 = vector.shape_cast %591 : vector<2x1x64xf32> to vector<2x64xf32>
    %593 = vector.shape_cast %590 : vector<2x64xf32> to vector<2x1x64xf32>
    tpu.vector_store %arg5[%c0_183, %c2_184, %c0_185], %593 {strides = array<i32>} : memref<2x8x64xf32, #tpu.memory_space<vmem>>, vector<2x1x64xf32>,
    %c0_186 = arith.constant 0 : index
    %c1_187 = arith.constant 1 : index
    %c0_188 = arith.constant 0 : index
    %594 = vector.load %arg2[%c0_186, %c1_187, %c0_188] : memref<2x8x128xf32, #tpu.memory_space<vmem>>, vector<2x1x128xf32>
    %595 = vector.shape_cast %594 : vector<2x1x128xf32> to vector<2x128xf32>
    %596 = arith.truncf %569 : vector<2x32xf32> to vector<2x32xbf16>
    %cst_189 = arith.constant dense<0.000000e+00> : vector<2x128xf32>
    %597 = tpu.matmul %596, %3, %cst_189 {dimension_numbers = #tpu.dot_dimension_numbers<[1], [0], [0], [1], [0, 0, 1, 1], [], []>} : vector<2x32xbf16>, vector<32x128xbf16>, vector<2x128xf32> -> vector<2x128xf32>
    %598 = arith.addf %595, %597 : vector<2x128xf32>
    %599 = vector.extract_strided_slice %598 {offsets = [0, 0], sizes = [2, 32], strides = [1, 1]} : vector<2x128xf32> to vector<2x32xf32>
    %600 = arith.negf %599 : vector<2x32xf32>
    %601 = math.exp %600 : vector<2x32xf32>
    %cst_190 = arith.constant 1.000000e+00 : f32
    %602 = vector.broadcast %cst_190 : f32 to vector<2x32xf32>
    %603 = arith.addf %602, %601 : vector<2x32xf32>
    %604 = arith.divf %602, %603 : vector<2x32xf32>
    %605 = vector.extract_strided_slice %598 {offsets = [0, 32], sizes = [2, 32], strides = [1, 1]} : vector<2x128xf32> to vector<2x32xf32>
    %606 = arith.negf %605 : vector<2x32xf32>
    %607 = math.exp %606 : vector<2x32xf32>
    %cst_191 = arith.constant 1.000000e+00 : f32
    %608 = vector.broadcast %cst_191 : f32 to vector<2x32xf32>
    %609 = arith.addf %608, %607 : vector<2x32xf32>
    %610 = arith.divf %608, %609 : vector<2x32xf32>
    %611 = vector.extract_strided_slice %598 {offsets = [0, 64], sizes = [2, 32], strides = [1, 1]} : vector<2x128xf32> to vector<2x32xf32>
    %612 = math.tanh %611 : vector<2x32xf32>
    %613 = vector.extract_strided_slice %598 {offsets = [0, 96], sizes = [2, 32], strides = [1, 1]} : vector<2x128xf32> to vector<2x32xf32>
    %614 = arith.negf %613 : vector<2x32xf32>
    %615 = math.exp %614 : vector<2x32xf32>
    %cst_192 = arith.constant 1.000000e+00 : f32
    %616 = vector.broadcast %cst_192 : f32 to vector<2x32xf32>
    %617 = arith.addf %616, %615 : vector<2x32xf32>
    %618 = arith.divf %616, %617 : vector<2x32xf32>
    %619 = arith.mulf %610, %567 : vector<2x32xf32>
    %620 = arith.mulf %604, %612 : vector<2x32xf32>
    %621 = arith.addf %619, %620 : vector<2x32xf32>
    %622 = math.tanh %621 : vector<2x32xf32>
    %623 = arith.mulf %618, %622 : vector<2x32xf32>
    %c0_193 = arith.constant 0 : index
    %c1_194 = arith.constant 1 : index
    %c0_195 = arith.constant 0 : index
    %624 = vector.load %arg5[%c0_193, %c1_194, %c0_195] : memref<2x8x64xf32, #tpu.memory_space<vmem>>, vector<2x1x32xf32>
    %625 = vector.shape_cast %624 : vector<2x1x32xf32> to vector<2x32xf32>
    %626 = tpu.concatenate %625, %623 in 1 : vector<2x32xf32>, vector<2x32xf32> -> vector<2x64xf32>
    %cst_196 = arith.constant dense<0.000000e+00> : vector<2xf32>
    %627 = vector.multi_reduction <add>, %626, %cst_196 [1] : vector<2x64xf32> to vector<2xf32>
    %628 = vector.shape_cast %627 : vector<2xf32> to vector<2x1xf32>
    %cst_197 = arith.constant 6.400000e+01 : f32
    %629 = vector.broadcast %cst_197 : f32 to vector<2x1xf32>
    %630 = arith.divf %628, %629 : vector<2x1xf32>
    %631 = vector.broadcast %630 : vector<2x1xf32> to vector<2x64xf32>
    %632 = arith.subf %626, %631 : vector<2x64xf32>
    %633 = arith.mulf %632, %632 : vector<2x64xf32>
    %cst_198 = arith.constant dense<0.000000e+00> : vector<2xf32>
    %634 = vector.multi_reduction <add>, %633, %cst_198 [1] : vector<2x64xf32> to vector<2xf32>
    %635 = vector.shape_cast %634 : vector<2xf32> to vector<2x1xf32>
    %cst_199 = arith.constant 6.400000e+01 : f32
    %636 = vector.broadcast %cst_199 : f32 to vector<2x1xf32>
    %637 = arith.divf %635, %636 : vector<2x1xf32>
    %638 = vector.broadcast %630 : vector<2x1xf32> to vector<2x64xf32>
    %639 = arith.subf %626, %638 : vector<2x64xf32>
    %cst_200 = arith.constant 9.99999974E-6 : f32
    %640 = vector.broadcast %cst_200 : f32 to vector<2x1xf32>
    %641 = arith.addf %637, %640 : vector<2x1xf32>
    %642 = math.rsqrt %641 : vector<2x1xf32>
    %643 = vector.broadcast %642 : vector<2x1xf32> to vector<2x64xf32>
    %644 = arith.mulf %639, %643 : vector<2x64xf32>
    %c0_201 = arith.constant 0 : index
    %c1_202 = arith.constant 1 : index
    %c0_203 = arith.constant 0 : index
    %645 = vector.load %arg5[%c0_201, %c1_202, %c0_203] : memref<2x8x64xf32, #tpu.memory_space<vmem>>, vector<2x1x64xf32>
    %646 = vector.shape_cast %645 : vector<2x1x64xf32> to vector<2x64xf32>
    %647 = vector.shape_cast %644 : vector<2x64xf32> to vector<2x1x64xf32>
    tpu.vector_store %arg5[%c0_201, %c1_202, %c0_203], %647 {strides = array<i32>} : memref<2x8x64xf32, #tpu.memory_space<vmem>>, vector<2x1x64xf32>,
    %c0_204 = arith.constant 0 : index
    %c0_205 = arith.constant 0 : index
    %c0_206 = arith.constant 0 : index
    %648 = vector.load %arg2[%c0_204, %c0_205, %c0_206] : memref<2x8x128xf32, #tpu.memory_space<vmem>>, vector<2x1x128xf32>
    %649 = vector.shape_cast %648 : vector<2x1x128xf32> to vector<2x128xf32>
    %650 = arith.truncf %623 : vector<2x32xf32> to vector<2x32xbf16>
    %cst_207 = arith.constant dense<0.000000e+00> : vector<2x128xf32>
    %651 = tpu.matmul %650, %3, %cst_207 {dimension_numbers = #tpu.dot_dimension_numbers<[1], [0], [0], [1], [0, 0, 1, 1], [], []>} : vector<2x32xbf16>, vector<32x128xbf16>, vector<2x128xf32> -> vector<2x128xf32>
    %652 = arith.addf %649, %651 : vector<2x128xf32>
    %653 = vector.extract_strided_slice %652 {offsets = [0, 0], sizes = [2, 32], strides = [1, 1]} : vector<2x128xf32> to vector<2x32xf32>
    %654 = arith.negf %653 : vector<2x32xf32>
    %655 = math.exp %654 : vector<2x32xf32>
    %cst_208 = arith.constant 1.000000e+00 : f32
    %656 = vector.broadcast %cst_208 : f32 to vector<2x32xf32>
    %657 = arith.addf %656, %655 : vector<2x32xf32>
    %658 = arith.divf %656, %657 : vector<2x32xf32>
    %659 = vector.extract_strided_slice %652 {offsets = [0, 32], sizes = [2, 32], strides = [1, 1]} : vector<2x128xf32> to vector<2x32xf32>
    %660 = arith.negf %659 : vector<2x32xf32>
    %661 = math.exp %660 : vector<2x32xf32>
    %cst_209 = arith.constant 1.000000e+00 : f32
    %662 = vector.broadcast %cst_209 : f32 to vector<2x32xf32>
    %663 = arith.addf %662, %661 : vector<2x32xf32>
    %664 = arith.divf %662, %663 : vector<2x32xf32>
    %665 = vector.extract_strided_slice %652 {offsets = [0, 64], sizes = [2, 32], strides = [1, 1]} : vector<2x128xf32> to vector<2x32xf32>
    %666 = math.tanh %665 : vector<2x32xf32>
    %667 = vector.extract_strided_slice %652 {offsets = [0, 96], sizes = [2, 32], strides = [1, 1]} : vector<2x128xf32> to vector<2x32xf32>
    %668 = arith.negf %667 : vector<2x32xf32>
    %669 = math.exp %668 : vector<2x32xf32>
    %cst_210 = arith.constant 1.000000e+00 : f32
    %670 = vector.broadcast %cst_210 : f32 to vector<2x32xf32>
    %671 = arith.addf %670, %669 : vector<2x32xf32>
    %672 = arith.divf %670, %671 : vector<2x32xf32>
    %673 = arith.mulf %664, %621 : vector<2x32xf32>
    %674 = arith.mulf %658, %666 : vector<2x32xf32>
    %675 = arith.addf %673, %674 : vector<2x32xf32>
    %676 = math.tanh %675 : vector<2x32xf32>
    %677 = arith.mulf %672, %676 : vector<2x32xf32>
    %c0_211 = arith.constant 0 : index
    %c0_212 = arith.constant 0 : index
    %c0_213 = arith.constant 0 : index
    %678 = vector.load %arg5[%c0_211, %c0_212, %c0_213] : memref<2x8x64xf32, #tpu.memory_space<vmem>>, vector<2x1x32xf32>
    %679 = vector.shape_cast %678 : vector<2x1x32xf32> to vector<2x32xf32>
    %680 = tpu.concatenate %679, %677 in 1 : vector<2x32xf32>, vector<2x32xf32> -> vector<2x64xf32>
    %cst_214 = arith.constant dense<0.000000e+00> : vector<2xf32>
    %681 = vector.multi_reduction <add>, %680, %cst_214 [1] : vector<2x64xf32> to vector<2xf32>
    %682 = vector.shape_cast %681 : vector<2xf32> to vector<2x1xf32>
    %cst_215 = arith.constant 6.400000e+01 : f32
    %683 = vector.broadcast %cst_215 : f32 to vector<2x1xf32>
    %684 = arith.divf %682, %683 : vector<2x1xf32>
    %685 = vector.broadcast %684 : vector<2x1xf32> to vector<2x64xf32>
    %686 = arith.subf %680, %685 : vector<2x64xf32>
    %687 = arith.mulf %686, %686 : vector<2x64xf32>
    %cst_216 = arith.constant dense<0.000000e+00> : vector<2xf32>
    %688 = vector.multi_reduction <add>, %687, %cst_216 [1] : vector<2x64xf32> to vector<2xf32>
    %689 = vector.shape_cast %688 : vector<2xf32> to vector<2x1xf32>
    %cst_217 = arith.constant 6.400000e+01 : f32
    %690 = vector.broadcast %cst_217 : f32 to vector<2x1xf32>
    %691 = arith.divf %689, %690 : vector<2x1xf32>
    %692 = vector.broadcast %684 : vector<2x1xf32> to vector<2x64xf32>
    %693 = arith.subf %680, %692 : vector<2x64xf32>
    %cst_218 = arith.constant 9.99999974E-6 : f32
    %694 = vector.broadcast %cst_218 : f32 to vector<2x1xf32>
    %695 = arith.addf %691, %694 : vector<2x1xf32>
    %696 = math.rsqrt %695 : vector<2x1xf32>
    %697 = vector.broadcast %696 : vector<2x1xf32> to vector<2x64xf32>
    %698 = arith.mulf %693, %697 : vector<2x64xf32>
    %c0_219 = arith.constant 0 : index
    %c0_220 = arith.constant 0 : index
    %c0_221 = arith.constant 0 : index
    %699 = vector.load %arg5[%c0_219, %c0_220, %c0_221] : memref<2x8x64xf32, #tpu.memory_space<vmem>>, vector<2x1x64xf32>
    %700 = vector.shape_cast %699 : vector<2x1x64xf32> to vector<2x64xf32>
    %701 = vector.shape_cast %698 : vector<2x64xf32> to vector<2x1x64xf32>
    tpu.vector_store %arg5[%c0_219, %c0_220, %c0_221], %701 {strides = array<i32>} : memref<2x8x64xf32, #tpu.memory_space<vmem>>, vector<2x1x64xf32>,
    %c0_222 = arith.constant 0 : index
    %c32 = arith.constant 32 : index
    %702 = vector.load %arg6[%c0_222, %c32] : memref<2x64xf32, #tpu.memory_space<vmem>>, vector<2x32xf32>
    tpu.vector_store %arg6[%c0_222, %c32], %677 {strides = array<i32>} : memref<2x64xf32, #tpu.memory_space<vmem>>, vector<2x32xf32>,
    return
  }
  func.func @transform_0(%arg0: i32) -> (i32, i32, i32) {
    %c0_i32 = arith.constant 0 : i32
    %c0_i32_0 = arith.constant 0 : i32
    %c0_i32_1 = arith.constant 0 : i32
    return %arg0, %c0_i32, %c0_i32_0 : i32, i32, i32
  }
  func.func @transform_1(%arg0: i32) -> (i32, i32, i32) {
    %c0_i32 = arith.constant 0 : i32
    %c0_i32_0 = arith.constant 0 : i32
    %c0_i32_1 = arith.constant 0 : i32
    return %arg0, %c0_i32, %c0_i32_0 : i32, i32, i32
  }
  func.func @transform_2(%arg0: i32) -> (i32, i32) {
    %c0_i32 = arith.constant 0 : i32
    %c0_i32_0 = arith.constant 0 : i32
    %c0_i32_1 = arith.constant 0 : i32
    return %c0_i32, %c0_i32_0 : i32, i32
  }
  func.func @transform_3(%arg0: i32) -> (i32, i32) {
    %c0_i32 = arith.constant 0 : i32
    %c0_i32_0 = arith.constant 0 : i32
    %c0_i32_1 = arith.constant 0 : i32
    return %c0_i32, %c0_i32_0 : i32, i32
  }
  func.func @transform_4(%arg0: i32) -> (i32, i32, i32) {
    %c0_i32 = arith.constant 0 : i32
    %c0_i32_0 = arith.constant 0 : i32
    %c0_i32_1 = arith.constant 0 : i32
    return %arg0, %c0_i32, %c0_i32_0 : i32, i32, i32
  }
  func.func @transform_5(%arg0: i32) -> (i32, i32) {
    %c0_i32 = arith.constant 0 : i32
    %c0_i32_0 = arith.constant 0 : i32
    return %arg0, %c0_i32 : i32, i32
  }
}

module attributes {stable_mosaic.version = 11 : i64} {
  func.func @proj_kernel(%arg0: i32, %arg1: memref<16x64xf32, #tpu.memory_space<vmem>>, %arg2: memref<64x32xf32, #tpu.memory_space<vmem>>, %arg3: memref<1x32xf32, #tpu.memory_space<vmem>>, %arg4: memref<32x128xf32, #tpu.memory_space<vmem>>, %arg5: memref<1x128xf32, #tpu.memory_space<vmem>>, %arg6: memref<32x128xf32, #tpu.memory_space<vmem>>, %arg7: memref<1x128xf32, #tpu.memory_space<vmem>>, %arg8: memref<16x128xf32, #tpu.memory_space<vmem>>, %arg9: memref<16x128xf32, #tpu.memory_space<vmem>>) attributes {dimension_semantics = [#tpu.dimension_semantics<parallel>], iteration_bounds = array<i64: 1>, scalar_prefetch = 0 : i64, scratch_operands = 0 : i64, tpu.core_type = #tpu.core_type<tc>, window_params = [{transform_indices = @transform_0, window_bounds = array<i64: 16, 64>}, {pipeline_mode = #tpu.pipeline_mode<synchronous>, transform_indices = @transform_1, window_bounds = array<i64: 64, 32>}, {pipeline_mode = #tpu.pipeline_mode<synchronous>, transform_indices = @transform_2, window_bounds = array<i64: 1, 32>}, {pipeline_mode = #tpu.pipeline_mode<synchronous>, transform_indices = @transform_3, window_bounds = array<i64: 32, 128>}, {pipeline_mode = #tpu.pipeline_mode<synchronous>, transform_indices = @transform_4, window_bounds = array<i64: 1, 128>}, {pipeline_mode = #tpu.pipeline_mode<synchronous>, transform_indices = @transform_5, window_bounds = array<i64: 32, 128>}, {pipeline_mode = #tpu.pipeline_mode<synchronous>, transform_indices = @transform_6, window_bounds = array<i64: 1, 128>}, {transform_indices = @transform_7, window_bounds = array<i64: 16, 128>}, {transform_indices = @transform_8, window_bounds = array<i64: 16, 128>}]} {
    %c0 = arith.constant 0 : index
    %c0_0 = arith.constant 0 : index
    %0 = vector.load %arg1[%c0, %c0_0] : memref<16x64xf32, #tpu.memory_space<vmem>>, vector<16x64xf32>
    %1 = arith.truncf %0 : vector<16x64xf32> to vector<16x64xbf16>
    %c0_1 = arith.constant 0 : index
    %c0_2 = arith.constant 0 : index
    %2 = vector.load %arg2[%c0_1, %c0_2] : memref<64x32xf32, #tpu.memory_space<vmem>>, vector<64x32xf32>
    %3 = arith.truncf %2 : vector<64x32xf32> to vector<64x32xbf16>
    %cst = arith.constant dense<0.000000e+00> : vector<16x32xf32>
    %4 = tpu.matmul %1, %3, %cst {dimension_numbers = #tpu.dot_dimension_numbers<[1], [0], [0], [1], [0, 0, 1, 1], [], []>} : vector<16x64xbf16>, vector<64x32xbf16>, vector<16x32xf32> -> vector<16x32xf32>
    %c0_3 = arith.constant 0 : index
    %c0_4 = arith.constant 0 : index
    %5 = vector.load %arg3[%c0_3, %c0_4] : memref<1x32xf32, #tpu.memory_space<vmem>>, vector<1x32xf32>
    %6 = vector.broadcast %5 : vector<1x32xf32> to vector<16x32xf32>
    %7 = arith.addf %4, %6 : vector<16x32xf32>
    %cst_5 = arith.constant 0.000000e+00 : f32
    %8 = vector.broadcast %cst_5 : f32 to vector<16x32xf32>
    %9 = arith.maximumf %7, %8 : vector<16x32xf32>
    %10 = arith.truncf %9 : vector<16x32xf32> to vector<16x32xbf16>
    %c0_6 = arith.constant 0 : index
    %c0_7 = arith.constant 0 : index
    %11 = vector.load %arg4[%c0_6, %c0_7] : memref<32x128xf32, #tpu.memory_space<vmem>>, vector<32x128xf32>
    %12 = arith.truncf %11 : vector<32x128xf32> to vector<32x128xbf16>
    %cst_8 = arith.constant dense<0.000000e+00> : vector<16x128xf32>
    %13 = tpu.matmul %10, %12, %cst_8 {dimension_numbers = #tpu.dot_dimension_numbers<[1], [0], [0], [1], [0, 0, 1, 1], [], []>} : vector<16x32xbf16>, vector<32x128xbf16>, vector<16x128xf32> -> vector<16x128xf32>
    %c0_9 = arith.constant 0 : index
    %c0_10 = arith.constant 0 : index
    %14 = vector.load %arg5[%c0_9, %c0_10] : memref<1x128xf32, #tpu.memory_space<vmem>>, vector<1x128xf32>
    %15 = vector.broadcast %14 : vector<1x128xf32> to vector<16x128xf32>
    %16 = arith.addf %13, %15 : vector<16x128xf32>
    %c0_11 = arith.constant 0 : index
    %c0_12 = arith.constant 0 : index
    %17 = vector.load %arg8[%c0_11, %c0_12] : memref<16x128xf32, #tpu.memory_space<vmem>>, vector<16x128xf32>
    tpu.vector_store %arg8[%c0_11, %c0_12], %16 {strides = array<i32>} : memref<16x128xf32, #tpu.memory_space<vmem>>, vector<16x128xf32>,
    %c0_13 = arith.constant 0 : index
    %c0_14 = arith.constant 0 : index
    %18 = vector.load %arg6[%c0_13, %c0_14] : memref<32x128xf32, #tpu.memory_space<vmem>>, vector<32x128xf32>
    %19 = arith.truncf %18 : vector<32x128xf32> to vector<32x128xbf16>
    %cst_15 = arith.constant dense<0.000000e+00> : vector<16x128xf32>
    %20 = tpu.matmul %10, %19, %cst_15 {dimension_numbers = #tpu.dot_dimension_numbers<[1], [0], [0], [1], [0, 0, 1, 1], [], []>} : vector<16x32xbf16>, vector<32x128xbf16>, vector<16x128xf32> -> vector<16x128xf32>
    %c0_16 = arith.constant 0 : index
    %c0_17 = arith.constant 0 : index
    %21 = vector.load %arg7[%c0_16, %c0_17] : memref<1x128xf32, #tpu.memory_space<vmem>>, vector<1x128xf32>
    %22 = vector.broadcast %21 : vector<1x128xf32> to vector<16x128xf32>
    %23 = arith.addf %20, %22 : vector<16x128xf32>
    %c0_18 = arith.constant 0 : index
    %c0_19 = arith.constant 0 : index
    %24 = vector.load %arg9[%c0_18, %c0_19] : memref<16x128xf32, #tpu.memory_space<vmem>>, vector<16x128xf32>
    tpu.vector_store %arg9[%c0_18, %c0_19], %23 {strides = array<i32>} : memref<16x128xf32, #tpu.memory_space<vmem>>, vector<16x128xf32>,
    return
  }
  func.func @transform_0(%arg0: i32) -> (i32, i32) {
    %c0_i32 = arith.constant 0 : i32
    %c0_i32_0 = arith.constant 0 : i32
    return %arg0, %c0_i32 : i32, i32
  }
  func.func @transform_1(%arg0: i32) -> (i32, i32) {
    %c0_i32 = arith.constant 0 : i32
    %c0_i32_0 = arith.constant 0 : i32
    %c0_i32_1 = arith.constant 0 : i32
    return %c0_i32, %c0_i32_0 : i32, i32
  }
  func.func @transform_2(%arg0: i32) -> (i32, i32) {
    %c0_i32 = arith.constant 0 : i32
    %c0_i32_0 = arith.constant 0 : i32
    %c0_i32_1 = arith.constant 0 : i32
    return %c0_i32, %c0_i32_0 : i32, i32
  }
  func.func @transform_3(%arg0: i32) -> (i32, i32) {
    %c0_i32 = arith.constant 0 : i32
    %c0_i32_0 = arith.constant 0 : i32
    %c0_i32_1 = arith.constant 0 : i32
    return %c0_i32, %c0_i32_0 : i32, i32
  }
  func.func @transform_4(%arg0: i32) -> (i32, i32) {
    %c0_i32 = arith.constant 0 : i32
    %c0_i32_0 = arith.constant 0 : i32
    %c0_i32_1 = arith.constant 0 : i32
    return %c0_i32, %c0_i32_0 : i32, i32
  }
  func.func @transform_5(%arg0: i32) -> (i32, i32) {
    %c0_i32 = arith.constant 0 : i32
    %c0_i32_0 = arith.constant 0 : i32
    %c0_i32_1 = arith.constant 0 : i32
    return %c0_i32, %c0_i32_0 : i32, i32
  }
  func.func @transform_6(%arg0: i32) -> (i32, i32) {
    %c0_i32 = arith.constant 0 : i32
    %c0_i32_0 = arith.constant 0 : i32
    %c0_i32_1 = arith.constant 0 : i32
    return %c0_i32, %c0_i32_0 : i32, i32
  }
  func.func @transform_7(%arg0: i32) -> (i32, i32) {
    %c0_i32 = arith.constant 0 : i32
    %c0_i32_0 = arith.constant 0 : i32
    return %arg0, %c0_i32 : i32, i32
  }
  func.func @transform_8(%arg0: i32) -> (i32, i32) {
    %c0_i32 = arith.constant 0 : i32
    %c0_i32_0 = arith.constant 0 : i32
    return %arg0, %c0_i32 : i32, i32
  }
}

</mosaic_0001>

<bundles_post_ra>
// kernel: encoder_vid_hga_forward.2
= control target key start
LH: loop header
LB: loop body
LE: loop exit
PB: predicated region body
PF: predicated region fallthrough
CT: control target
= control target key end

     0   :  { %v270_v0 = vmov 0.0   ;;  %vm271_vm0 = vmmov 0   ;;  %vm51_vm1 = vcmask 523264   ;;  %vm112_vm2 = vcmask 261120   ;;  %s406_s1 = inlined_call_operand.vmem [shape: f32[64,32], index: 1, kind: input, shape index: {}]   ;;  %s407_s0 = inlined_call_operand.vmem [shape: f32[16,64], index: 0, kind: input, shape index: {}]   ;;  %s408_s3 = inlined_call_operand.vmem [shape: f32[32,128], index: 3, kind: input, shape index: {}]   ;;  %s409_s2 = inlined_call_operand.vmem [shape: f32[1,32], index: 2, kind: input, shape index: {}]   ;;  %s410_s5 = inlined_call_operand.vmem [shape: f32[32,128], index: 5, kind: input, shape index: {}]   ;;  %s411_s4 = inlined_call_operand.vmem [shape: f32[1,128], index: 4, kind: input, shape index: {}]   ;;  %s412_s7 = inlined_call_operand.vmem [shape: f32[16,128], index: 7, kind: output, shape index: {0}]   ;;  %s413_s6 = inlined_call_operand.vmem [shape: f32[1,128], index: 6, kind: input, shape index: {}]   ;;  %s414_s8 = inlined_call_operand.vmem [shape: f32[16,128], index: 8, kind: output, shape index: {1}]  }
   0x1   :  { %240 = vmatprep.subr.bf16.mxu0 %v270_v0  ;;  %v32_v1 = vld [vmem:[%s406_s1] sm:$0xff]  ;;  %v33_v2 = vld [vmem:[%s406_s1 + $0x8] sm:$0xff]  ;;  %v34_v3 = vld [vmem:[%s406_s1 + $0x10] sm:$0xff]  ;;  %248 = vmatprep.mubr.msk.bf16.mxu0 %vm271_vm0, %v270_v0 }
   0x2   :  { %v40_v4 = vpack.c.bf16 %v33_v2, %v32_v1  ;;  %v35_v5 = vld [vmem:[%s406_s1 + $0x18] sm:$0xff]  ;;  %252 = vmatprep.subr.bf16.mxu1 %v270_v0  ;;  %256 = vmatprep.mubr.msk.bf16.mxu1 %vm271_vm0, %v270_v0  ;;  %v36_v7 = vld [vmem:[%s406_s1 + $0x20] sm:$0xff]  ;;  %v37_v8 = vld [vmem:[%s406_s1 + $0x28] sm:$0xff] }
   0x3   :  { %v41_v6 = vpack.c.bf16 %v35_v5, %v34_v3  ;;  %v42_v9 = vpack.c.bf16 %v37_v8, %v36_v7  ;;  %v38_v10 = vld [vmem:[%s406_s1 + $0x30] sm:$0xff]  ;;  %v39_v11 = vld [vmem:[%s406_s1 + $0x38] sm:$0xff]  ;;  %v29_v13 = vld [vmem:[%s407_s0] sm:$0xff] }
   0x4   :  { %241 = vmatpush3.bf16.msra.mxu0 %v40_v4  ;;  %v43_v12 = vpack.c.bf16 %v39_v11, %v38_v10  ;;  %v30_v14 = vld [vmem:[%s407_s0 + $0x8] sm:$0xff]  ;;  %v99_v16 = vld [vmem:[%s408_s3] sm:$0xff]  ;;  %v101_v19 = vld [vmem:[%s408_s3 + $0x10] sm:$0xff] }
   0x5   :  { %242 = vmatprep.subr.bf16.mxu0 %v270_v0  ;;  %v31_v15 = vpack.c.bf16 %v30_v14, %v29_v13  ;;  %v100_v17 = vld [vmem:[%s408_s3 + $0x8] sm:$0xff]  ;;  %v102_v20 = vld [vmem:[%s408_s3 + $0x18] sm:$0xff]  ;;  %v223_v22 = vld [vmem:[%s409_s2] ss:$0 sm:$0xff] }
   0x6   :  { %v103_v18 = vpack.c.bf16 %v100_v17, %v99_v16  ;;  %v104_v21 = vpack.c.bf16 %v102_v20, %v101_v19  ;;  %v159_v29 = vld [vmem:[%s410_s5] sm:$0xff]  ;;  %v160_v30 = vld [vmem:[%s410_s5 + $0x8] sm:$0xff]  ;;  %v161_v35 = vld [vmem:[%s410_s5 + $0x10] sm:$0xff] }
   0x7   :  { %v163_v33 = vpack.c.bf16 %v160_v30, %v159_v29  ;;  %v162_v36 = vld [vmem:[%s410_s5 + $0x18] sm:$0xff]  ;;  %v225_v38 = vld [vmem:[%s411_s4] ss:$0 sm:$0xff] }
   0x8   :  { %243 = vmatpush3.bf16.msra.mxu0 %v41_v6  ;;  %253 = vmatpush3.bf16.msra.mxu1 %v103_v18  ;;  %v164_v37 = vpack.c.bf16 %v162_v36, %v161_v35  ;;  %v227_v45 = vld [vmem:[%s413_s6] ss:$0 sm:$0xff] }
   0x9   :  { %244 = vmatprep.subr.bf16.mxu0 %v270_v0  ;;  %254 = vmatprep.subr.bf16.mxu1 %v270_v0 }
   0xc   :  { %245 = vmatpush3.bf16.msra.mxu0 %v42_v9  ;;  %255 = vmatpush3.bf16.msra.mxu1 %v104_v21 }
   0xd   :  { %246 = vmatprep.subr.bf16.mxu0 %v270_v0  ;;  %260 = vmatprep.subr.bf16.mxu1 %v270_v0 }
  0x10   :  { %247 = vmatpush3.bf16.msra.mxu0 %v43_v12 }
  0x13   :  { %249 = vmatmul.mubr.msk.bf16.vlgmr.msra.gmra.mrb[0].mxu0 %vm51_vm1, %v31_v15 }
  0xe6   :  { %v89_v23 = vpop.f32.mrb[0].mxu0 }
  0xe7   :  { %v90_v24 = vadd.f32 %v223_v22, %v89_v23  ;;  %v250_v25 = vpop.f32.mrb[1].mxu0 }
  0xe8   :  { %v92_v26 = vpop.f32.mrb[2].mxu0 }
  0xe9   :  { %v93_v27 = vadd.f32 %v223_v22, %v92_v26  ;;  %v251_v28 = vpop.f32.mrb[3].mxu0  ;;  %v96_v31 = vmax.f32 %v90_v24, 0.0 }
  0xeb   :  { %v97_v32 = vmax.f32 %v93_v27, 0.0 }
  0xed   :  { %v98_v34 = vpack.c.bf16 %v97_v32, %v96_v31 }
  0xef   :  { %257 = vmatmul.mubr.msk.bf16.vlgmr.msra.gmra.mrb[0].mxu1 %vm112_vm2, %v98_v34 }
  0xf0   :  { %261 = vmatpush3.bf16.msra.mxu1 %v163_v33  ;;  %264 = vmatprep.mubr.msk.bf16.mxu1 %vm271_vm0, %v270_v0 }
  0xf1   :  { %262 = vmatprep.subr.bf16.mxu1 %v270_v0 }
  0xf4   :  { %263 = vmatpush3.bf16.msra.mxu1 %v164_v37 }
  0xf7   :  { %265 = vmatmul.mubr.msk.bf16.vlgmr.msra.gmra.mrb[4].mxu1 %vm112_vm2, %v98_v34 }
 0x1c2   :  { %v150_v39 = vpop.f32.mrb[0].mxu1 }
 0x1c3   :  { %v151_v40 = vadd.f32 %v225_v38, %v150_v39  ;;  %v258_v41 = vpop.f32.mrb[1].mxu1 }
 0x1c4   :  { %v153_v42 = vpop.f32.mrb[2].mxu1 }
 0x1c5   :  { %157 = vst [vmem:[%s412_s7] sm:$0xff] %v151_v40  ;;  %v154_v43 = vadd.f32 %v225_v38, %v153_v42  ;;  %v259_v44 = vpop.f32.mrb[3].mxu1 }
 0x1c7   :  { %158 = vst [vmem:[%s412_s7 + $0x8] sm:$0xff] %v154_v43 }
 0x1ca   :  { %v206_v46 = vpop.f32.mrb[4].mxu1 }
 0x1cb   :  { %v207_v47 = vadd.f32 %v227_v45, %v206_v46  ;;  %v266_v48 = vpop.f32.mrb[5].mxu1 }
 0x1cc   :  { %v209_v49 = vpop.f32.mrb[6].mxu1 }
 0x1cd   :  { %213 = vst [vmem:[%s414_s8] sm:$0xff] %v207_v47  ;;  %v210_v50 = vadd.f32 %v227_v45, %v209_v49  ;;  %v267_v51 = vpop.f32.mrb[7].mxu1 }
 0x1cf   :  { %214 = vst [vmem:[%s414_s8 + $0x8] sm:$0xff] %v210_v50 }

// kernel: encoder_vid_hga_forward.3
= control target key start
LH: loop header
LB: loop body
LE: loop exit
PB: predicated region body
PF: predicated region fallthrough
CT: control target
= control target key end

     0   :  { %11 = vsyncpa [#allocation3], 0  ;;  %v2886_v3 = vmov 0.0   ;;  %vm2887_vm0 = vmmov 0   ;;  %s3650_s0 = inlined_call_operand.vmem [shape: f32[2,8,128], index: 0, kind: input, shape index: {}]   ;;  %s3651_s1 = inlined_call_operand.vmem [shape: f32[2,8,128], index: 1, kind: input, shape index: {}]   ;;  %s3652_s2 = inlined_call_operand.vmem [shape: f32[32,128], index: 2, kind: input, shape index: {}]   ;;  %s3653_s3 = inlined_call_operand.vmem [shape: f32[32,128], index: 3, kind: input, shape index: {}]   ;;  %s3654_s4 = inlined_call_operand.hbm [shape: f32[2,8,64], index: 4, kind: output, shape index: {0}]   ;;  %s3655_s5 = inlined_call_operand.hbm [shape: f32[2,64], index: 5, kind: output, shape index: {1}]  }
   0x1   :  { %v22_v0 = vld [vmem:[%s3652_s2] sm:$0xff]  ;;  %v23_v1 = vld [vmem:[%s3652_s2 + $0x8] sm:$0xff]  ;;  %v24_v2 = vld [vmem:[%s3652_s2 + $0x10] sm:$0xff]  ;;  %2428 = vmatprep.subr.bf16.mxu0 %v2886_v3  ;;  %2432 = vmatprep.mubr.msk.bf16.mxu0 %vm2887_vm0, %v2886_v3 }
   0x2   :  { %v2936_v4 = vpack.c.bf16 %v23_v1, %v22_v0  ;;  %v25_v5 = vld [vmem:[%s3652_s2 + $0x18] sm:$0xff]  ;;  %2436 = vmatprep.subr.bf16.mxu1 %v2886_v3  ;;  %2440 = vmatprep.mubr.msk.bf16.mxu1 %vm2887_vm0, %v2886_v3 }
   0x3   :  { %12 = vsyncpa [#allocation5], 0  ;;  %v2947_v6 = vpack.c.bf16 %v25_v5, %v24_v2  ;;  %v2888_v7 = vmov 0   ;;  %v35_v8 = vld [vmem:[%s3650_s0 + $0x8] sm:$0x1]  ;;  %s2889_s29 = smov 64  }
   0x4   :  { %2429 = vmatpush3.bf16.msra.mxu0 %v2936_v4  ;;  %2437 = vmatpush3.bf16.msra.mxu1 %v2936_v4  ;;  %v34_v13 = vld [vmem:[%s3650_s0] sm:$0x1]  ;;  %s2890_s30 = smov 32   ;;  %vm154_vm1 = vcmask 1041409   ;;  %vm36_vm2 = vcmask 261120   ;;  %vm142_vm3 = vcmask 253952  }
   0x5   :  { %2430 = vmatprep.subr.bf16.mxu0 %v2886_v3  ;;  %2438 = vmatprep.subr.bf16.mxu1 %v2886_v3  ;;  %v145_v51 = vld [vmem:[%s3650_s0 + $0x1] sm:$0x1]  ;;  %v146_v52 = vld [vmem:[%s3650_s0 + $0x9] sm:$0x1]  ;;  %vm1104_vm4 = vcmask 517120   ;;  %vm991_vm5 = vcmask 254976  }
   0x6   :  { %vm2302_vm6 = vcmask 517376   ;;  %vm1144_vm7 = vcmask 516096  }
   0x8   :  { %2431 = vmatpush3.bf16.msra.mxu0 %v2947_v6  ;;  %2439 = vmatpush3.bf16.msra.mxu1 %v2947_v6 }
   0x9   :  { %2444 = vmatprep.subr.bf16.mxu0 %v2886_v3  ;;  %2452 = vmatprep.subr.bf16.mxu1 %v2886_v3 }
   0xb   :  { %2433 = vmatmul.mubr.bf16.vlgmr.msra.gmra.mrb[0].mxu0 %v2888_v7 }
   0xc   :  { %2445 = vmatpush3.bf16.msra.mxu0 %v2936_v4  ;;  %2448 = vmatprep.mubr.msk.bf16.mxu0 %vm2887_vm0, %v2886_v3 }
   0xd   :  { %2446 = vmatprep.subr.bf16.mxu0 %v2886_v3 }
  0x10   :  { %2447 = vmatpush3.bf16.msra.mxu0 %v2947_v6 }
  0x11   :  { %2460 = vmatprep.subr.bf16.mxu0 %v2886_v3 }
  0xde   :  { %v74_v9 = vpop.f32.mrb[0].mxu0 }
  0xdf   :  { %v81_v10 = vrot.slane %v74_v9, 1  ;;  %v2434_v11 = vpop.f32.mrb[1].mxu0  ;;  %v84_v16 = vadd.f32 %v74_v9, %v34_v13 }
  0xe0   :  { %v77_v12 = vpop.f32.mrb[2].mxu0 }
  0xe1   :  { %v85_v14 = vadd.f32 %v81_v10, %v35_v8  ;;  %v2435_v15 = vpop.f32.mrb[3].mxu0  ;;  %v2334_v20 = vmul.f32 -1.442695, %v84_v16 }
  0xe3   :  { %2566 = vtanh.f32 %v85_v14  ;;  %v2335_v19 = vmul.f32 -1.442695, %v85_v14 }
  0xe4   :  { %2568 = vtanh.f32 %v84_v16 }
  0xe5   :  { %2570 = vpow2.f32 %v2335_v19 }
  0xe6   :  { %2572 = vpow2.f32 %v2334_v20 }
  0xed   :  { %v2567_v17 = vpop.eup %2566 }
  0xee   :  { %106 = vrot.lane.b32.xlu0 %v2567_v17, %s2889_s29  ;;  %v2569_v18 = vpop.eup %2568 }
  0xef   :  { %v2571_v21 = vpop.eup %2570 }
  0xf0   :  { %v93_v22 = vadd.f32 1.0, %v2571_v21  ;;  %v2573_v23 = vpop.eup %2572 }
  0xf1   :  { %v92_v24 = vadd.f32 1.0, %v2573_v23 }
  0xf2   :  { %104 = vrot.lane.b32.xlu0 %v2569_v18, %s2889_s29  ;;  %2574 = vrcp.f32 %v93_v22 }
  0xf3   :  { %2576 = vrcp.f32 %v92_v24 }
  0xfc   :  { %v2575_v25 = vpop.eup %2574 }
  0xfd   :  { %v2577_v28 = vpop.eup %2576  ;;  %v101_v31 = vmul.f32 0.0, %v2575_v25 }
  0xfe   :  { %v100_v34 = vmul.f32 0.0, %v2577_v28 }
 0x160   :  { %v107_v26 = vpop.permute.xlu0 %106 }
 0x161   :  { %v111_v27 = vmul.f32 %v2575_v25, %v107_v26 }
 0x163   :  { %116 = vrot.lane.b32.xlu1 %v111_v27, %s2890_s30 }
 0x164   :  { %v105_v29 = vpop.permute.xlu0 %104 }
 0x165   :  { %v110_v30 = vmul.f32 %v2577_v28, %v105_v29 }
 0x167   :  { %114 = vrot.lane.b32.xlu1 %v110_v30, %s2890_s30 }
 0x1d5   :  { %v117_v32 = vpop.permute.xlu1 %116 }
 0x1d6   :  { %v2973_v33 = vadd.f32 %v117_v32, %v101_v31 }
 0x1d8   :  { %2578 = vtanh.f32 %v2973_v33 }
 0x1d9   :  { %v115_v35 = vpop.permute.xlu1 %114 }
 0x1da   :  { %v120_v36 = vadd.f32 %v115_v35, %v100_v34  ;;  %v266_v34 = vld [vmem:[%s3650_s0 + $0x2] sm:$0x1]  ;;  %v267_v35 = vld [vmem:[%s3650_s0 + $0xa] sm:$0x1] }
 0x1dc   :  { %2580 = vtanh.f32 %v120_v36 }
 0x1e2   :  { %v2579_v37 = vpop.eup %2578 }
 0x1e3   :  { %128 = vrot.lane.b32.xlu0 %v2579_v37, %s2889_s29 }
 0x1e6   :  { %v2581_v38 = vpop.eup %2580 }
 0x1e7   :  { %126 = vrot.lane.b32.xlu1 %v2581_v38, %s2889_s29 }
 0x255   :  { %v129_v39 = vpop.permute.xlu0 %128 }
 0x256   :  { %v2978_v40 = vmul.f32 %v2575_v25, %v129_v39 }
 0x258   :  { %v148_v41 = vpack.c.bf16 %v2978_v40, %v2978_v40 }
 0x259   :  { %v127_v42 = vpop.permute.xlu1 %126 }
 0x25a   :  { %v152_v43 = vunpack.c.l.b16 %v148_v41  ;;  %v2982_v44 = vmul.f32 %v2577_v28, %v127_v42 }
 0x25c   :  { %v147_v45 = vpack.c.bf16 %v2982_v44, %v2982_v44  ;;  %v153_v46 = vrot.slane %v152_v43, 7 }
 0x25e   :  { %v151_v47 = vunpack.c.l.b16 %v147_v45 }
 0x260   :  { %v155_v48 = vsel %vm154_vm1, %v153_v46, %v151_v47 }
 0x261   :  { %v156_v49 = vpack.c.b16 %v155_v48, %v155_v48 }
 0x263   :  { %157 = vrot.lane.b32.xlu0 %v156_v49, %s2890_s30 }
 0x2d5   :  { %v158_v50 = vpop.permute.xlu0 %157 }
 0x2d6   :  { %2441 = vmatmul.mubr.msk.bf16.vlgmr.msra.gmra.mrb[0].mxu1 %vm36_vm2, %v158_v50 }
 0x2d7   :  { %2453 = vmatpush3.bf16.msra.mxu1 %v2936_v4  ;;  %2456 = vmatprep.mubr.msk.bf16.mxu1 %vm2887_vm0, %v2886_v3 }
 0x2d8   :  { %2454 = vmatprep.subr.bf16.mxu1 %v2886_v3 }
 0x2db   :  { %2455 = vmatpush3.bf16.msra.mxu1 %v2947_v6 }
 0x2dc   :  { %2468 = vmatprep.subr.bf16.mxu1 %v2886_v3 }
 0x3a9   :  { %v196_v53 = vpop.f32.mrb[0].mxu1 }
 0x3aa   :  { %v203_v54 = vrot.slane %v196_v53, 1  ;;  %v206_v55 = vadd.f32 %v196_v53, %v145_v51  ;;  %v2442_v56 = vpop.f32.mrb[1].mxu1 }
 0x3ab   :  { %v199_v57 = vpop.f32.mrb[2].mxu1 }
 0x3ac   :  { %v207_v58 = vadd.f32 %v203_v54, %v146_v52  ;;  %2582 = vtanh.f32 %v206_v55  ;;  %v2443_v59 = vpop.f32.mrb[3].mxu1  ;;  %v2337_v62 = vmul.f32 -1.442695, %v206_v55 }
 0x3ae   :  { %2584 = vtanh.f32 %v207_v58  ;;  %v2338_v63 = vmul.f32 -1.442695, %v207_v58 }
 0x3af   :  { %2586 = vpow2.f32 %v2337_v62 }
 0x3b0   :  { %2588 = vpow2.f32 %v2338_v63 }
 0x3b6   :  { %v2583_v60 = vpop.eup %2582 }
 0x3b7   :  { %226 = vrot.lane.b32.xlu0 %v2583_v60, %s2889_s29 }
 0x3b8   :  { %v2585_v61 = vpop.eup %2584 }
 0x3b9   :  { %228 = vrot.lane.b32.xlu1 %v2585_v61, %s2889_s29  ;;  %v2587_v0 = vpop.eup %2586 }
 0x3ba   :  { %v2589_v1 = vpop.eup %2588  ;;  %v214_v2 = vadd.f32 1.0, %v2587_v0 }
 0x3bb   :  { %v215_v5 = vadd.f32 1.0, %v2589_v1 }
 0x3bc   :  { %2590 = vrcp.f32 %v214_v2 }
 0x3bd   :  { %2592 = vrcp.f32 %v215_v5 }
 0x3c6   :  { %v2591_v8 = vpop.eup %2590 }
 0x3c7   :  { %v2593_v11 = vpop.eup %2592  ;;  %v222_v14 = vmul.f32 %v2591_v8, %v120_v36 }
 0x3c8   :  { %v223_v17 = vmul.f32 %v2593_v11, %v2973_v33 }
 0x429   :  { %v227_v9 = vpop.permute.xlu0 %226 }
 0x42a   :  { %v232_v10 = vmul.f32 %v2591_v8, %v227_v9 }
 0x42b   :  { %v229_v12 = vpop.permute.xlu1 %228 }
 0x42c   :  { %236 = vrot.lane.b32.xlu0 %v232_v10, %s2890_s30  ;;  %v233_v13 = vmul.f32 %v2593_v11, %v229_v12 }
 0x42e   :  { %238 = vrot.lane.b32.xlu1 %v233_v13, %s2890_s30 }
 0x49e   :  { %v237_v15 = vpop.permute.xlu0 %236 }
 0x49f   :  { %v242_v16 = vadd.f32 %v237_v15, %v222_v14 }
 0x4a0   :  { %v239_v18 = vpop.permute.xlu1 %238 }
 0x4a1   :  { %2594 = vtanh.f32 %v242_v16  ;;  %v243_v19 = vadd.f32 %v239_v18, %v223_v17 }
 0x4a3   :  { %2596 = vtanh.f32 %v243_v19 }
 0x4ab   :  { %v2595_v20 = vpop.eup %2594 }
 0x4ac   :  { %248 = vrot.lane.b32.xlu0 %v2595_v20, %s2889_s29  ;;  %v387_v20 = vld [vmem:[%s3650_s0 + $0xb] sm:$0x1] }
 0x4ad   :  { %v2597_v21 = vpop.eup %2596 }
 0x4ae   :  { %250 = vrot.lane.b32.xlu1 %v2597_v21, %s2889_s29 }
 0x51e   :  { %v249_v22 = vpop.permute.xlu0 %248 }
 0x51f   :  { %v3008_v23 = vmul.f32 %v2591_v8, %v249_v22 }
 0x520   :  { %v251_v24 = vpop.permute.xlu1 %250 }
 0x521   :  { %v3010_v25 = vmul.f32 %v2593_v11, %v251_v24  ;;  %v268_v26 = vpack.c.bf16 %v3008_v23, %v3008_v23 }
 0x523   :  { %v269_v27 = vpack.c.bf16 %v3010_v25, %v3010_v25  ;;  %v272_v29 = vunpack.c.l.b16 %v268_v26 }
 0x525   :  { %v273_v28 = vunpack.c.l.b16 %v269_v27 }
 0x527   :  { %v274_v30 = vrot.slane %v273_v28, 7 }
 0x529   :  { %v275_v31 = vsel %vm154_vm1, %v274_v30, %v272_v29 }
 0x52a   :  { %v276_v32 = vpack.c.b16 %v275_v31, %v275_v31 }
 0x52c   :  { %277 = vrot.lane.b32.xlu1 %v276_v32, %s2890_s30 }
 0x59e   :  { %v278_v33 = vpop.permute.xlu1 %277 }
 0x59f   :  { %2449 = vmatmul.mubr.msk.bf16.vlgmr.msra.gmra.mrb[4].mxu0 %vm36_vm2, %v278_v33 }
 0x5a0   :  { %2461 = vmatpush3.bf16.msra.mxu0 %v2936_v4  ;;  %2464 = vmatprep.mubr.msk.bf16.mxu0 %vm2887_vm0, %v2886_v3 }
 0x5a1   :  { %2462 = vmatprep.subr.bf16.mxu0 %v2886_v3 }
 0x5a4   :  { %2463 = vmatpush3.bf16.msra.mxu0 %v2947_v6 }
 0x5a5   :  { %2476 = vmatprep.subr.bf16.mxu0 %v2886_v3 }
 0x672   :  { %v316_v36 = vpop.f32.mrb[4].mxu0 }
 0x673   :  { %v323_v37 = vrot.slane %v316_v36, 1  ;;  %v326_v38 = vadd.f32 %v316_v36, %v266_v34  ;;  %v2450_v39 = vpop.f32.mrb[5].mxu0 }
 0x674   :  { %v319_v41 = vpop.f32.mrb[6].mxu0 }
 0x675   :  { %v327_v42 = vadd.f32 %v323_v37, %v267_v35  ;;  %2598 = vtanh.f32 %v326_v38  ;;  %v2451_v43 = vpop.f32.mrb[7].mxu0  ;;  %v2340_v47 = vmul.f32 -1.442695, %v326_v38 }
 0x677   :  { %2600 = vtanh.f32 %v327_v42  ;;  %v2341_v48 = vmul.f32 -1.442695, %v327_v42 }
 0x678   :  { %2602 = vpow2.f32 %v2340_v47 }
 0x679   :  { %2604 = vpow2.f32 %v2341_v48 }
 0x67f   :  { %v2599_v45 = vpop.eup %2598 }
 0x680   :  { %346 = vrot.lane.b32.xlu1 %v2599_v45, %s2889_s29 }
 0x681   :  { %v2601_v46 = vpop.eup %2600 }
 0x682   :  { %348 = vrot.lane.b32.xlu0 %v2601_v46, %s2889_s29  ;;  %v2603_v49 = vpop.eup %2602 }
 0x683   :  { %v2605_v50 = vpop.eup %2604  ;;  %v334_v51 = vadd.f32 1.0, %v2603_v49 }
 0x684   :  { %v335_v52 = vadd.f32 1.0, %v2605_v50 }
 0x685   :  { %2606 = vrcp.f32 %v334_v51 }
 0x686   :  { %2608 = vrcp.f32 %v335_v52 }
 0x68f   :  { %v2607_v53 = vpop.eup %2606 }
 0x690   :  { %v2609_v56 = vpop.eup %2608  ;;  %v342_v59 = vmul.f32 %v2607_v53, %v242_v16 }
 0x691   :  { %v343_v62 = vmul.f32 %v2609_v56, %v243_v19  ;;  %v386_v19 = vld [vmem:[%s3650_s0 + $0x3] sm:$0x1] }
 0x6f2   :  { %v347_v54 = vpop.permute.xlu1 %346 }
 0x6f3   :  { %v352_v55 = vmul.f32 %v2607_v53, %v347_v54 }
 0x6f4   :  { %v349_v57 = vpop.permute.xlu0 %348 }
 0x6f5   :  { %356 = vrot.lane.b32.xlu1 %v352_v55, %s2890_s30  ;;  %v353_v58 = vmul.f32 %v2609_v56, %v349_v57 }
 0x6f7   :  { %358 = vrot.lane.b32.xlu0 %v353_v58, %s2890_s30 }
 0x767   :  { %v357_v60 = vpop.permute.xlu1 %356 }
 0x768   :  { %v362_v61 = vadd.f32 %v357_v60, %v342_v59 }
 0x769   :  { %v359_v63 = vpop.permute.xlu0 %358 }
 0x76a   :  { %2610 = vtanh.f32 %v362_v61  ;;  %v363_v0 = vadd.f32 %v359_v63, %v343_v62 }
 0x76c   :  { %2612 = vtanh.f32 %v363_v0 }
 0x774   :  { %v2611_v1 = vpop.eup %2610 }
 0x775   :  { %368 = vrot.lane.b32.xlu1 %v2611_v1, %s2889_s29 }
 0x776   :  { %v2613_v2 = vpop.eup %2612 }
 0x777   :  { %370 = vrot.lane.b32.xlu0 %v2613_v2, %s2889_s29  ;;  %v506_v2 = vld [vmem:[%s3650_s0 + $0x4] sm:$0x1] }
 0x7e7   :  { %v369_v5 = vpop.permute.xlu1 %368 }
 0x7e8   :  { %v3037_v8 = vmul.f32 %v2607_v53, %v369_v5  ;;  %v507_v5 = vld [vmem:[%s3650_s0 + $0xc] sm:$0x1] }
 0x7e9   :  { %v371_v9 = vpop.permute.xlu0 %370 }
 0x7ea   :  { %v3039_v10 = vmul.f32 %v2609_v56, %v371_v9  ;;  %v388_v11 = vpack.c.bf16 %v3037_v8, %v3037_v8 }
 0x7ec   :  { %v389_v12 = vpack.c.bf16 %v3039_v10, %v3039_v10  ;;  %v392_v14 = vunpack.c.l.b16 %v388_v11 }
 0x7ee   :  { %v393_v13 = vunpack.c.l.b16 %v389_v12 }
 0x7f0   :  { %v394_v15 = vrot.slane %v393_v13, 7 }
 0x7f2   :  { %v395_v16 = vsel %vm154_vm1, %v394_v15, %v392_v14 }
 0x7f3   :  { %v396_v17 = vpack.c.b16 %v395_v16, %v395_v16 }
 0x7f5   :  { %397 = vrot.lane.b32.xlu0 %v396_v17, %s2890_s30 }
 0x867   :  { %v398_v18 = vpop.permute.xlu0 %397 }
 0x868   :  { %2457 = vmatmul.mubr.msk.bf16.vlgmr.msra.gmra.mrb[4].mxu1 %vm36_vm2, %v398_v18 }
 0x869   :  { %2469 = vmatpush3.bf16.msra.mxu1 %v2936_v4  ;;  %2472 = vmatprep.mubr.msk.bf16.mxu1 %vm2887_vm0, %v2886_v3 }
 0x86a   :  { %2470 = vmatprep.subr.bf16.mxu1 %v2886_v3 }
 0x86d   :  { %2471 = vmatpush3.bf16.msra.mxu1 %v2947_v6 }
 0x86e   :  { %2484 = vmatprep.subr.bf16.mxu1 %v2886_v3 }
 0x93b   :  { %v436_v21 = vpop.f32.mrb[4].mxu1 }
 0x93c   :  { %v443_v22 = vrot.slane %v436_v21, 1  ;;  %v446_v24 = vadd.f32 %v436_v21, %v386_v19  ;;  %v2458_v26 = vpop.f32.mrb[5].mxu1 }
 0x93d   :  { %v439_v27 = vpop.f32.mrb[6].mxu1 }
 0x93e   :  { %v447_v28 = vadd.f32 %v443_v22, %v387_v20  ;;  %2614 = vtanh.f32 %v446_v24  ;;  %v2459_v29 = vpop.f32.mrb[7].mxu1  ;;  %v2343_v32 = vmul.f32 -1.442695, %v446_v24 }
 0x940   :  { %2616 = vtanh.f32 %v447_v28  ;;  %v2344_v33 = vmul.f32 -1.442695, %v447_v28 }
 0x941   :  { %2618 = vpow2.f32 %v2343_v32 }
 0x942   :  { %2620 = vpow2.f32 %v2344_v33 }
 0x948   :  { %v2615_v30 = vpop.eup %2614 }
 0x949   :  { %466 = vrot.lane.b32.xlu0 %v2615_v30, %s2889_s29 }
 0x94a   :  { %v2617_v31 = vpop.eup %2616 }
 0x94b   :  { %468 = vrot.lane.b32.xlu1 %v2617_v31, %s2889_s29  ;;  %v2619_v34 = vpop.eup %2618 }
 0x94c   :  { %v2621_v35 = vpop.eup %2620  ;;  %v454_v36 = vadd.f32 1.0, %v2619_v34 }
 0x94d   :  { %v455_v37 = vadd.f32 1.0, %v2621_v35 }
 0x94e   :  { %2622 = vrcp.f32 %v454_v36 }
 0x94f   :  { %2624 = vrcp.f32 %v455_v37 }
 0x958   :  { %v2623_v38 = vpop.eup %2622 }
 0x959   :  { %v2625_v42 = vpop.eup %2624  ;;  %v462_v46 = vmul.f32 %v2623_v38, %v362_v61 }
 0x95a   :  { %v463_v49 = vmul.f32 %v2625_v42, %v363_v0 }
 0x9bb   :  { %v467_v39 = vpop.permute.xlu0 %466 }
 0x9bc   :  { %v472_v41 = vmul.f32 %v2623_v38, %v467_v39 }
 0x9bd   :  { %v469_v43 = vpop.permute.xlu1 %468 }
 0x9be   :  { %476 = vrot.lane.b32.xlu0 %v472_v41, %s2890_s30  ;;  %v473_v45 = vmul.f32 %v2625_v42, %v469_v43 }
 0x9c0   :  { %478 = vrot.lane.b32.xlu1 %v473_v45, %s2890_s30 }
 0xa30   :  { %v477_v47 = vpop.permute.xlu0 %476 }
 0xa31   :  { %v482_v48 = vadd.f32 %v477_v47, %v462_v46 }
 0xa32   :  { %v479_v50 = vpop.permute.xlu1 %478 }
 0xa33   :  { %2626 = vtanh.f32 %v482_v48  ;;  %v483_v51 = vadd.f32 %v479_v50, %v463_v49 }
 0xa35   :  { %2628 = vtanh.f32 %v483_v51 }
 0xa3d   :  { %v2627_v52 = vpop.eup %2626 }
 0xa3e   :  { %488 = vrot.lane.b32.xlu0 %v2627_v52, %s2889_s29 }
 0xa3f   :  { %v2629_v53 = vpop.eup %2628 }
 0xa40   :  { %490 = vrot.lane.b32.xlu1 %v2629_v53, %s2889_s29 }
 0xab0   :  { %v489_v54 = vpop.permute.xlu0 %488 }
 0xab1   :  { %v3066_v55 = vmul.f32 %v2623_v38, %v489_v54 }
 0xab2   :  { %v491_v56 = vpop.permute.xlu1 %490 }
 0xab3   :  { %v3068_v57 = vmul.f32 %v2625_v42, %v491_v56  ;;  %v508_v58 = vpack.c.bf16 %v3066_v55, %v3066_v55  ;;  %v626_v56 = vld [vmem:[%s3650_s0 + $0x5] sm:$0x1] }
 0xab5   :  { %v509_v59 = vpack.c.bf16 %v3068_v57, %v3068_v57  ;;  %v512_v61 = vunpack.c.l.b16 %v508_v58  ;;  %v627_v58 = vld [vmem:[%s3650_s0 + $0xd] sm:$0x1] }
 0xab7   :  { %v513_v60 = vunpack.c.l.b16 %v509_v59 }
 0xab9   :  { %v514_v62 = vrot.slane %v513_v60, 7 }
 0xabb   :  { %v515_v63 = vsel %vm154_vm1, %v514_v62, %v512_v61 }
 0xabc   :  { %v516_v0 = vpack.c.b16 %v515_v63, %v515_v63 }
 0xabe   :  { %517 = vrot.lane.b32.xlu1 %v516_v0, %s2890_s30 }
 0xb30   :  { %v518_v1 = vpop.permute.xlu1 %517 }
 0xb31   :  { %2465 = vmatmul.mubr.msk.bf16.vlgmr.msra.gmra.mrb[8].mxu0 %vm36_vm2, %v518_v1 }
 0xb32   :  { %2477 = vmatpush3.bf16.msra.mxu0 %v2936_v4  ;;  %2480 = vmatprep.mubr.msk.bf16.mxu0 %vm2887_vm0, %v2886_v3 }
 0xb33   :  { %2478 = vmatprep.subr.bf16.mxu0 %v2886_v3 }
 0xb36   :  { %2479 = vmatpush3.bf16.msra.mxu0 %v2947_v6 }
 0xb37   :  { %2492 = vmatprep.subr.bf16.mxu0 %v2886_v3 }
 0xc04   :  { %v556_v9 = vpop.f32.mrb[8].mxu0 }
 0xc05   :  { %v563_v11 = vrot.slane %v556_v9, 1  ;;  %v566_v12 = vadd.f32 %v556_v9, %v506_v2  ;;  %v2466_v13 = vpop.f32.mrb[9].mxu0 }
 0xc06   :  { %v559_v14 = vpop.f32.mrb[10].mxu0 }
 0xc07   :  { %v567_v15 = vadd.f32 %v563_v11, %v507_v5  ;;  %2630 = vtanh.f32 %v566_v12  ;;  %v2467_v16 = vpop.f32.mrb[11].mxu0  ;;  %v2346_v19 = vmul.f32 -1.442695, %v566_v12 }
 0xc09   :  { %2632 = vtanh.f32 %v567_v15  ;;  %v2347_v20 = vmul.f32 -1.442695, %v567_v15 }
 0xc0a   :  { %2634 = vpow2.f32 %v2346_v19 }
 0xc0b   :  { %2636 = vpow2.f32 %v2347_v20 }
 0xc11   :  { %v2631_v17 = vpop.eup %2630 }
 0xc12   :  { %586 = vrot.lane.b32.xlu1 %v2631_v17, %s2889_s29 }
 0xc13   :  { %v2633_v18 = vpop.eup %2632 }
 0xc14   :  { %588 = vrot.lane.b32.xlu0 %v2633_v18, %s2889_s29  ;;  %v2635_v21 = vpop.eup %2634 }
 0xc15   :  { %v2637_v22 = vpop.eup %2636  ;;  %v574_v24 = vadd.f32 1.0, %v2635_v21 }
 0xc16   :  { %v575_v26 = vadd.f32 1.0, %v2637_v22 }
 0xc17   :  { %2638 = vrcp.f32 %v574_v24 }
 0xc18   :  { %2640 = vrcp.f32 %v575_v26 }
 0xc21   :  { %v2639_v27 = vpop.eup %2638 }
 0xc22   :  { %v2641_v30 = vpop.eup %2640  ;;  %v582_v33 = vmul.f32 %v2639_v27, %v482_v48 }
 0xc23   :  { %v583_v36 = vmul.f32 %v2641_v30, %v483_v51 }
 0xc84   :  { %v587_v28 = vpop.permute.xlu1 %586 }
 0xc85   :  { %v592_v29 = vmul.f32 %v2639_v27, %v587_v28 }
 0xc86   :  { %v589_v31 = vpop.permute.xlu0 %588 }
 0xc87   :  { %596 = vrot.lane.b32.xlu1 %v592_v29, %s2890_s30  ;;  %v593_v32 = vmul.f32 %v2641_v30, %v589_v31 }
 0xc89   :  { %598 = vrot.lane.b32.xlu0 %v593_v32, %s2890_s30 }
 0xcf9   :  { %v597_v34 = vpop.permute.xlu1 %596 }
 0xcfa   :  { %v602_v35 = vadd.f32 %v597_v34, %v582_v33 }
 0xcfb   :  { %v599_v37 = vpop.permute.xlu0 %598 }
 0xcfc   :  { %2642 = vtanh.f32 %v602_v35  ;;  %v603_v38 = vadd.f32 %v599_v37, %v583_v36 }
 0xcfe   :  { %2644 = vtanh.f32 %v603_v38 }
 0xd06   :  { %v2643_v39 = vpop.eup %2642 }
 0xd07   :  { %608 = vrot.lane.b32.xlu1 %v2643_v39, %s2889_s29 }
 0xd08   :  { %v2645_v41 = vpop.eup %2644 }
 0xd09   :  { %610 = vrot.lane.b32.xlu0 %v2645_v41, %s2889_s29 }
 0xd79   :  { %v609_v42 = vpop.permute.xlu1 %608 }
 0xd7a   :  { %v3095_v43 = vmul.f32 %v2639_v27, %v609_v42  ;;  %v28_v42 = vld [vmem:[%s3653_s3] sm:$0xff] }
 0xd7b   :  { %v611_v45 = vpop.permute.xlu0 %610 }
 0xd7c   :  { %v3097_v46 = vmul.f32 %v2641_v30, %v611_v45  ;;  %v628_v47 = vpack.c.bf16 %v3095_v43, %v3095_v43  ;;  %v29_v45 = vld [vmem:[%s3653_s3 + $0x8] sm:$0xff] }
 0xd7e   :  { %v629_v48 = vpack.c.bf16 %v3097_v46, %v3097_v46  ;;  %v632_v50 = vunpack.c.l.b16 %v628_v47  ;;  %v3146_v47 = vpack.c.bf16 %v29_v45, %v28_v42 }
 0xd80   :  { %v633_v49 = vunpack.c.l.b16 %v629_v48  ;;  %v30_v48 = vld [vmem:[%s3653_s3 + $0x10] sm:$0xff] }
 0xd82   :  { %v634_v51 = vrot.slane %v633_v49, 7  ;;  %v31_v49 = vld [vmem:[%s3653_s3 + $0x18] sm:$0xff] }
 0xd84   :  { %v635_v52 = vsel %vm154_vm1, %v634_v51, %v632_v50  ;;  %v3156_v51 = vpack.c.bf16 %v31_v49, %v30_v48 }
 0xd85   :  { %v636_v53 = vpack.c.b16 %v635_v52, %v635_v52  ;;  %v746_v52 = vld [vmem:[%s3650_s0 + $0x6] sm:$0x1] }
 0xd87   :  { %637 = vrot.lane.b32.xlu0 %v636_v53, %s2890_s30  ;;  %v747_v53 = vld [vmem:[%s3650_s0 + $0xe] sm:$0x1] }
 0xdf9   :  { %v638_v54 = vpop.permute.xlu0 %637 }
 0xdfa   :  { %2473 = vmatmul.mubr.msk.bf16.vlgmr.msra.gmra.mrb[8].mxu1 %vm36_vm2, %v638_v54 }
 0xdfb   :  { %2485 = vmatpush3.bf16.msra.mxu1 %v2936_v4  ;;  %2488 = vmatprep.mubr.msk.bf16.mxu1 %vm2887_vm0, %v2886_v3 }
 0xdfc   :  { %2486 = vmatprep.subr.bf16.mxu1 %v2886_v3 }
 0xdff   :  { %2487 = vmatpush3.bf16.msra.mxu1 %v2947_v6 }
 0xe00   :  { %2500 = vmatprep.subr.bf16.mxu1 %v2886_v3 }
 0xecd   :  { %v676_v59 = vpop.f32.mrb[8].mxu1 }
 0xece   :  { %v683_v60 = vrot.slane %v676_v59, 1  ;;  %v686_v4 = vadd.f32 %v676_v59, %v626_v56  ;;  %v2474_v61 = vpop.f32.mrb[9].mxu1 }
 0xecf   :  { %v679_v62 = vpop.f32.mrb[10].mxu1  ;;  %v993_v61 = vld [vmem:[%s3651_s1 + $0x7] sm:$0x1] }
 0xed0   :  { %v687_v63 = vadd.f32 %v683_v60, %v627_v58  ;;  %2646 = vtanh.f32 %v686_v4  ;;  %v2475_v0 = vpop.f32.mrb[11].mxu1  ;;  %v2349_v2 = vmul.f32 -1.442695, %v686_v4  ;;  %v994_v62 = vld [vmem:[%s3651_s1 + $0xf] sm:$0x1] }
 0xed2   :  { %2648 = vtanh.f32 %v687_v63  ;;  %v2350_v5 = vmul.f32 -1.442695, %v687_v63 }
 0xed3   :  { %2650 = vpow2.f32 %v2349_v2 }
 0xed4   :  { %2652 = vpow2.f32 %v2350_v5 }
 0xeda   :  { %v2647_v6 = vpop.eup %2646 }
 0xedb   :  { %706 = vrot.lane.b32.xlu0 %v2647_v6, %s2889_s29 }
 0xedc   :  { %v2649_v1 = vpop.eup %2648 }
 0xedd   :  { %708 = vrot.lane.b32.xlu1 %v2649_v1, %s2889_s29  ;;  %v2651_v9 = vpop.eup %2650 }
 0xede   :  { %v2653_v11 = vpop.eup %2652  ;;  %v694_v12 = vadd.f32 1.0, %v2651_v9 }
 0xedf   :  { %v695_v13 = vadd.f32 1.0, %v2653_v11 }
 0xee0   :  { %2654 = vrcp.f32 %v694_v12 }
 0xee1   :  { %2656 = vrcp.f32 %v695_v13 }
 0xeea   :  { %v2655_v14 = vpop.eup %2654 }
 0xeeb   :  { %v2657_v17 = vpop.eup %2656  ;;  %v702_v20 = vmul.f32 %v2655_v14, %v602_v35 }
 0xeec   :  { %v703_v24 = vmul.f32 %v2657_v17, %v603_v38 }
 0xf4d   :  { %v707_v15 = vpop.permute.xlu0 %706 }
 0xf4e   :  { %v712_v16 = vmul.f32 %v2655_v14, %v707_v15 }
 0xf4f   :  { %v709_v18 = vpop.permute.xlu1 %708 }
 0xf50   :  { %716 = vrot.lane.b32.xlu0 %v712_v16, %s2890_s30  ;;  %v713_v19 = vmul.f32 %v2657_v17, %v709_v18 }
 0xf52   :  { %718 = vrot.lane.b32.xlu1 %v713_v19, %s2890_s30 }
 0xfc2   :  { %v717_v21 = vpop.permute.xlu0 %716 }
 0xfc3   :  { %v3122_v22 = vadd.f32 %v717_v21, %v702_v20 }
 0xfc4   :  { %v719_v26 = vpop.permute.xlu1 %718 }
 0xfc5   :  { %2658 = vtanh.f32 %v3122_v22  ;;  %v3125_v27 = vadd.f32 %v719_v26, %v703_v24 }
 0xfc7   :  { %2660 = vtanh.f32 %v3125_v27 }
 0xfcf   :  { %v2659_v28 = vpop.eup %2658 }
 0xfd0   :  { %728 = vrot.lane.b32.xlu0 %v2659_v28, %s2889_s29 }
 0xfd1   :  { %v2661_v29 = vpop.eup %2660 }
 0xfd2   :  { %730 = vrot.lane.b32.xlu1 %v2661_v29, %s2889_s29 }
0x1042   :  { %v729_v30 = vpop.permute.xlu0 %728 }
0x1043   :  { %v3130_v31 = vmul.f32 %v2655_v14, %v729_v30 }
0x1044   :  { %v731_v32 = vpop.permute.xlu1 %730 }
0x1045   :  { %v3132_v33 = vmul.f32 %v2657_v17, %v731_v32  ;;  %v748_v34 = vpack.c.bf16 %v3130_v31, %v3130_v31 }
0x1047   :  { %v749_v35 = vpack.c.bf16 %v3132_v33, %v3132_v33  ;;  %v752_v37 = vunpack.c.l.b16 %v748_v34 }
0x1049   :  { %v753_v36 = vunpack.c.l.b16 %v749_v35 }
0x104b   :  { %v754_v38 = vrot.slane %v753_v36, 7 }
0x104d   :  { %v755_v39 = vsel %vm154_vm1, %v754_v38, %v752_v37 }
0x104e   :  { %v756_v41 = vpack.c.b16 %v755_v39, %v755_v39 }
0x1050   :  { %757 = vrot.lane.b32.xlu1 %v756_v41, %s2890_s30 }
0x10c2   :  { %v758_v50 = vpop.permute.xlu1 %757 }
0x10c3   :  { %2481 = vmatmul.mubr.msk.bf16.vlgmr.msra.gmra.mrb[12].mxu0 %vm36_vm2, %v758_v50 }
0x10c4   :  { %2493 = vmatpush3.bf16.msra.mxu0 %v3146_v47  ;;  %2496 = vmatprep.mubr.msk.bf16.mxu0 %vm2887_vm0, %v2886_v3 }
0x10c5   :  { %2494 = vmatprep.subr.bf16.mxu0 %v2886_v3 }
0x10c8   :  { %2495 = vmatpush3.bf16.msra.mxu0 %v3156_v51 }
0x10c9   :  { %2508 = vmatprep.subr.bf16.mxu0 %v2886_v3 }
0x10cb   :  { %2497 = vmatmul.mubr.bf16.vlgmr.msra.gmra.mrb[16].mxu0 %v2888_v7 }
0x10cc   :  { %2509 = vmatpush3.bf16.msra.mxu0 %v3146_v47  ;;  %2512 = vmatprep.mubr.msk.bf16.mxu0 %vm2887_vm0, %v2886_v3 }
0x10cd   :  { %2510 = vmatprep.subr.bf16.mxu0 %v2886_v3 }
0x10d0   :  { %2511 = vmatpush3.bf16.msra.mxu0 %v3156_v51 }
0x10d1   :  { %2524 = vmatprep.subr.bf16.mxu0 %v2886_v3 }
0x1196   :  { %v796_v7 = vpop.f32.mrb[12].mxu0 }
0x1197   :  { %v803_v54 = vrot.slane %v796_v7, 1  ;;  %v806_v56 = vadd.f32 %v796_v7, %v746_v52  ;;  %v2482_v58 = vpop.f32.mrb[13].mxu0 }
0x1198   :  { %v799_v59 = vpop.f32.mrb[14].mxu0 }
0x1199   :  { %v807_v60 = vadd.f32 %v803_v54, %v747_v53  ;;  %2662 = vtanh.f32 %v806_v56  ;;  %v2483_v4 = vpop.f32.mrb[15].mxu0  ;;  %v2352_v15 = vmul.f32 -1.442695, %v806_v56 }
0x119b   :  { %2664 = vtanh.f32 %v807_v60  ;;  %v2353_v16 = vmul.f32 -1.442695, %v807_v60 }
0x119e   :  { %v1029_v63 = vpop.f32.mrb[16].mxu0 }
0x119f   :  { %v1036_v0 = vrot.slane %v1029_v63, 1  ;;  %v1039_v6 = vadd.f32 %v1029_v63, %v993_v61  ;;  %v2498_v1 = vpop.f32.mrb[17].mxu0 }
0x11a0   :  { %v1032_v2 = vpop.f32.mrb[18].mxu0 }
0x11a1   :  { %v1040_v5 = vadd.f32 %v1036_v0, %v994_v62  ;;  %2666 = vtanh.f32 %v1039_v6  ;;  %v2499_v9 = vpop.f32.mrb[19].mxu0  ;;  %v2357_v17 = vmul.f32 -1.442695, %v1039_v6 }
0x11a3   :  { %v2663_v11 = vpop.eup %2662  ;;  %2668 = vtanh.f32 %v1040_v5  ;;  %v2358_v18 = vmul.f32 -1.442695, %v1040_v5 }
0x11a4   :  { %826 = vrot.lane.b32.xlu1 %v2663_v11, %s2889_s29  ;;  %2670 = vpow2.f32 %v2352_v15 }
0x11a5   :  { %v2665_v12 = vpop.eup %2664  ;;  %2672 = vpow2.f32 %v2353_v16 }
0x11a6   :  { %828 = vrot.lane.b32.xlu0 %v2665_v12, %s2889_s29  ;;  %2674 = vpow2.f32 %v2357_v17 }
0x11a7   :  { %2676 = vpow2.f32 %v2358_v18 }
0x11ab   :  { %v2667_v13 = vpop.eup %2666 }
0x11ac   :  { %1059 = vrot.lane.b32.xlu1 %v2667_v13, %s2889_s29 }
0x11ad   :  { %v2669_v14 = vpop.eup %2668 }
0x11ae   :  { %1061 = vrot.lane.b32.xlu0 %v2669_v14, %s2889_s29  ;;  %v2671_v19 = vpop.eup %2670 }
0x11af   :  { %v2673_v20 = vpop.eup %2672  ;;  %v814_v21 = vadd.f32 1.0, %v2671_v19 }
0x11b0   :  { %v815_v24 = vadd.f32 1.0, %v2673_v20  ;;  %v2675_v26 = vpop.eup %2674 }
0x11b1   :  { %2678 = vrcp.f32 %v814_v21  ;;  %v2677_v28 = vpop.eup %2676  ;;  %v1047_v29 = vadd.f32 1.0, %v2675_v26 }
0x11b2   :  { %2680 = vrcp.f32 %v815_v24  ;;  %v1048_v30 = vadd.f32 1.0, %v2677_v28 }
0x11b3   :  { %2682 = vrcp.f32 %v1047_v29 }
0x11b4   :  { %2684 = vrcp.f32 %v1048_v30 }
0x11bb   :  { %v2679_v32 = vpop.eup %2678 }
0x11bc   :  { %v2681_v36 = vpop.eup %2680  ;;  %v822_v50 = vmul.f32 %v2679_v32, %v3122_v22 }
0x11bd   :  { %v2683_v39 = vpop.eup %2682  ;;  %v823_v7 = vmul.f32 %v2681_v36, %v3125_v27 }
0x11be   :  { %v2685_v45 = vpop.eup %2684  ;;  %v1055_v58 = vmul.f32 0.0, %v2683_v39 }
0x11bf   :  { %v1056_v4 = vmul.f32 0.0, %v2685_v45 }
0x1216   :  { %v827_v34 = vpop.permute.xlu1 %826 }
0x1217   :  { %v832_v35 = vmul.f32 %v2679_v32, %v827_v34 }
0x1218   :  { %v829_v37 = vpop.permute.xlu0 %828 }
0x1219   :  { %836 = vrot.lane.b32.xlu1 %v832_v35, %s2890_s30  ;;  %v833_v38 = vmul.f32 %v2681_v36, %v829_v37 }
0x121b   :  { %838 = vrot.lane.b32.xlu0 %v833_v38, %s2890_s30 }
0x121e   :  { %v1060_v41 = vpop.permute.xlu1 %1059 }
0x121f   :  { %v1065_v42 = vmul.f32 %v2683_v39, %v1060_v41 }
0x1220   :  { %v1062_v48 = vpop.permute.xlu0 %1061 }
0x1221   :  { %1069 = vrot.lane.b32.xlu1 %v1065_v42, %s2890_s30  ;;  %v1066_v49 = vmul.f32 %v2685_v45, %v1062_v48  ;;  %v1148_v48 = vld [vmem:[%s3651_s1 + $0xe] sm:$0x1] }
0x1223   :  { %1071 = vrot.lane.b32.xlu0 %v1066_v49, %s2890_s30 }
0x128b   :  { %v837_v52 = vpop.permute.xlu1 %836 }
0x128c   :  { %v3191_v53 = vadd.f32 %v837_v52, %v822_v50 }
0x128d   :  { %v839_v54 = vpop.permute.xlu0 %838 }
0x128e   :  { %2686 = vtanh.f32 %v3191_v53  ;;  %v3195_v56 = vadd.f32 %v839_v54, %v823_v7 }
0x1290   :  { %2688 = vtanh.f32 %v3195_v56 }
0x1293   :  { %v1070_v59 = vpop.permute.xlu1 %1069 }
0x1294   :  { %v3198_v60 = vadd.f32 %v1070_v59, %v1055_v58 }
0x1295   :  { %v1072_v22 = vpop.permute.xlu0 %1071 }
0x1296   :  { %2690 = vtanh.f32 %v3198_v60  ;;  %v3201_v61 = vadd.f32 %v1072_v22, %v1056_v4 }
0x1298   :  { %v2687_v62 = vpop.eup %2686  ;;  %2692 = vtanh.f32 %v3201_v61 }
0x1299   :  { %848 = vrot.lane.b32.xlu1 %v2687_v62, %s2889_s29 }
0x129a   :  { %v2689_v27 = vpop.eup %2688 }
0x129b   :  { %850 = vrot.lane.b32.xlu0 %v2689_v27, %s2889_s29 }
0x12a0   :  { %v2691_v63 = vpop.eup %2690 }
0x12a1   :  { %1081 = vrot.lane.b32.xlu1 %v2691_v63, %s2889_s29 }
0x12a2   :  { %v2693_v0 = vpop.eup %2692 }
0x12a3   :  { %1083 = vrot.lane.b32.xlu0 %v2693_v0, %s2889_s29 }
0x130b   :  { %v849_v6 = vpop.permute.xlu1 %848 }
0x130c   :  { %v3208_v1 = vmul.f32 %v2679_v32, %v849_v6 }
0x130d   :  { %v851_v2 = vpop.permute.xlu0 %850 }
0x130e   :  { %v3210_v5 = vmul.f32 %v2681_v36, %v851_v2  ;;  %v868_v9 = vpack.c.bf16 %v3208_v1, %v3208_v1 }
0x1310   :  { %v869_v11 = vpack.c.bf16 %v3210_v5, %v3210_v5  ;;  %v872_v14 = vunpack.c.l.b16 %v868_v9 }
0x1312   :  { %v873_v12 = vunpack.c.l.b16 %v869_v11 }
0x1313   :  { %v1082_v13 = vpop.permute.xlu1 %1081 }
0x1314   :  { %v874_v15 = vrot.slane %v873_v12, 7  ;;  %v1087_v16 = vmul.f32 %v2683_v39, %v1082_v13 }
0x1315   :  { %v1084_v17 = vpop.permute.xlu0 %1083 }
0x1316   :  { %v1088_v18 = vmul.f32 %v2685_v45, %v1084_v17  ;;  %v875_v19 = vsel %vm154_vm1, %v874_v15, %v872_v14  ;;  %v1149_v21 = vpack.c.bf16 %v1087_v16, %v1087_v16  ;;  %v1147_v45 = vld [vmem:[%s3651_s1 + $0x6] sm:$0x1] }
0x1317   :  { %v876_v20 = vpack.c.b16 %v875_v19, %v875_v19 }
0x1318   :  { %v1098_v24 = vrot.slane %v1088_v18, 7  ;;  %v1150_v26 = vpack.c.bf16 %v1088_v18, %v1088_v18  ;;  %v1153_v30 = vunpack.c.l.b16 %v1149_v21 }
0x1319   :  { %877 = vrot.lane.b32.xlu0 %v876_v20, %s2890_s30 }
0x131a   :  { %v1154_v28 = vunpack.c.l.b16 %v1150_v26  ;;  %v3219_v29 = vsel %vm154_vm1, %v1098_v24, %v1087_v16 }
0x131c   :  { %v1155_v32 = vrot.slane %v1154_v28, 7 }
0x131e   :  { %v1156_v34 = vsel %vm154_vm1, %v1155_v32, %v1153_v30 }
0x131f   :  { %v1157_v35 = vpack.c.b16 %v1156_v34, %v1156_v34 }
0x1321   :  { %1158 = vrot.lane.b32.xlu1 %v1157_v35, %s2890_s30 }
0x138b   :  { %v878_v36 = vpop.permute.xlu0 %877 }
0x138c   :  { %2489 = vmatmul.mubr.msk.bf16.vlgmr.msra.gmra.mrb[12].mxu1 %vm36_vm2, %v878_v36 }
0x138d   :  { %2501 = vmatpush3.bf16.msra.mxu1 %v3146_v47  ;;  %2504 = vmatprep.mubr.msk.bf16.mxu1 %vm2887_vm0, %v2886_v3 }
0x138e   :  { %2502 = vmatprep.subr.bf16.mxu1 %v2886_v3 }
0x1391   :  { %2503 = vmatpush3.bf16.msra.mxu1 %v3156_v51 }
0x1392   :  { %2516 = vmatprep.subr.bf16.mxu1 %v2886_v3 }
0x1393   :  { %v1159_v37 = vpop.permute.xlu1 %1158 }
0x1394   :  { %2505 = vmatmul.mubr.msk.bf16.vlgmr.msra.gmra.mrb[16].mxu1 %vm36_vm2, %v1159_v37 }
0x1395   :  { %2517 = vmatpush3.bf16.msra.mxu1 %v3146_v47  ;;  %2520 = vmatprep.mubr.msk.bf16.mxu1 %vm2887_vm0, %v2886_v3 }
0x1396   :  { %2518 = vmatprep.subr.bf16.mxu1 %v2886_v3 }
0x1399   :  { %2519 = vmatpush3.bf16.msra.mxu1 %v3156_v51 }
0x139a   :  { %2532 = vmatprep.subr.bf16.mxu1 %v2886_v3 }
0x145f   :  { %v3237_v38 = vpop.f32.mrb[12].mxu1 }
0x1460   :  { %v2490_v39 = vpop.f32.mrb[13].mxu1 }
0x1461   :  { %v919_v41 = vpop.f32.mrb[14].mxu1 }
0x1462   :  { %v2491_v42 = vpop.f32.mrb[15].mxu1 }
0x1467   :  { %v1197_v49 = vpop.f32.mrb[16].mxu1 }
0x1468   :  { %v1204_v50 = vrot.slane %v1197_v49, 1  ;;  %v1207_v52 = vadd.f32 %v1197_v49, %v1147_v45  ;;  %v2506_v7 = vpop.f32.mrb[17].mxu1  ;;  %v1312_v49 = vld [vmem:[%s3651_s1 + $0x5] sm:$0x1] }
0x1469   :  { %v1200_v54 = vpop.f32.mrb[18].mxu1 }
0x146a   :  { %v1208_v58 = vadd.f32 %v1204_v50, %v1148_v48  ;;  %2694 = vtanh.f32 %v1207_v52  ;;  %v2507_v59 = vpop.f32.mrb[19].mxu1  ;;  %v2360_v62 = vmul.f32 -1.442695, %v1207_v52  ;;  %v1313_v50 = vld [vmem:[%s3651_s1 + $0xd] sm:$0x1] }
0x146c   :  { %2696 = vtanh.f32 %v1208_v58  ;;  %v2361_v27 = vmul.f32 -1.442695, %v1208_v58 }
0x146d   :  { %2698 = vpow2.f32 %v2360_v62 }
0x146e   :  { %2700 = vpow2.f32 %v2361_v27 }
0x1474   :  { %v2695_v4 = vpop.eup %2694 }
0x1475   :  { %1227 = vrot.lane.b32.xlu1 %v2695_v4, %s2889_s29 }
0x1476   :  { %v2697_v22 = vpop.eup %2696 }
0x1477   :  { %1229 = vrot.lane.b32.xlu0 %v2697_v22, %s2889_s29  ;;  %v2699_v63 = vpop.eup %2698 }
0x1478   :  { %v2701_v0 = vpop.eup %2700  ;;  %v1215_v6 = vadd.f32 1.0, %v2699_v63 }
0x1479   :  { %v1216_v2 = vadd.f32 1.0, %v2701_v0 }
0x147a   :  { %2702 = vrcp.f32 %v1215_v6 }
0x147b   :  { %2704 = vrcp.f32 %v1216_v2 }
0x1484   :  { %v2703_v9 = vpop.eup %2702 }
0x1485   :  { %v2705_v13 = vpop.eup %2704  ;;  %v1223_v16 = vmul.f32 %v2703_v9, %v3198_v60 }
0x1486   :  { %v1224_v19 = vmul.f32 %v2705_v13, %v3201_v61 }
0x14e7   :  { %v1228_v11 = vpop.permute.xlu1 %1227 }
0x14e8   :  { %v1233_v12 = vmul.f32 %v2703_v9, %v1228_v11 }
0x14e9   :  { %v1230_v14 = vpop.permute.xlu0 %1229 }
0x14ea   :  { %1237 = vrot.lane.b32.xlu1 %v1233_v12, %s2890_s30  ;;  %v1234_v15 = vmul.f32 %v2705_v13, %v1230_v14 }
0x14ec   :  { %1239 = vrot.lane.b32.xlu0 %v1234_v15, %s2890_s30 }
0x155c   :  { %v1238_v17 = vpop.permute.xlu1 %1237 }
0x155d   :  { %v3250_v18 = vadd.f32 %v1238_v17, %v1223_v16 }
0x155e   :  { %v1240_v20 = vpop.permute.xlu0 %1239 }
0x155f   :  { %2706 = vtanh.f32 %v3250_v18  ;;  %v3254_v21 = vadd.f32 %v1240_v20, %v1224_v19 }
0x1561   :  { %2708 = vtanh.f32 %v3254_v21 }
0x1569   :  { %v2707_v24 = vpop.eup %2706 }
0x156a   :  { %1249 = vrot.lane.b32.xlu1 %v2707_v24, %s2889_s29 }
0x156b   :  { %v2709_v26 = vpop.eup %2708 }
0x156c   :  { %1251 = vrot.lane.b32.xlu0 %v2709_v26, %s2889_s29 }
0x15dc   :  { %v1250_v28 = vpop.permute.xlu1 %1249 }
0x15dd   :  { %v1255_v60 = vmul.f32 %v2703_v9, %v1250_v28 }
0x15de   :  { %v1252_v30 = vpop.permute.xlu0 %1251 }
0x15df   :  { %v1256_v32 = vmul.f32 %v2705_v13, %v1252_v30  ;;  %v1314_v34 = vpack.c.bf16 %v1255_v60, %v1255_v60 }
0x15e1   :  { %v1266_v35 = vrot.slane %v1256_v32, 7  ;;  %v1315_v61 = vpack.c.bf16 %v1256_v32, %v1256_v32  ;;  %v1318_v39 = vunpack.c.l.b16 %v1314_v34 }
0x15e3   :  { %v1319_v36 = vunpack.c.l.b16 %v1315_v61  ;;  %v3260_v37 = vsel %vm154_vm1, %v1266_v35, %v1255_v60 }
0x15e5   :  { %v1320_v41 = vrot.slane %v1319_v36, 7 }
0x15e7   :  { %v1321_v42 = vsel %vm154_vm1, %v1320_v41, %v1318_v39 }
0x15e8   :  { %v1322_v45 = vpack.c.b16 %v1321_v42, %v1321_v42 }
0x15ea   :  { %1323 = vrot.lane.b32.xlu0 %v1322_v45, %s2890_s30 }
0x165c   :  { %v1324_v48 = vpop.permute.xlu0 %1323 }
0x165d   :  { %2513 = vmatmul.mubr.msk.bf16.vlgmr.msra.gmra.mrb[20].mxu0 %vm36_vm2, %v1324_v48 }
0x165e   :  { %2525 = vmatpush3.bf16.msra.mxu0 %v3146_v47  ;;  %2528 = vmatprep.mubr.msk.bf16.mxu0 %vm2887_vm0, %v2886_v3 }
0x165f   :  { %2526 = vmatprep.subr.bf16.mxu0 %v2886_v3 }
0x1662   :  { %2527 = vmatpush3.bf16.msra.mxu0 %v3156_v51 }
0x1663   :  { %2540 = vmatprep.subr.bf16.mxu0 %v2886_v3 }
0x1730   :  { %v1362_v52 = vpop.f32.mrb[20].mxu0 }
0x1731   :  { %v1369_v7 = vrot.slane %v1362_v52, 1  ;;  %v1372_v54 = vadd.f32 %v1362_v52, %v1312_v49  ;;  %v2514_v58 = vpop.f32.mrb[21].mxu0 }
0x1732   :  { %v1365_v59 = vpop.f32.mrb[22].mxu0 }
0x1733   :  { %v1373_v4 = vadd.f32 %v1369_v7, %v1313_v50  ;;  %2710 = vtanh.f32 %v1372_v54  ;;  %v2515_v22 = vpop.f32.mrb[23].mxu0  ;;  %v2363_v63 = vmul.f32 -1.442695, %v1372_v54  ;;  %v1477_v7 = vld [vmem:[%s3651_s1 + $0x4] sm:$0x1] }
0x1734   :  { %v1478_v54 = vld [vmem:[%s3651_s1 + $0xc] sm:$0x1] }
0x1735   :  { %2712 = vtanh.f32 %v1373_v4  ;;  %v2364_v0 = vmul.f32 -1.442695, %v1373_v4 }
0x1736   :  { %2714 = vpow2.f32 %v2363_v63 }
0x1737   :  { %2716 = vpow2.f32 %v2364_v0 }
0x173d   :  { %v2711_v62 = vpop.eup %2710 }
0x173e   :  { %1392 = vrot.lane.b32.xlu0 %v2711_v62, %s2889_s29 }
0x173f   :  { %v2713_v27 = vpop.eup %2712 }
0x1740   :  { %1394 = vrot.lane.b32.xlu1 %v2713_v27, %s2889_s29  ;;  %v2715_v6 = vpop.eup %2714 }
0x1741   :  { %v2717_v2 = vpop.eup %2716  ;;  %v1380_v9 = vadd.f32 1.0, %v2715_v6 }
0x1742   :  { %v1381_v11 = vadd.f32 1.0, %v2717_v2 }
0x1743   :  { %2718 = vrcp.f32 %v1380_v9 }
0x1744   :  { %2720 = vrcp.f32 %v1381_v11 }
0x174d   :  { %v2719_v12 = vpop.eup %2718 }
0x174e   :  { %v2721_v15 = vpop.eup %2720  ;;  %v1388_v19 = vmul.f32 %v2719_v12, %v3250_v18 }
0x174f   :  { %v1389_v26 = vmul.f32 %v2721_v15, %v3254_v21 }
0x17b0   :  { %v1393_v13 = vpop.permute.xlu0 %1392 }
0x17b1   :  { %v1398_v14 = vmul.f32 %v2719_v12, %v1393_v13 }
0x17b2   :  { %v1395_v16 = vpop.permute.xlu1 %1394 }
0x17b3   :  { %1402 = vrot.lane.b32.xlu0 %v1398_v14, %s2890_s30  ;;  %v1399_v17 = vmul.f32 %v2721_v15, %v1395_v16 }
0x17b5   :  { %1404 = vrot.lane.b32.xlu1 %v1399_v17, %s2890_s30 }
0x1825   :  { %v1403_v20 = vpop.permute.xlu0 %1402 }
0x1826   :  { %v3282_v24 = vadd.f32 %v1403_v20, %v1388_v19 }
0x1827   :  { %v1405_v28 = vpop.permute.xlu1 %1404 }
0x1828   :  { %2722 = vtanh.f32 %v3282_v24  ;;  %v3286_v60 = vadd.f32 %v1405_v28, %v1389_v26 }
0x182a   :  { %2724 = vtanh.f32 %v3286_v60 }
0x1832   :  { %v2723_v30 = vpop.eup %2722 }
0x1833   :  { %1414 = vrot.lane.b32.xlu0 %v2723_v30, %s2889_s29 }
0x1834   :  { %v2725_v32 = vpop.eup %2724 }
0x1835   :  { %1416 = vrot.lane.b32.xlu1 %v2725_v32, %s2889_s29 }
0x18a5   :  { %v1415_v34 = vpop.permute.xlu0 %1414 }
0x18a6   :  { %v1420_v18 = vmul.f32 %v2719_v12, %v1415_v34 }
0x18a7   :  { %v1417_v35 = vpop.permute.xlu1 %1416 }
0x18a8   :  { %v1421_v61 = vmul.f32 %v2721_v15, %v1417_v35  ;;  %v1479_v36 = vpack.c.bf16 %v1420_v18, %v1420_v18 }
0x18aa   :  { %v1431_v39 = vrot.slane %v1421_v61, 7  ;;  %v1480_v21 = vpack.c.bf16 %v1421_v61, %v1421_v61  ;;  %v1483_v45 = vunpack.c.l.b16 %v1479_v36 }
0x18ac   :  { %v1484_v41 = vunpack.c.l.b16 %v1480_v21  ;;  %v3292_v42 = vsel %vm154_vm1, %v1431_v39, %v1420_v18 }
0x18ae   :  { %v1485_v48 = vrot.slane %v1484_v41, 7 }
0x18b0   :  { %v1486_v49 = vsel %vm154_vm1, %v1485_v48, %v1483_v45 }
0x18b1   :  { %v1487_v50 = vpack.c.b16 %v1486_v49, %v1486_v49 }
0x18b3   :  { %1488 = vrot.lane.b32.xlu1 %v1487_v50, %s2890_s30 }
0x1925   :  { %v1489_v52 = vpop.permute.xlu1 %1488 }
0x1926   :  { %2521 = vmatmul.mubr.msk.bf16.vlgmr.msra.gmra.mrb[20].mxu1 %vm36_vm2, %v1489_v52 }
0x1927   :  { %2533 = vmatpush3.bf16.msra.mxu1 %v3146_v47  ;;  %2536 = vmatprep.mubr.msk.bf16.mxu1 %vm2887_vm0, %v2886_v3 }
0x1928   :  { %2534 = vmatprep.subr.bf16.mxu1 %v2886_v3 }
0x192b   :  { %2535 = vmatpush3.bf16.msra.mxu1 %v3156_v51 }
0x192c   :  { %2548 = vmatprep.subr.bf16.mxu1 %v2886_v3 }
0x19f9   :  { %v1527_v58 = vpop.f32.mrb[20].mxu1 }
0x19fa   :  { %v1534_v59 = vrot.slane %v1527_v58, 1  ;;  %v1537_v4 = vadd.f32 %v1527_v58, %v1477_v7  ;;  %v2522_v22 = vpop.f32.mrb[21].mxu1 }
0x19fb   :  { %v1530_v62 = vpop.f32.mrb[22].mxu1  ;;  %v1643_v22 = vld [vmem:[%s3651_s1 + $0xb] sm:$0x1] }
0x19fc   :  { %v1538_v27 = vadd.f32 %v1534_v59, %v1478_v54  ;;  %2726 = vtanh.f32 %v1537_v4  ;;  %v2523_v63 = vpop.f32.mrb[23].mxu1  ;;  %v2366_v2 = vmul.f32 -1.442695, %v1537_v4  ;;  %v1642_v4 = vld [vmem:[%s3651_s1 + $0x3] sm:$0x1] }
0x19fe   :  { %2728 = vtanh.f32 %v1538_v27  ;;  %v2367_v9 = vmul.f32 -1.442695, %v1538_v27 }
0x19ff   :  { %2730 = vpow2.f32 %v2366_v2 }
0x1a00   :  { %2732 = vpow2.f32 %v2367_v9 }
0x1a06   :  { %v2727_v0 = vpop.eup %2726 }
0x1a07   :  { %1557 = vrot.lane.b32.xlu1 %v2727_v0, %s2889_s29 }
0x1a08   :  { %v2729_v6 = vpop.eup %2728 }
0x1a09   :  { %1559 = vrot.lane.b32.xlu0 %v2729_v6, %s2889_s29  ;;  %v2731_v11 = vpop.eup %2730 }
0x1a0a   :  { %v2733_v12 = vpop.eup %2732  ;;  %v1545_v13 = vadd.f32 1.0, %v2731_v11 }
0x1a0b   :  { %v1546_v14 = vadd.f32 1.0, %v2733_v12 }
0x1a0c   :  { %2734 = vrcp.f32 %v1545_v13 }
0x1a0d   :  { %2736 = vrcp.f32 %v1546_v14 }
0x1a16   :  { %v2735_v15 = vpop.eup %2734 }
0x1a17   :  { %v2737_v19 = vpop.eup %2736  ;;  %v1553_v28 = vmul.f32 %v2735_v15, %v3282_v24 }
0x1a18   :  { %v1554_v34 = vmul.f32 %v2737_v19, %v3286_v60 }
0x1a79   :  { %v1558_v16 = vpop.permute.xlu1 %1557 }
0x1a7a   :  { %v1563_v17 = vmul.f32 %v2735_v15, %v1558_v16 }
0x1a7b   :  { %v1560_v20 = vpop.permute.xlu0 %1559 }
0x1a7c   :  { %1567 = vrot.lane.b32.xlu1 %v1563_v17, %s2890_s30  ;;  %v1564_v26 = vmul.f32 %v2737_v19, %v1560_v20 }
0x1a7e   :  { %1569 = vrot.lane.b32.xlu0 %v1564_v26, %s2890_s30 }
0x1aee   :  { %v1568_v30 = vpop.permute.xlu1 %1567 }
0x1aef   :  { %v3314_v32 = vadd.f32 %v1568_v30, %v1553_v28 }
0x1af0   :  { %v1570_v18 = vpop.permute.xlu0 %1569 }
0x1af1   :  { %2738 = vtanh.f32 %v3314_v32  ;;  %v1574_v35 = vadd.f32 %v1570_v18, %v1554_v34 }
0x1af3   :  { %2740 = vtanh.f32 %v1574_v35 }
0x1afb   :  { %v2739_v61 = vpop.eup %2738 }
0x1afc   :  { %1579 = vrot.lane.b32.xlu1 %v2739_v61, %s2889_s29 }
0x1afd   :  { %v2741_v36 = vpop.eup %2740 }
0x1afe   :  { %1581 = vrot.lane.b32.xlu0 %v2741_v36, %s2889_s29 }
0x1b6e   :  { %v1580_v39 = vpop.permute.xlu1 %1579 }
0x1b6f   :  { %v1585_v21 = vmul.f32 %v2735_v15, %v1580_v39 }
0x1b70   :  { %v1582_v41 = vpop.permute.xlu0 %1581 }
0x1b71   :  { %v1586_v24 = vmul.f32 %v2737_v19, %v1582_v41  ;;  %v1644_v45 = vpack.c.bf16 %v1585_v21, %v1585_v21 }
0x1b73   :  { %v1596_v48 = vrot.slane %v1586_v24, 7  ;;  %v1645_v49 = vpack.c.bf16 %v1586_v24, %v1586_v24  ;;  %v1648_v52 = vunpack.c.l.b16 %v1644_v45 }
0x1b75   :  { %v1649_v50 = vunpack.c.l.b16 %v1645_v49  ;;  %v3321_v60 = vsel %vm154_vm1, %v1596_v48, %v1585_v21 }
0x1b77   :  { %v1650_v7 = vrot.slane %v1649_v50, 7 }
0x1b79   :  { %v1651_v54 = vsel %vm154_vm1, %v1650_v7, %v1648_v52 }
0x1b7a   :  { %v1652_v58 = vpack.c.b16 %v1651_v54, %v1651_v54 }
0x1b7c   :  { %1653 = vrot.lane.b32.xlu0 %v1652_v58, %s2890_s30 }
0x1bee   :  { %v1654_v59 = vpop.permute.xlu0 %1653 }
0x1bef   :  { %2529 = vmatmul.mubr.msk.bf16.vlgmr.msra.gmra.mrb[24].mxu0 %vm36_vm2, %v1654_v59 }
0x1bf0   :  { %2541 = vmatpush3.bf16.msra.mxu0 %v3146_v47  ;;  %2544 = vmatprep.mubr.msk.bf16.mxu0 %vm2887_vm0, %v2886_v3 }
0x1bf1   :  { %2542 = vmatprep.subr.bf16.mxu0 %v2886_v3 }
0x1bf4   :  { %2543 = vmatpush3.bf16.msra.mxu0 %v3156_v51 }
0x1cc2   :  { %v1692_v62 = vpop.f32.mrb[24].mxu0 }
0x1cc3   :  { %v1699_v27 = vrot.slane %v1692_v62, 1  ;;  %v1702_v63 = vadd.f32 %v1692_v62, %v1642_v4  ;;  %v2530_v0 = vpop.f32.mrb[25].mxu0 }
0x1cc4   :  { %v1695_v6 = vpop.f32.mrb[26].mxu0  ;;  %v1807_v0 = vld [vmem:[%s3651_s1 + $0x2] sm:$0x1] }
0x1cc5   :  { %v1703_v2 = vadd.f32 %v1699_v27, %v1643_v22  ;;  %2742 = vtanh.f32 %v1702_v63  ;;  %v2531_v9 = vpop.f32.mrb[27].mxu0  ;;  %v2369_v13 = vmul.f32 -1.442695, %v1702_v63  ;;  %v1808_v6 = vld [vmem:[%s3651_s1 + $0xa] sm:$0x1] }
0x1cc7   :  { %2744 = vtanh.f32 %v1703_v2  ;;  %v2370_v14 = vmul.f32 -1.442695, %v1703_v2 }
0x1cc8   :  { %2746 = vpow2.f32 %v2369_v13 }
0x1cc9   :  { %2748 = vpow2.f32 %v2370_v14 }
0x1ccf   :  { %v2743_v11 = vpop.eup %2742 }
0x1cd0   :  { %1722 = vrot.lane.b32.xlu0 %v2743_v11, %s2889_s29 }
0x1cd1   :  { %v2745_v12 = vpop.eup %2744 }
0x1cd2   :  { %1724 = vrot.lane.b32.xlu1 %v2745_v12, %s2889_s29  ;;  %v2747_v15 = vpop.eup %2746 }
0x1cd3   :  { %v2749_v16 = vpop.eup %2748  ;;  %v1710_v17 = vadd.f32 1.0, %v2747_v15 }
0x1cd4   :  { %v1711_v19 = vadd.f32 1.0, %v2749_v16 }
0x1cd5   :  { %2750 = vrcp.f32 %v1710_v17 }
0x1cd6   :  { %2752 = vrcp.f32 %v1711_v19 }
0x1cdf   :  { %v2751_v20 = vpop.eup %2750 }
0x1ce0   :  { %v2753_v30 = vpop.eup %2752  ;;  %v1718_v61 = vmul.f32 %v2751_v20, %v3314_v32 }
0x1ce1   :  { %v1719_v21 = vmul.f32 %v2753_v30, %v1574_v35 }
0x1d42   :  { %v1723_v26 = vpop.permute.xlu0 %1722 }
0x1d43   :  { %v1728_v28 = vmul.f32 %v2751_v20, %v1723_v26 }
0x1d44   :  { %v1725_v34 = vpop.permute.xlu1 %1724 }
0x1d45   :  { %1732 = vrot.lane.b32.xlu0 %v1728_v28, %s2890_s30  ;;  %v1729_v18 = vmul.f32 %v2753_v30, %v1725_v34 }
0x1d47   :  { %1734 = vrot.lane.b32.xlu1 %v1729_v18, %s2890_s30 }
0x1db7   :  { %v1733_v36 = vpop.permute.xlu0 %1732 }
0x1db8   :  { %v3342_v39 = vadd.f32 %v1733_v36, %v1718_v61 }
0x1db9   :  { %v1735_v41 = vpop.permute.xlu1 %1734 }
0x1dba   :  { %2754 = vtanh.f32 %v3342_v39  ;;  %v1739_v24 = vadd.f32 %v1735_v41, %v1719_v21 }
0x1dbc   :  { %2756 = vtanh.f32 %v1739_v24 }
0x1dc4   :  { %v2755_v45 = vpop.eup %2754 }
0x1dc5   :  { %1744 = vrot.lane.b32.xlu0 %v2755_v45, %s2889_s29 }
0x1dc6   :  { %v2757_v48 = vpop.eup %2756 }
0x1dc7   :  { %1746 = vrot.lane.b32.xlu1 %v2757_v48, %s2889_s29 }
0x1e37   :  { %v1745_v49 = vpop.permute.xlu0 %1744 }
0x1e38   :  { %v1750_v50 = vmul.f32 %v2751_v20, %v1745_v49 }
0x1e39   :  { %v1747_v52 = vpop.permute.xlu1 %1746 }
0x1e3a   :  { %v1751_v7 = vmul.f32 %v2753_v30, %v1747_v52  ;;  %v1809_v32 = vpack.c.bf16 %v1750_v50, %v1750_v50 }
0x1e3c   :  { %v1761_v54 = vrot.slane %v1751_v7, 7  ;;  %v1810_v58 = vpack.c.bf16 %v1751_v7, %v1751_v7  ;;  %v1813_v4 = vunpack.c.l.b16 %v1809_v32 }
0x1e3e   :  { %v1814_v59 = vunpack.c.l.b16 %v1810_v58  ;;  %v3348_v35 = vsel %vm154_vm1, %v1761_v54, %v1750_v50 }
0x1e40   :  { %v1815_v22 = vrot.slane %v1814_v59, 7 }
0x1e42   :  { %v1816_v62 = vsel %vm154_vm1, %v1815_v22, %v1813_v4 }
0x1e43   :  { %v1817_v27 = vpack.c.b16 %v1816_v62, %v1816_v62 }
0x1e45   :  { %1818 = vrot.lane.b32.xlu1 %v1817_v27, %s2890_s30 }
0x1eb7   :  { %v1819_v63 = vpop.permute.xlu1 %1818 }
0x1eb8   :  { %2537 = vmatmul.mubr.msk.bf16.vlgmr.msra.gmra.mrb[24].mxu1 %vm36_vm2, %v1819_v63 }
0x1eb9   :  { %2549 = vmatpush3.bf16.msra.mxu1 %v3146_v47  ;;  %2552 = vmatprep.mubr.msk.bf16.mxu1 %vm2887_vm0, %v2886_v3 }
0x1eba   :  { %2550 = vmatprep.subr.bf16.mxu1 %v2886_v3 }
0x1ebd   :  { %2551 = vmatpush3.bf16.msra.mxu1 %v3156_v51 }
0x1f8b   :  { %v1857_v2 = vpop.f32.mrb[24].mxu1 }
0x1f8c   :  { %v1864_v9 = vrot.slane %v1857_v2, 1  ;;  %v1867_v11 = vadd.f32 %v1857_v2, %v1807_v0  ;;  %v2538_v12 = vpop.f32.mrb[25].mxu1 }
0x1f8d   :  { %v1860_v47 = vpop.f32.mrb[26].mxu1 }
0x1f8e   :  { %v1868_v13 = vadd.f32 %v1864_v9, %v1808_v6  ;;  %2758 = vtanh.f32 %v1867_v11  ;;  %v2539_v14 = vpop.f32.mrb[27].mxu1  ;;  %v2372_v15 = vmul.f32 -1.442695, %v1867_v11  ;;  %v1972_v9 = vld [vmem:[%s3651_s1 + $0x1] sm:$0x1] }
0x1f8f   :  { %v1973_v11 = vld [vmem:[%s3651_s1 + $0x9] sm:$0x1] }
0x1f90   :  { %2760 = vtanh.f32 %v1868_v13  ;;  %v2373_v16 = vmul.f32 -1.442695, %v1868_v13 }
0x1f91   :  { %2762 = vpow2.f32 %v2372_v15 }
0x1f92   :  { %2764 = vpow2.f32 %v2373_v16 }
0x1f98   :  { %v2759_v3 = vpop.eup %2758 }
0x1f99   :  { %1887 = vrot.lane.b32.xlu1 %v2759_v3, %s2889_s29 }
0x1f9a   :  { %v2761_v51 = vpop.eup %2760 }
0x1f9b   :  { %1889 = vrot.lane.b32.xlu0 %v2761_v51, %s2889_s29  ;;  %v2763_v17 = vpop.eup %2762 }
0x1f9c   :  { %v2765_v19 = vpop.eup %2764  ;;  %v1875_v20 = vadd.f32 1.0, %v2763_v17 }
0x1f9d   :  { %v1876_v26 = vadd.f32 1.0, %v2765_v19 }
0x1f9e   :  { %2766 = vrcp.f32 %v1875_v20 }
0x1f9f   :  { %2768 = vrcp.f32 %v1876_v26 }
0x1fa8   :  { %v2767_v28 = vpop.eup %2766 }
0x1fa9   :  { %v2769_v18 = vpop.eup %2768  ;;  %v1883_v21 = vmul.f32 %v2767_v28, %v3342_v39 }
0x1faa   :  { %v1884_v48 = vmul.f32 %v2769_v18, %v1739_v24 }
0x200b   :  { %v1888_v30 = vpop.permute.xlu1 %1887 }
0x200c   :  { %v1893_v34 = vmul.f32 %v2767_v28, %v1888_v30 }
0x200d   :  { %v1890_v61 = vpop.permute.xlu0 %1889 }
0x200e   :  { %1897 = vrot.lane.b32.xlu1 %v1893_v34, %s2890_s30  ;;  %v1894_v36 = vmul.f32 %v2769_v18, %v1890_v61 }
0x2010   :  { %1899 = vrot.lane.b32.xlu0 %v1894_v36, %s2890_s30 }
0x2080   :  { %v1898_v41 = vpop.permute.xlu1 %1897 }
0x2081   :  { %v1903_v45 = vadd.f32 %v1898_v41, %v1883_v21 }
0x2082   :  { %v1900_v49 = vpop.permute.xlu0 %1899 }
0x2083   :  { %2770 = vtanh.f32 %v1903_v45  ;;  %v1904_v50 = vadd.f32 %v1900_v49, %v1884_v48  ;;  %v923_v49 = vrot.slane %v3237_v38, 1 }
0x2085   :  { %2772 = vtanh.f32 %v1904_v50 }
0x208d   :  { %v2771_v52 = vpop.eup %2770 }
0x208e   :  { %1909 = vrot.lane.b32.xlu1 %v2771_v52, %s2889_s29 }
0x208f   :  { %v2773_v7 = vpop.eup %2772 }
0x2090   :  { %1911 = vrot.lane.b32.xlu0 %v2773_v7, %s2889_s29  ;;  %v867_v7 = vld [vmem:[%s3650_s0 + $0xf] sm:$0x1] }
0x2100   :  { %v1910_v32 = vpop.permute.xlu1 %1909 }
0x2101   :  { %v1915_v54 = vmul.f32 %v2767_v28, %v1910_v32 }
0x2102   :  { %v1912_v58 = vpop.permute.xlu0 %1911 }
0x2103   :  { %v1916_v59 = vmul.f32 %v2769_v18, %v1912_v58  ;;  %v1974_v4 = vpack.c.bf16 %v1915_v54, %v1915_v54 }
0x2105   :  { %v1926_v22 = vrot.slane %v1916_v59, 7  ;;  %v1975_v39 = vpack.c.bf16 %v1916_v59, %v1916_v59  ;;  %v1978_v27 = vunpack.c.l.b16 %v1974_v4  ;;  %v927_v59 = vadd.f32 %v923_v49, %v867_v7 }
0x2107   :  { %v1979_v62 = vunpack.c.l.b16 %v1975_v39  ;;  %v3372_v24 = vsel %vm154_vm1, %v1926_v22, %v1915_v54 }
0x2109   :  { %v1980_v63 = vrot.slane %v1979_v62, 7 }
0x210b   :  { %v1981_v0 = vsel %vm154_vm1, %v1980_v63, %v1978_v27 }
0x210c   :  { %v1982_v6 = vpack.c.b16 %v1981_v0, %v1981_v0 }
0x210e   :  { %1983 = vrot.lane.b32.xlu0 %v1982_v6, %s2890_s30 }
0x2180   :  { %v1984_v2 = vpop.permute.xlu0 %1983 }
0x2181   :  { %2545 = vmatmul.mubr.msk.bf16.vlgmr.msra.gmra.mrb[28].mxu0 %vm36_vm2, %v1984_v2 }
0x2254   :  { %v2022_v12 = vpop.f32.mrb[28].mxu0 }
0x2255   :  { %v2029_v47 = vrot.slane %v2022_v12, 1  ;;  %v2032_v13 = vadd.f32 %v2022_v12, %v1972_v9  ;;  %v2546_v14 = vpop.f32.mrb[29].mxu0 }
0x2256   :  { %v2025_v3 = vpop.f32.mrb[30].mxu0 }
0x2257   :  { %v2033_v51 = vadd.f32 %v2029_v47, %v1973_v11  ;;  %2774 = vtanh.f32 %v2032_v13  ;;  %v2547_v15 = vpop.f32.mrb[31].mxu0  ;;  %v2375_v19 = vmul.f32 -1.442695, %v2032_v13 }
0x2259   :  { %2776 = vtanh.f32 %v2033_v51  ;;  %v2376_v20 = vmul.f32 -1.442695, %v2033_v51 }
0x225a   :  { %2778 = vpow2.f32 %v2375_v19  ;;  %v2356_v19 = vmul.f32 -1.442695, %v927_v59 }
0x225b   :  { %2780 = vpow2.f32 %v2376_v20 }
0x2261   :  { %v2775_v16 = vpop.eup %2774 }
0x2262   :  { %2052 = vrot.lane.b32.xlu0 %v2775_v16, %s2889_s29 }
0x2263   :  { %v2777_v17 = vpop.eup %2776 }
0x2264   :  { %2054 = vrot.lane.b32.xlu1 %v2777_v17, %s2889_s29  ;;  %v2779_v26 = vpop.eup %2778 }
0x2265   :  { %v2781_v28 = vpop.eup %2780  ;;  %v2040_v30 = vadd.f32 1.0, %v2779_v26  ;;  %v2137_v26 = vld [vmem:[%s3651_s1] sm:$0x1] }
0x2266   :  { %v2041_v34 = vadd.f32 1.0, %v2781_v28  ;;  %v2138_v28 = vld [vmem:[%s3651_s1 + $0x8] sm:$0x1]  ;;  %s2892_s1 = smov [#allocation4]  }
0x2267   :  { %2782 = vrcp.f32 %v2040_v30 }
0x2268   :  { %2784 = vrcp.f32 %v2041_v34 }
0x2271   :  { %v2783_v18 = vpop.eup %2782 }
0x2272   :  { %v2785_v21 = vpop.eup %2784  ;;  %v2048_v52 = vmul.f32 %v2783_v18, %v1903_v45 }
0x2273   :  { %v2049_v58 = vmul.f32 %v2785_v21, %v1904_v50  ;;  %v866_v50 = vld [vmem:[%s3650_s0 + $0x7] sm:$0x1] }
0x2274   :  { %v926_v6 = vadd.f32 %v3237_v38, %v866_v50 }
0x2276   :  { %v2355_v17 = vmul.f32 -1.442695, %v926_v6 }
0x22d4   :  { %v2053_v61 = vpop.permute.xlu0 %2052 }
0x22d5   :  { %v2058_v36 = vmul.f32 %v2783_v18, %v2053_v61 }
0x22d6   :  { %v2055_v41 = vpop.permute.xlu1 %2054 }
0x22d7   :  { %2062 = vrot.lane.b32.xlu0 %v2058_v36, %s2890_s30  ;;  %v2059_v48 = vmul.f32 %v2785_v21, %v2055_v41 }
0x22d9   :  { %2064 = vrot.lane.b32.xlu1 %v2059_v48, %s2890_s30 }
0x2349   :  { %v2063_v32 = vpop.permute.xlu0 %2062 }
0x234a   :  { %v3391_v54 = vadd.f32 %v2063_v32, %v2048_v52 }
0x234b   :  { %v2065_v4 = vpop.permute.xlu1 %2064 }
0x234c   :  { %2786 = vtanh.f32 %v3391_v54  ;;  %v3394_v22 = vadd.f32 %v2065_v4, %v2049_v58 }
0x234e   :  { %2788 = vtanh.f32 %v3394_v22 }
0x234f   :  { %2790 = vtanh.f32 %v927_v59 }
0x2350   :  { %2792 = vtanh.f32 %v926_v6 }
0x2351   :  { %2794 = vpow2.f32 %v2355_v17 }
0x2352   :  { %2796 = vpow2.f32 %v2356_v19 }
0x2356   :  { %v2787_v39 = vpop.eup %2786 }
0x2357   :  { %2074 = vrot.lane.b32.xlu0 %v2787_v39, %s2889_s29 }
0x2358   :  { %v2789_v45 = vpop.eup %2788 }
0x2359   :  { %v2791_v62 = vpop.eup %2790  ;;  %2076 = vrot.lane.b32.xlu1 %v2789_v45, %s2889_s29 }
0x235a   :  { %v2793_v16 = vpop.eup %2792 }
0x235b   :  { %948 = vrot.lane.b32.xlu0 %v2791_v62, %s2889_s29  ;;  %v2795_v20 = vpop.eup %2794 }
0x235c   :  { %v2797_v34 = vpop.eup %2796 }
0x235d   :  { %v935_v52 = vadd.f32 1.0, %v2797_v34 }
0x23c9   :  { %v2075_v27 = vpop.permute.xlu0 %2074 }
0x23ca   :  { %v2080_v63 = vmul.f32 %v2783_v18, %v2075_v27  ;;  %v934_v18 = vadd.f32 1.0, %v2795_v20 }
0x23cb   :  { %v2077_v0 = vpop.permute.xlu1 %2076 }
0x23cc   :  { %v2081_v2 = vmul.f32 %v2785_v21, %v2077_v0  ;;  %v2139_v9 = vpack.c.bf16 %v2080_v63, %v2080_v63 }
0x23cd   :  { %v949_v4 = vpop.permute.xlu0 %948 }
0x23ce   :  { %v2091_v11 = vrot.slane %v2081_v2, 7  ;;  %v2140_v12 = vpack.c.bf16 %v2081_v2, %v2081_v2  ;;  %v2143_v14 = vunpack.c.l.b16 %v2139_v9 }
0x23d0   :  { %v2144_v47 = vunpack.c.l.b16 %v2140_v12  ;;  %v3405_v13 = vsel %vm154_vm1, %v2091_v11, %v2080_v63 }
0x23d2   :  { %v2145_v3 = vrot.slane %v2144_v47, 7 }
0x23d4   :  { %v2146_v51 = vsel %vm154_vm1, %v2145_v3, %v2143_v14 }
0x23d5   :  { %v2147_v15 = vpack.c.b16 %v2146_v51, %v2146_v51 }
0x23d7   :  { %2148 = vrot.lane.b32.xlu1 %v2147_v15, %s2890_s30 }
0x23db   :  { %946 = vrot.lane.b32.xlu1 %v2793_v16, %s2889_s29 }
0x2449   :  { %v2149_v38 = vpop.permute.xlu1 %2148 }
0x244a   :  { %2553 = vmatmul.mubr.msk.bf16.vlgmr.msra.gmra.mrb[28].mxu1 %vm36_vm2, %v2149_v38 }
0x244d   :  { %v947_v32 = vpop.permute.xlu1 %946 }
0x251d   :  { %v2187_v30 = vpop.f32.mrb[28].mxu1 }
0x251e   :  { %v2194_v61 = vrot.slane %v2187_v30, 1  ;;  %v2197_v36 = vadd.f32 %v2187_v30, %v2137_v26  ;;  %v2554_v21 = vpop.f32.mrb[29].mxu1 }
0x251f   :  { %v2190_v41 = vpop.f32.mrb[30].mxu1 }
0x2520   :  { %v2198_v48 = vadd.f32 %v2194_v61, %v2138_v28  ;;  %2798 = vtanh.f32 %v2197_v36  ;;  %v2555_v49 = vpop.f32.mrb[31].mxu1  ;;  %v2378_v27 = vmul.f32 -1.442695, %v2197_v36 }
0x2521   :  { %2800 = vrcp.f32 %v934_v18 }
0x2522   :  { %2802 = vtanh.f32 %v2198_v48  ;;  %v2379_v50 = vmul.f32 -1.442695, %v2198_v48 }
0x2523   :  { %2804 = vrcp.f32 %v935_v52 }
0x2524   :  { %2806 = vpow2.f32 %v2378_v27 }
0x2525   :  { %2808 = vpow2.f32 %v2379_v50 }
0x252a   :  { %v2799_v7 = vpop.eup %2798 }
0x252b   :  { %2217 = vrot.lane.b32.xlu1 %v2799_v7, %s2889_s29  ;;  %v3418_v58 = vpop.eup %2800 }
0x252c   :  { %v2803_v59 = vpop.eup %2802  ;;  %v952_v39 = vmul.f32 %v3418_v58, %v947_v32  ;;  %v942_v3 = vmul.f32 %v3418_v58, %v3191_v53 }
0x252d   :  { %2219 = vrot.lane.b32.xlu0 %v2803_v59, %s2889_s29  ;;  %v2805_v45 = vpop.eup %2804 }
0x252e   :  { %v953_v62 = vmul.f32 %v2805_v45, %v949_v4  ;;  %v2807_v63 = vpop.eup %2806  ;;  %v943_v38 = vmul.f32 %v2805_v45, %v3195_v56 }
0x252f   :  { %956 = vrot.lane.b32.xlu1 %v952_v39, %s2890_s30  ;;  %v2809_v0 = vpop.eup %2808  ;;  %v2205_v6 = vadd.f32 1.0, %v2807_v63 }
0x2530   :  { %v2206_v2 = vadd.f32 1.0, %v2809_v0 }
0x2531   :  { %958 = vrot.lane.b32.xlu0 %v953_v62, %s2890_s30  ;;  %2810 = vrcp.f32 %v2205_v6 }
0x2532   :  { %2812 = vrcp.f32 %v2206_v2 }
0x253b   :  { %v3424_v9 = vpop.eup %2810 }
0x253c   :  { %v2813_v47 = vpop.eup %2812  ;;  %v2213_v53 = vmul.f32 %v3424_v9, %v3391_v54 }
0x253d   :  { %v2214_v34 = vmul.f32 %v2813_v47, %v3394_v22 }
0x259d   :  { %v2218_v11 = vpop.permute.xlu1 %2217 }
0x259e   :  { %v2223_v12 = vmul.f32 %v3424_v9, %v2218_v11 }
0x259f   :  { %v2220_v14 = vpop.permute.xlu0 %2219 }
0x25a0   :  { %2227 = vrot.lane.b32.xlu1 %v2223_v12, %s2890_s30  ;;  %v2224_v51 = vmul.f32 %v2813_v47, %v2220_v14 }
0x25a1   :  { %v957_v15 = vpop.permute.xlu1 %956 }
0x25a2   :  { %v962_v16 = vadd.f32 %v957_v15, %v942_v3  ;;  %2229 = vrot.lane.b32.xlu0 %v2224_v51, %s2890_s30 }
0x25a3   :  { %v959_v17 = vpop.permute.xlu0 %958 }
0x25a4   :  { %2814 = vtanh.f32 %v962_v16  ;;  %v963_v19 = vadd.f32 %v959_v17, %v943_v38 }
0x25a6   :  { %2816 = vtanh.f32 %v963_v19 }
0x25ae   :  { %v2815_v20 = vpop.eup %2814 }
0x25af   :  { %968 = vrot.lane.b32.xlu1 %v2815_v20, %s2889_s29 }
0x25b0   :  { %v2817_v26 = vpop.eup %2816 }
0x25b1   :  { %970 = vrot.lane.b32.xlu0 %v2817_v26, %s2889_s29 }
0x2612   :  { %v2228_v28 = vpop.permute.xlu1 %2227 }
0x2613   :  { %v2233_v30 = vadd.f32 %v2228_v28, %v2213_v53 }
0x2614   :  { %v2230_v18 = vpop.permute.xlu0 %2229 }
0x2615   :  { %2818 = vtanh.f32 %v2233_v30  ;;  %v2234_v56 = vadd.f32 %v2230_v18, %v2214_v34 }
0x2617   :  { %2820 = vtanh.f32 %v2234_v56 }
0x261f   :  { %v2819_v61 = vpop.eup %2818 }
0x2620   :  { %2239 = vrot.lane.b32.xlu1 %v2819_v61, %s2889_s29 }
0x2621   :  { %v2821_v36 = vpop.eup %2820 }
0x2622   :  { %2241 = vrot.lane.b32.xlu0 %v2821_v36, %s2889_s29 }
0x2624   :  { %138 = vrot.lane.b32.xlu1 %v2978_v40, %s2890_s30  ;;  %v971_v40 = vpop.permute.xlu0 %970 }
0x2626   :  { %136 = vrot.lane.b32.xlu0 %v2982_v44, %s2890_s30  ;;  %v975_v44 = vmul.f32 %v2805_v45, %v971_v40 }
0x2628   :  { %260 = vrot.lane.b32.xlu1 %v3010_v25, %s2890_s30 }
0x262a   :  { %258 = vrot.lane.b32.xlu0 %v3008_v23, %s2890_s30  ;;  %v969_v23 = vpop.permute.xlu1 %968 }
0x262b   :  { %v974_v25 = vmul.f32 %v3418_v58, %v969_v23 }
0x262c   :  { %380 = vrot.lane.b32.xlu1 %v3039_v10, %s2890_s30 }
0x262e   :  { %378 = vrot.lane.b32.xlu0 %v3037_v8, %s2890_s30  ;;  %v986_v8 = vrot.slane %v975_v44, 7 }
0x2630   :  { %620 = vrot.lane.b32.xlu1 %v3097_v46, %s2890_s30  ;;  %v987_v10 = vsel %vm154_vm1, %v986_v8, %v974_v25 }
0x2632   :  { %500 = vrot.lane.b32.xlu0 %v3068_v57, %s2890_s30 }
0x2634   :  { %860 = vrot.lane.b32.xlu1 %v3210_v5, %s2890_s30 }
0x2636   :  { %740 = vrot.lane.b32.xlu0 %v3132_v33, %s2890_s30 }
0x2638   :  { %498 = vrot.lane.b32.xlu1 %v3066_v55, %s2890_s30 }
0x263a   :  { %980 = vrot.lane.b32.xlu0 %v975_v44, %s2890_s30 }
0x263c   :  { %738 = vrot.lane.b32.xlu1 %v3130_v31, %s2890_s30 }
0x263e   :  { %618 = vrot.lane.b32.xlu0 %v3095_v43, %s2890_s30 }
0x2640   :  { %978 = vrot.lane.b32.xlu1 %v974_v25, %s2890_s30 }
0x2642   :  { %858 = vrot.lane.b32.xlu0 %v3208_v1, %s2890_s30 }
0x2644   :  { %1268 = vrot.lane.b32.xlu1 %v3260_v37, %s2889_s29 }
0x2646   :  { %1100 = vrot.lane.b32.xlu0 %v3219_v29, %s2889_s29 }
0x2648   :  { %1598 = vrot.lane.b32.xlu1 %v3321_v60, %s2889_s29 }
0x264a   :  { %1433 = vrot.lane.b32.xlu0 %v3292_v42, %s2889_s29 }
0x264c   :  { %1928 = vrot.lane.b32.xlu1 %v3372_v24, %s2889_s29 }
0x264e   :  { %1763 = vrot.lane.b32.xlu0 %v3348_v35, %s2889_s29 }
0x2652   :  { %2093 = vrot.lane.b32.xlu0 %v3405_v13, %s2889_s29 }
0x2656   :  { %988 = vrot.lane.b32.xlu0 %v987_v10, %s2890_s30 }
0x2692   :  { %v2240_v55 = vpop.permute.xlu1 %2239 }
0x2693   :  { %v2245_v31 = vmul.f32 %v3424_v9, %v2240_v55 }
0x2694   :  { %v2242_v57 = vpop.permute.xlu0 %2241 }
0x2695   :  { %v2246_v43 = vmul.f32 %v2813_v47, %v2242_v57 }
0x2696   :  { %v139_v46 = vpop.permute.xlu1 %138 }
0x2697   :  { %144 = vst.msk [vmem:[#allocation2 + $0x8] sm:$0x1] %vm142_vm3, %v139_v46  ;;  %v2256_v33 = vrot.slane %v2246_v43, 7 }
0x2698   :  { %v137_v1 = vpop.permute.xlu0 %136 }
0x2699   :  { %143 = vst.msk [vmem:[#allocation2] sm:$0x1] %vm142_vm3, %v137_v1  ;;  %v2257_v5 = vsel %vm154_vm1, %v2256_v33, %v2245_v31 }
0x269a   :  { %v261_v29 = vpop.permute.xlu1 %260  ;;  %2258 = vrot.lane.b32.xlu1 %v2257_v5, %s2889_s29  ;;  %s2322_s29 = sshll.u32 %s2892_s1, 4  ;;  %s2323_s29 = int_to_ptr.vmem [resolvable:$true] %s2322_s29 }
0x269b   :  { %265 = vst.msk [vmem:[#allocation2 + $0x9] sm:$0x1] %vm142_vm3, %v261_v29  ;;  %s2838_s30 = scalar_lea.vmem %s2323_s29, 32  ;;  %p2843_p1 = scmp.lt.s32.totalorder %s2323_s29, %s2323_s29 }
0x269c   :  { %v259_v37 = vpop.permute.xlu0 %258  ;;  %p2839_p0 = scmp.ne.s32.totalorder %s2323_s29, %s2838_s30  ;;  %p2844_p2 = scmp.lt.s32.totalorder %s2838_s30, %s2838_s30 }
0x269d   :  { %264 = vst.msk [vmem:[#allocation2 + $0x1] sm:$0x1] %vm142_vm3, %v259_v37 }
0x269e   :  { %v381_v42 = vpop.permute.xlu1 %380  ;;  %p2845_p3 = por %p2844_p2, %p2843_p1 }
0x269f   :  { %385 = vst.msk [vmem:[#allocation2 + $0xa] sm:$0x1] %vm142_vm3, %v381_v42 }
0x26a0   :  { %v379_v60 = vpop.permute.xlu0 %378  ;;  %p2846_p4 = pnand %p2845_p3, %p2839_p0 }
0x26a1   :  { %384 = vst.msk [vmem:[#allocation2 + $0x2] sm:$0x1] %vm142_vm3, %v379_v60 }
0x26a2   :  { %v621_v35 = vpop.permute.xlu1 %620  ;;  %v2083_v25 = vld [vmem:[#allocation2 + $0x9] sm:$0x1] }
0x26a3   :  { %625 = vst.msk [vmem:[#allocation2 + $0xc] sm:$0x1] %vm142_vm3, %v621_v35  ;;  %v2086_v55 = vrot.slane %v2083_v25, 7 }
0x26a4   :  { %v501_v24 = vpop.permute.xlu0 %500  ;;  %v2082_v46 = vld [vmem:[#allocation2 + $0x1] sm:$0x1] }
0x26a5   :  { %505 = vst.msk [vmem:[#allocation2 + $0xb] sm:$0x1] %vm142_vm3, %v501_v24  ;;  %v2087_v31 = vsel %vm154_vm1, %v2086_v55, %v2082_v46  ;;  %v2891_v24 = vmov 1966171168  }
0x26a6   :  { %v861_v54 = vpop.permute.xlu1 %860 }
0x26a7   :  { %865 = vst.msk [vmem:[#allocation2 + $0xe] sm:$0x1] %vm142_vm3, %v861_v54  ;;  %v1121_v54 = vunpack.c.l.s4 %v2891_v24 }
0x26a8   :  { %v741_v22 = vpop.permute.xlu0 %740 }
0x26a9   :  { %745 = vst.msk [vmem:[#allocation2 + $0xd] sm:$0x1] %vm142_vm3, %v741_v22  ;;  %v1123_v22 = vlaneseq }
0x26aa   :  { %v499_v13 = vpop.permute.xlu1 %498  ;;  %v1588_v20 = vld [vmem:[#allocation2 + $0xc] sm:$0x1] }
0x26ab   :  { %504 = vst.msk [vmem:[#allocation2 + $0x3] sm:$0x1] %vm142_vm3, %v499_v13  ;;  %v1591_v30 = vrot.slane %v1588_v20, 7 }
0x26ac   :  { %v981_v21 = vpop.permute.xlu0 %980  ;;  %v1753_v36 = vld [vmem:[#allocation2 + $0xb] sm:$0x1] }
0x26ad   :  { %985 = vst.msk [vmem:[#allocation2 + $0xf] sm:$0x1] %vm142_vm3, %v981_v21  ;;  %v1756_v8 = vrot.slane %v1753_v36, 7 }
0x26ae   :  { %v739_v41 = vpop.permute.xlu1 %738  ;;  %v1258_v11 = vld [vmem:[#allocation2 + $0xe] sm:$0x1] }
0x26af   :  { %744 = vst.msk [vmem:[#allocation2 + $0x5] sm:$0x1] %vm142_vm3, %v739_v41  ;;  %v1261_v3 = vrot.slane %v1258_v11, 7 }
0x26b0   :  { %v619_v48 = vpop.permute.xlu0 %618  ;;  %v1423_v38 = vld [vmem:[#allocation2 + $0xd] sm:$0x1] }
0x26b1   :  { %624 = vst.msk [vmem:[#allocation2 + $0x4] sm:$0x1] %vm142_vm3, %v619_v48  ;;  %v1426_v53 = vrot.slane %v1423_v38, 7 }
0x26b2   :  { %v979_v49 = vpop.permute.xlu1 %978  ;;  %v1752_v23 = vld [vmem:[#allocation2 + $0x3] sm:$0x1] }
0x26b3   :  { %984 = vst.msk [vmem:[#allocation2 + $0x7] sm:$0x1] %vm142_vm3, %v979_v49  ;;  %v1757_v10 = vsel %vm154_vm1, %v1756_v8, %v1752_v23  ;;  %v1122_v49 = vunpack.c.0.s8 %v1121_v54 }
0x26b4   :  { %v859_v52 = vpop.permute.xlu0 %858  ;;  %v1090_v7 = vld [vmem:[#allocation2 + $0xf] sm:$0x1] }
0x26b5   :  { %864 = vst.msk [vmem:[#allocation2 + $0x6] sm:$0x1] %vm142_vm3, %v859_v52  ;;  %v1093_v32 = vrot.slane %v1090_v7, 7  ;;  %v1124_v52 = vshrl.u32 %v1123_v22, 7 }
0x26b6   :  { %v1269_v0 = vpop.permute.xlu1 %1268  ;;  %v1422_v26 = vld [vmem:[#allocation2 + $0x5] sm:$0x1] }
0x26b7   :  { %v1427_v34 = vsel %vm154_vm1, %v1426_v53, %v1422_v26 }
0x26b8   :  { %v1101_v58 = vpop.permute.xlu0 %1100  ;;  %v1587_v28 = vld [vmem:[#allocation2 + $0x4] sm:$0x1] }
0x26b9   :  { %v1592_v61 = vsel %vm154_vm1, %v1591_v30, %v1587_v28 }
0x26ba   :  { %v1089_v59 = vld [vmem:[#allocation2 + $0x7] sm:$0x1]  ;;  %v1599_v6 = vpop.permute.xlu1 %1598 }
0x26bb   :  { %v1094_v4 = vsel %vm154_vm1, %v1093_v32, %v1089_v59  ;;  %v1601_v44 = vsel %vm36_vm2, %v1592_v61, %v1599_v6  ;;  %v1917_v6 = vld [vmem:[#allocation2 + $0x2] sm:$0x1] }
0x26bc   :  { %v1103_v39 = vsel %vm36_vm2, %v1094_v4, %v1101_v58  ;;  %v1434_v45 = vpop.permute.xlu0 %1433  ;;  %v1257_v14 = vld [vmem:[#allocation2 + $0x6] sm:$0x1]  ;;  %v1602_v57 = vsel %vm1104_vm4, %v1601_v44, 0.0  ;;  %v1918_v58 = vld [vmem:[#allocation2 + $0xa] sm:$0x1] }
0x26bd   :  { %v1105_v62 = vsel %vm1104_vm4, %v1103_v39, 0.0  ;;  %v1262_v15 = vsel %vm154_vm1, %v1261_v3, %v1257_v14  ;;  %v1436_v56 = vsel %vm36_vm2, %v1427_v34, %v1434_v45  ;;  %v3542_v45 = vsub.s32 %v1122_v49, %v1124_v52 }
0x26be   :  { %1106 = vadd.xlane.f32.xlu1 %v1105_v62  ;;  %v3508_v2 = vpop.permute.xlu1 %1928  ;;  %v1271_v19 = vsel %vm36_vm2, %v1262_v15, %v1269_v0  ;;  %v1437_v40 = vsel %vm1104_vm4, %v1436_v56, 0.0 }
0x26bf   :  { %v1272_v18 = vsel %vm1104_vm4, %v1271_v19, 0.0 }
0x26c0   :  { %v1764_v27 = vpop.permute.xlu0 %1763 }
0x26c1   :  { %v1766_v43 = vsel %vm36_vm2, %v1757_v10, %v1764_v27  ;;  %v1921_v27 = vrot.slane %v1918_v58, 7 }
0x26c2   :  { %v1767_v33 = vsel %vm1104_vm4, %v1766_v43, 0.0 }
0x26c4   :  { %v2094_v50 = vpop.permute.xlu0 %2093 }
0x26c5   :  { %v2096_v1 = vsel %vm36_vm2, %v2087_v31, %v2094_v50  ;;  %v2248_v50 = vld [vmem:[#allocation2 + $0x8] sm:$0x1] }
0x26c6   :  { %v2097_v5 = vsel %vm1104_vm4, %v2096_v1, 0.0  ;;  %v2251_v3 = vrot.slane %v2248_v50, 7 }
0x26c8   :  { %v989_v63 = vpop.permute.xlu0 %988 }
0x26c9   :  { %992 = vst.msk [vmem:[#allocation4] sm:$0x3] %vm991_vm5, %v989_v63 }
0x270c   :  { %v3510_v9 = vpop.permute.xlu1 %2258 }
0x270d   :  { %2303 = vst.msk [vmem:[#allocation4] sm:$0x3] %vm2302_vm6, %v3510_v9 }
0x274b   :  { %v1107_v12 = vpop.xlane.xlu1 %1106 }
0x274c   :  { %v1109_v47 = vmul.f32 0.015625, %v1107_v12 }
0x274e   :  { %v3513_v51 = vsub.f32 %v1103_v39, %v1109_v47 }
0x2750   :  { %v1111_v16 = vmul.f32 %v3513_v51, %v3513_v51 }
0x2752   :  { %v1112_v17 = vsel %vm1104_vm4, %v1111_v16, 0.0  ;;  %v1922_v16 = vsel %vm154_vm1, %v1921_v27, %v1917_v6 }
0x2753   :  { %1113 = vadd.xlane.f32.xlu0 %v1112_v17 }
0x2757   :  { %1273 = vadd.xlane.f32.xlu0 %v1272_v18 }
0x275b   :  { %1438 = vadd.xlane.f32.xlu0 %v1437_v40 }
0x275f   :  { %1603 = vadd.xlane.f32.xlu0 %v1602_v57 }
0x2763   :  { %1768 = vadd.xlane.f32.xlu0 %v1767_v33 }
0x2767   :  { %2098 = vadd.xlane.f32.xlu0 %v2097_v5 }
0x27e0   :  { %v1114_v29 = vpop.xlane.xlu0 %1113 }
0x27e1   :  { %v1115_v37 = vmul.f32 0.015625, %v1114_v29 }
0x27e3   :  { %v1116_v42 = vadd.f32 1e-05, %v1115_v37 }
0x27e4   :  { %v1274_v60 = vpop.xlane.xlu0 %1273 }
0x27e5   :  { %2822 = vrsqrt.f32 %v1116_v42  ;;  %v1275_v35 = vmul.f32 0.015625, %v1274_v60 }
0x27e7   :  { %v3533_v13 = vsub.f32 %v1271_v19, %v1275_v35  ;;  %v1931_v19 = vsel %vm36_vm2, %v1922_v16, %v3508_v2 }
0x27e8   :  { %v1439_v21 = vpop.xlane.xlu0 %1438  ;;  %v1932_v2 = vsel %vm1104_vm4, %v1931_v19, 0.0 }
0x27e9   :  { %v1440_v41 = vmul.f32 0.015625, %v1439_v21  ;;  %v1277_v48 = vmul.f32 %v3533_v13, %v3533_v13 }
0x27eb   :  { %v3537_v7 = vsub.f32 %v1436_v56, %v1440_v41  ;;  %v1278_v32 = vsel %vm1104_vm4, %v1277_v48, 0.0 }
0x27ec   :  { %1279 = vadd.xlane.f32.xlu1 %v1278_v32  ;;  %v1604_v59 = vpop.xlane.xlu0 %1603 }
0x27ed   :  { %v1605_v4 = vmul.f32 0.015625, %v1604_v59  ;;  %v1442_v39 = vmul.f32 %v3537_v7, %v3537_v7 }
0x27ef   :  { %v2823_v62 = vpop.eup %2822  ;;  %v3544_v63 = vsub.f32 %v1601_v44, %v1605_v4  ;;  %v1443_v0 = vsel %vm1104_vm4, %v1442_v39, 0.0 }
0x27f0   :  { %v1118_v11 = vmul.f32 %v2823_v62, %v3513_v51  ;;  %1444 = vadd.xlane.f32.xlu1 %v1443_v0  ;;  %v1769_v12 = vpop.xlane.xlu0 %1768  ;;  %v2247_v51 = vld [vmem:[#allocation2] sm:$0x1] }
0x27f1   :  { %v1770_v47 = vmul.f32 0.015625, %v1769_v12  ;;  %v1607_v14 = vmul.f32 %v3544_v63, %v3544_v63  ;;  %v2252_v18 = vsel %vm154_vm1, %v2251_v3, %v2247_v51 }
0x27f2   :  { %v1126_v15 = vrot.slane %v1118_v11, %v3542_v45  ;;  %v2261_v36 = vsel %vm36_vm2, %v2252_v18, %v3510_v9 }
0x27f3   :  { %v3552_v38 = vsub.f32 %v1766_v43, %v1770_v47  ;;  %v1608_v17 = vsel %vm1104_vm4, %v1607_v14, 0.0  ;;  %v2262_v44 = vsel %vm1104_vm4, %v2261_v36, 0.0 }
0x27f4   :  { %v1127_v20 = vcombine.high %v1126_v15, %v1126_v15  ;;  %v1134_v26 = vrot.slane %v1126_v15, %v3542_v45  ;;  %1609 = vadd.xlane.f32.xlu1 %v1608_v17  ;;  %v2099_v53 = vpop.xlane.xlu0 %2098 }
0x27f5   :  { %v2100_v28 = vmul.f32 0.015625, %v2099_v53  ;;  %v1772_v30 = vmul.f32 %v3552_v38, %v3552_v38 }
0x27f6   :  { %v1141_v34 = vrot.slane %v1127_v20, %v3542_v45  ;;  %1145 = vst.msk [vmem:[#allocation2 + $0x7] sm:$0x1] %vm1144_vm7, %v1134_v26 }
0x27f7   :  { %v3563_v56 = vsub.f32 %v2096_v1, %v2100_v28  ;;  %v1773_v61 = vsel %vm1104_vm4, %v1772_v30, 0.0 }
0x27f8   :  { %1146 = vst.msk [vmem:[#allocation2 + $0xf] sm:$0x1] %vm1144_vm7, %v1141_v34  ;;  %1933 = vadd.xlane.f32.xlu1 %v1932_v2  ;;  %1774 = vadd.xlane.f32.xlu0 %v1773_v61 }
0x27f9   :  { %v2102_v40 = vmul.f32 %v3563_v56, %v3563_v56 }
0x27fb   :  { %v2103_v23 = vsel %vm1104_vm4, %v2102_v40, 0.0 }
0x27fc   :  { %2263 = vadd.xlane.f32.xlu1 %v2262_v44  ;;  %2104 = vadd.xlane.f32.xlu0 %v2103_v23 }
0x2879   :  { %v1280_v25 = vpop.xlane.xlu1 %1279 }
0x287a   :  { %v1281_v8 = vmul.f32 0.015625, %v1280_v25 }
0x287c   :  { %v1282_v10 = vadd.f32 1e-05, %v1281_v8 }
0x287d   :  { %v1445_v55 = vpop.xlane.xlu1 %1444 }
0x287e   :  { %2824 = vrsqrt.f32 %v1282_v10  ;;  %v1446_v57 = vmul.f32 0.015625, %v1445_v55 }
0x2880   :  { %v1447_v9 = vadd.f32 1e-05, %v1446_v57 }
0x2881   :  { %v1610_v43 = vpop.xlane.xlu1 %1609 }
0x2882   :  { %2826 = vrsqrt.f32 %v1447_v9  ;;  %v1611_v46 = vmul.f32 0.015625, %v1610_v43 }
0x2884   :  { %v1612_v31 = vadd.f32 1e-05, %v1611_v46 }
0x2885   :  { %v1934_v33 = vpop.xlane.xlu1 %1933  ;;  %v1775_v1 = vpop.xlane.xlu0 %1774 }
0x2886   :  { %2828 = vrsqrt.f32 %v1612_v31  ;;  %v1935_v5 = vmul.f32 0.015625, %v1934_v33  ;;  %v1776_v29 = vmul.f32 0.015625, %v1775_v1 }
0x2888   :  { %v2825_v37 = vpop.eup %2824  ;;  %v3574_v42 = vsub.f32 %v1931_v19, %v1935_v5  ;;  %v1777_v60 = vadd.f32 1e-05, %v1776_v29 }
0x2889   :  { %v1284_v35 = vmul.f32 %v2825_v37, %v3533_v13  ;;  %v2264_v24 = vpop.xlane.xlu1 %2263  ;;  %v2105_v54 = vpop.xlane.xlu0 %2104 }
0x288a   :  { %2830 = vrsqrt.f32 %v1777_v60  ;;  %v2265_v22 = vmul.f32 0.015625, %v2264_v24  ;;  %v2106_v21 = vmul.f32 0.015625, %v2105_v54  ;;  %v1937_v41 = vmul.f32 %v3574_v42, %v3574_v42 }
0x288b   :  { %v1292_v48 = vrot.slane %v1284_v35, %v3542_v45 }
0x288c   :  { %v2827_v49 = vpop.eup %2826  ;;  %v3580_v52 = vsub.f32 %v2261_v36, %v2265_v22  ;;  %v2107_v32 = vadd.f32 1e-05, %v2106_v21  ;;  %v1938_v58 = vsel %vm1104_vm4, %v1937_v41, 0.0 }
0x288d   :  { %v1293_v59 = vcombine.high %v1292_v48, %v1292_v48  ;;  %v1300_v4 = vrot.slane %v1292_v48, %v3542_v45  ;;  %v1449_v13 = vmul.f32 %v2827_v49, %v3537_v7  ;;  %1939 = vadd.xlane.f32.xlu1 %v1938_v58 }
0x288e   :  { %2832 = vrsqrt.f32 %v2107_v32  ;;  %v2267_v39 = vmul.f32 %v3580_v52, %v3580_v52 }
0x288f   :  { %v1307_v62 = vrot.slane %v1293_v59, %v3542_v45  ;;  %1310 = vst.msk [vmem:[#allocation2 + $0x6] sm:$0x1] %vm1144_vm7, %v1300_v4  ;;  %v1457_v27 = vrot.slane %v1449_v13, %v3542_v45 }
0x2890   :  { %v2829_v50 = vpop.eup %2828  ;;  %v2268_v0 = vsel %vm1104_vm4, %v2267_v39, 0.0 }
0x2891   :  { %1311 = vst.msk [vmem:[#allocation2 + $0xe] sm:$0x1] %vm1144_vm7, %v1307_v62  ;;  %v1458_v6 = vcombine.high %v1457_v27, %v1457_v27  ;;  %v1465_v11 = vrot.slane %v1457_v27, %v3542_v45  ;;  %v1614_v7 = vmul.f32 %v2829_v50, %v3544_v63  ;;  %2269 = vadd.xlane.f32.xlu1 %v2268_v0 }
0x2893   :  { %v1472_v12 = vrot.slane %v1458_v6, %v3542_v45  ;;  %1475 = vst.msk [vmem:[#allocation2 + $0x5] sm:$0x1] %vm1144_vm7, %v1465_v11  ;;  %v1622_v47 = vrot.slane %v1614_v7, %v3542_v45 }
0x2894   :  { %v2831_v14 = vpop.eup %2830 }
0x2895   :  { %1476 = vst.msk [vmem:[#allocation2 + $0xd] sm:$0x1] %vm1144_vm7, %v1472_v12  ;;  %v1623_v3 = vcombine.high %v1622_v47, %v1622_v47  ;;  %v1630_v15 = vrot.slane %v1622_v47, %v3542_v45  ;;  %v1779_v16 = vmul.f32 %v2831_v14, %v3552_v38 }
0x2897   :  { %v1637_v17 = vrot.slane %v1623_v3, %v3542_v45  ;;  %1640 = vst.msk [vmem:[#allocation2 + $0x4] sm:$0x1] %vm1144_vm7, %v1630_v15  ;;  %v1787_v63 = vrot.slane %v1779_v16, %v3542_v45 }
0x2898   :  { %v2833_v19 = vpop.eup %2832 }
0x2899   :  { %1641 = vst.msk [vmem:[#allocation2 + $0xc] sm:$0x1] %vm1144_vm7, %v1637_v17  ;;  %v1788_v51 = vcombine.high %v1787_v63, %v1787_v63  ;;  %v1795_v20 = vrot.slane %v1787_v63, %v3542_v45  ;;  %v2109_v26 = vmul.f32 %v2833_v19, %v3563_v56 }
0x289b   :  { %v1802_v53 = vrot.slane %v1788_v51, %v3542_v45  ;;  %1805 = vst.msk [vmem:[#allocation2 + $0x3] sm:$0x1] %vm1144_vm7, %v1795_v20  ;;  %v2117_v38 = vrot.slane %v2109_v26, %v3542_v45 }
0x289d   :  { %1806 = vst.msk [vmem:[#allocation2 + $0xb] sm:$0x1] %vm1144_vm7, %v1802_v53  ;;  %v2118_v28 = vcombine.high %v2117_v38, %v2117_v38  ;;  %v2125_v30 = vrot.slane %v2117_v38, %v3542_v45 }
0x289f   :  { %v2132_v34 = vrot.slane %v2118_v28, %v3542_v45  ;;  %2135 = vst.msk [vmem:[#allocation2 + $0x1] sm:$0x1] %vm1144_vm7, %v2125_v30 }
0x28a1   :  { %2136 = vst.msk [vmem:[#allocation2 + $0x9] sm:$0x1] %vm1144_vm7, %v2132_v34 }
0x28a2   :  { %2849 = shalt.err (!%p2846_p4)
}
0x28a3   :  { %s2850_s25 = scalar_lea.hbm %s3655_s5, 32 }
0x28a4   :  { %p2851_p5 = scmp.ne.s32.totalorder %s3655_s5, %s2850_s25  ;;  %p2854_p6 = scmp.lt.u32.totalorder %s2850_s25, %s3655_s5 }
0x28a6   :  { %p2856_p7 = pnand %p2854_p6, %p2851_p5 }
0x28a8   :  { %2859 = shalt.err (!%p2856_p7)
}
0x28a9   :  { %2325 = dma.vmem_to_hbm [thread:$0]  %s2323_s29, 32, %s3655_s5, [#allocation5]  }
0x28aa   :  { %s2893_s5 = smov [#allocation2]  }
0x28ab   :  { %s2309_s8 = sshll.u32 %s2893_s5, 4  ;;  %s2310_s8 = int_to_ptr.vmem [resolvable:$true] %s2309_s8 }
0x28ac   :  { %s2860_s9 = scalar_lea.vmem %s2310_s8, 256  ;;  %p2865_p9 = scmp.lt.s32.totalorder %s2310_s8, %s2310_s8 }
0x28ad   :  { %p2861_p8 = scmp.ne.s32.totalorder %s2310_s8, %s2860_s9  ;;  %p2866_p10 = scmp.lt.s32.totalorder %s2860_s9, %s2860_s9 }
0x28af   :  { %p2867_p11 = por %p2866_p10, %p2865_p9 }
0x28b1   :  { %p2868_p12 = pnand %p2867_p11, %p2861_p8 }
0x291a   :  { %v1940_v18 = vpop.xlane.xlu1 %1939 }
0x291b   :  { %v1941_v56 = vmul.f32 0.015625, %v1940_v18 }
0x291d   :  { %v1942_v2 = vadd.f32 1e-05, %v1941_v56 }
0x291e   :  { %v2270_v61 = vpop.xlane.xlu1 %2269 }
0x291f   :  { %2834 = vrsqrt.f32 %v1942_v2  ;;  %v2271_v36 = vmul.f32 0.015625, %v2270_v61 }
0x2921   :  { %v2272_v40 = vadd.f32 1e-05, %v2271_v36 }
0x2923   :  { %2836 = vrsqrt.f32 %v2272_v40 }
0x2929   :  { %v2835_v44 = vpop.eup %2834 }
0x292a   :  { %v1944_v23 = vmul.f32 %v2835_v44, %v3574_v42 }
0x292c   :  { %v1952_v25 = vrot.slane %v1944_v23, %v3542_v45 }
0x292d   :  { %v2837_v8 = vpop.eup %2836 }
0x292e   :  { %v1953_v10 = vcombine.high %v1952_v25, %v1952_v25  ;;  %v1960_v55 = vrot.slane %v1952_v25, %v3542_v45  ;;  %v2274_v57 = vmul.f32 %v2837_v8, %v3580_v52 }
0x2930   :  { %v1967_v9 = vrot.slane %v1953_v10, %v3542_v45  ;;  %1970 = vst.msk [vmem:[#allocation2 + $0x2] sm:$0x1] %vm1144_vm7, %v1960_v55  ;;  %v2282_v43 = vrot.slane %v2274_v57, %v3542_v45 }
0x2932   :  { %1971 = vst.msk [vmem:[#allocation2 + $0xa] sm:$0x1] %vm1144_vm7, %v1967_v9  ;;  %v2283_v46 = vcombine.high %v2282_v43, %v2282_v43  ;;  %v2290_v31 = vrot.slane %v2282_v43, %v3542_v45 }
0x2934   :  { %v2297_v33 = vrot.slane %v2283_v46, %v3542_v45  ;;  %2300 = vst.msk [vmem:[#allocation2] sm:$0x1] %vm1144_vm7, %v2290_v31 }
0x2936   :  { %2301 = vst.msk [vmem:[#allocation2 + $0x8] sm:$0x1] %vm1144_vm7, %v2297_v33 }
0x2937   :  { %2871 = shalt.err (!%p2868_p12)
}
0x2938   :  { %s2872_s11 = scalar_lea.hbm %s3654_s4, 256 }
0x2939   :  { %p2873_p13 = scmp.ne.s32.totalorder %s3654_s4, %s2872_s11  ;;  %p2876_p0 = scmp.lt.u32.totalorder %s2872_s11, %s3654_s4 }
0x293b   :  { %p2878_p1 = pnand %p2876_p0, %p2873_p13 }
0x293d   :  { %2881 = shalt.err (!%p2878_p1)
}
0x293e   :  { %s2894_s16 = smov 128   ;;  %s2895_s17 = smov 8  }
0x293f   :  { %2315 = dma.vmem_to_hbm [thread:$0]  %s2310_s8, 256, %s3654_s4, [#allocation3], %s2894_s16, %s2894_s16, %s2895_s17  }
0x2940   :  { %2882 = dma.done.wait [#allocation3], 256  }
0x2941   :  { %2883 = vsyncadd [#allocation3], 4294967040 }
0x2942   :  { %2884 = dma.done.wait [#allocation5], 32  }
0x2943   :  { %2885 = vsyncadd [#allocation5], 4294967264 }
0x2944   :  { %2332 = vsyncpa [#allocation3], 1 }
0x2945   :  { %2333 = vsyncpa [#allocation5], 1 }

</bundles_post_ra>
